<compile_context>
chip_gen: v7x
topology: tpu7x:2x2x1
jax: 0.10.0
libtpu: 0.0.40
codegen_flags: <defaults>
</compile_context>

<pallas_src>
import functools

import jax
import jax.numpy as jnp
from jax.experimental import pallas as pl
from jax.experimental.pallas import tpu as pltpu

# ----------------------------- config (module defaults) ------------------------------
WEIGHT_BIT = 8
ACT_BIT = 8
BIAS_BIT = 16
ALPHA = 123.0                                    # alpha_coeff of PACT_QuantReLU
ACT_SCALE = (2.0 ** ACT_BIT - 1.0) / ALPHA       # uniform act-quant step over [0, alpha]
LANE = 128                                       # TPU lane width


def _act_quant(y):
    """PACT ReLU: clamp to [0, alpha], then fake-quantize to ACT_BIT uniform levels."""
    y = jnp.clip(y, 0.0, ALPHA)
    return jnp.round(y * ACT_SCALE) * (1.0 / ACT_SCALE)


# ----------------------------- fused Pallas kernel ------------------------------------
def _make_residual33_kernel(H, W, cin, cp, b_tile):
    M = H * W                 # flattened output rows per image
    R = M + 2 * W             # rows of the wrapper-built, row-padded conv1 slab
    K1 = 3 * cin              # conv1 packed contraction
    K2 = 3 * cp               # conv2 packed contraction (384: fills v6e/v7x MXU depth)

    def kernel(xs_ref, w1_ref, wu_ref, w2_ref, aff_ref, o_ref, s_ref):
        g1 = aff_ref[0:1, :]
        t1 = aff_ref[1:2, :]
        g2 = aff_ref[2:3, :]
        t2 = aff_ref[3:4, :]
        gu = aff_ref[4:5, :]
        tu = aff_ref[5:6, :]

        # pixel column of each flat output row (edge masks for the conv2 dx taps)
        col = jax.lax.broadcasted_iota(jnp.int32, (M, 1), 0) % W
        not_last_col = col != (W - 1)   # pixel may serve as somebody's LEFT neighbour
        not_first_col = col != 0        # pixel may serve as somebody's RIGHT neighbour

        # Zero the never-data-written halo rows of the y1 staging scratch.  Re-done
        # every grid step (only 2*(W+1) rows) so it stays correct if the "parallel"
        # batch axis is split across TensorCores (each core owns its own scratch).
        halo = jnp.zeros((W + 1, K2), jnp.bfloat16)
        s_ref[pl.ds(0, W + 1), :] = halo
        s_ref[pl.ds(M + W - 1, W + 1), :] = halo

        for b in range(b_tile):                       # static inner batch loop
            x_img = xs_ref.at[b]                      # (R, 3*cin) bf16 view

            # ---- conv1 (3x3): 3 MXU dots over the K-packed dx taps ------------------
            acc1 = jnp.dot(x_img[pl.ds(0 * W, M), :], w1_ref[0],
                           preferred_element_type=jnp.float32)
            acc1 += jnp.dot(x_img[pl.ds(1 * W, M), :], w1_ref[1],
                            preferred_element_type=jnp.float32)
            acc1 += jnp.dot(x_img[pl.ds(2 * W, M), :], w1_ref[2],
                            preferred_element_type=jnp.float32)

            # ---- bn1 fold + PACT/uint8 act1; stage y1 in bf16 with dx shifts baked --
            y1 = _act_quant(acc1 * g1 + t1).astype(jnp.bfloat16)      # (M, cp)
            zero = jnp.zeros_like(y1)
            # dx=1 (centre) column block
            s_ref[pl.ds(W, M), pl.ds(cp, cp)] = y1
            # dx=0 block: pixel j feeds output j+1 iff j is not in the last column
            s_ref[pl.ds(W + 1, M), pl.ds(0, cp)] = jnp.where(not_last_col, y1, zero)
            # dx=2 block: pixel j feeds output j-1 iff j is not in the first column
            s_ref[pl.ds(W - 1, M), pl.ds(2 * cp, cp)] = jnp.where(not_first_col, y1, zero)

            # ---- conv2 (3x3): 3 MXU dots, contiguous unmasked (M, 3*cp) slab reads ---
            acc2 = jnp.dot(s_ref[pl.ds(0 * W, M), :], w2_ref[0],
                           preferred_element_type=jnp.float32)
            acc2 += jnp.dot(s_ref[pl.ds(1 * W, M), :], w2_ref[1],
                            preferred_element_type=jnp.float32)
            acc2 += jnp.dot(s_ref[pl.ds(2 * W, M), :], w2_ref[2],
                            preferred_element_type=jnp.float32)

            # ---- residual path: 1x1 upscale conv + bn_up, issued AFTER conv2 so the
            #      (M, cp) f32 value is never live across the conv2 dots ---------------
            res = jnp.dot(x_img[pl.ds(W, M), :], wu_ref[...],
                          preferred_element_type=jnp.float32)

            # ---- bn2 fold + residual add + final PACT act; bf16 lane-dense store -----
            out = _act_quant(acc2 * g2 + t2 + res * gu + tu)
            o_ref[b] = out.astype(jnp.bfloat16)

    return kernel, M, R


def _pick_batch_tile(n):
    """Amortize per-grid-step overhead while keeping >=2 grid steps (2 TCs on v7x)."""
    for bt in (8, 4, 2):
        if n % bt == 0 and n // bt >= 2:
            return bt
    return 1


def residual33_block(xs, w1_k, wu_k, w2_k, aff, *, H, W):
    n, r, k1 = xs.shape
    cp = aff.shape[-1]
    b_tile = _pick_batch_tile(n)
    kernel, M, R = _make_residual33_kernel(H, W, k1 // 3, cp, b_tile)
    assert r == R and n % b_tile == 0

    return pl.pallas_call(
        kernel,
        out_shape=jax.ShapeDtypeStruct((n, M, cp), jnp.bfloat16),
        grid_spec=pltpu.PrefetchScalarGridSpec(
            num_scalar_prefetch=0,
            grid=(n // b_tile,),
            in_specs=[
                pl.BlockSpec((b_tile, R, k1), lambda i: (i, 0, 0)),   # conv1 input slab
                pl.BlockSpec((3, k1, cp), lambda i: (0, 0, 0)),       # resident weights
                pl.BlockSpec((k1, cp), lambda i: (0, 0)),
                pl.BlockSpec((3, 3 * cp, cp), lambda i: (0, 0, 0)),
                pl.BlockSpec((8, cp), lambda i: (0, 0)),              # folded scale/bias
            ],
            out_specs=pl.BlockSpec((b_tile, M, cp), lambda i: (i, 0, 0)),
            scratch_shapes=[pltpu.VMEM((M + 2 * W, 3 * cp), jnp.bfloat16)],
        ),
        compiler_params=pltpu.CompilerParams(
            dimension_semantics=("parallel",),          # 2 TCs on v7x split the batch
            vmem_limit_bytes=32 * 1024 * 1024,
        ),
    )(xs, w1_k, wu_k, w2_k, aff)


# ----------------------------- parameter prep (plain JAX glue) ------------------------
def fake_quant_tensor(w, bits):
    """'scale' fake quant: symmetric, per-tensor, round-to-scale."""
    max_abs = jnp.maximum(jnp.max(jnp.abs(w)), 1e-8)
    scale = (2.0 ** (bits - 1) - 1.0) / max_abs
    return jnp.round(w * scale) / scale


def init_params(key, in_ch, out_ch):
    """Conv weights/biases like PyTorch (+-1/sqrt(fan_in)); BN-scale-bias per channel."""
    ks = jax.random.split(key, 12)

    def u(k, shape, fan_in):
        bound = 1.0 / jnp.sqrt(fan_in)
        return jax.random.uniform(k, shape, jnp.float32, -bound, bound)

    return dict(
        w1=u(ks[0], (3, 3, in_ch, out_ch), 9 * in_ch),       # res_block.l1 (3x3, HWIO)
        b1=u(ks[1], (out_ch,), 9 * in_ch),
        g1=1.0 + 0.1 * jax.random.normal(ks[2], (out_ch,)),  # bn1 scale / shift
        s1=0.1 * jax.random.normal(ks[3], (out_ch,)),
        w2=u(ks[4], (3, 3, out_ch, out_ch), 9 * out_ch),     # res_block.l2 (3x3)
        b2=u(ks[5], (out_ch,), 9 * out_ch),
        g2=1.0 + 0.1 * jax.random.normal(ks[6], (out_ch,)),  # bn2
        s2=0.1 * jax.random.normal(ks[7], (out_ch,)),
        wu=u(ks[8], (1, 1, in_ch, out_ch), in_ch),           # upscale 1x1 conv
        bu=u(ks[9], (out_ch,), in_ch),
        gu=1.0 + 0.1 * jax.random.normal(ks[10], (out_ch,)), # bn_up
        su=0.1 * jax.random.normal(ks[11], (out_ch,)),
    )


def prepare_params(params):
    """Fake-quant weights/biases, fold conv-bias + BN into per-channel affines, pad
    output channels (lanes) to 128, and K-pack the 3 dx taps of each dy along the MXU
    contraction axis (packed row dx*C + c multiplies slab channel dx*C + c)."""
    cin, cout = params["w1"].shape[2], params["w1"].shape[3]
    cp = ((cout + LANE - 1) // LANE) * LANE
    pad_c = cp - cout

    w1q = fake_quant_tensor(params["w1"], WEIGHT_BIT)
    w2q = fake_quant_tensor(params["w2"], WEIGHT_BIT)
    wuq = fake_quant_tensor(params["wu"], WEIGHT_BIT)
    b1q = fake_quant_tensor(params["b1"], BIAS_BIT)
    b2q = fake_quant_tensor(params["b2"], BIAS_BIT)
    buq = fake_quant_tensor(params["bu"], BIAS_BIT)

    w1p = jnp.pad(w1q, ((0, 0), (0, 0), (0, 0), (0, pad_c)))        # (3,3,cin,cp)
    w2p = jnp.pad(w2q, ((0, 0), (0, 0), (0, pad_c), (0, pad_c)))    # (3,3,cp,cp)
    wup = jnp.pad(wuq, ((0, 0), (0, 0), (0, 0), (0, pad_c)))        # (1,1,cin,cp)
    w1_k = w1p.reshape(3, 3 * cin, cp)                              # per-dy (3*cin, cp)
    w2_k = w2p.reshape(3, 3 * cp, cp)                               # per-dy (3*cp, cp)
    # 1x1 residual conv packed against the dy=1 slab: only the centre slot is nonzero.
    wu_k = jnp.concatenate([jnp.zeros((cin, cp), jnp.float32),
                            wup.reshape(cin, cp),
                            jnp.zeros((cin, cp), jnp.float32)], axis=0)

    def fold(g_bn, s_bn, bq):
        g = jnp.pad(g_bn, (0, pad_c), constant_values=1.0)
        t = jnp.pad(g_bn * bq + s_bn, (0, pad_c))
        return g, t

    g1, t1 = fold(params["g1"], params["s1"], b1q)
    g2, t2 = fold(params["g2"], params["s2"], b2q)
    gu, tu = fold(params["gu"], params["su"], buq)
    zero = jnp.zeros((cp,), jnp.float32)
    aff = jnp.stack([g1, t1, g2, t2, gu, tu, zero, zero]).astype(jnp.float32)  # (8, cp)

    return dict(w1=w1_k.astype(jnp.bfloat16), wu=wu_k.astype(jnp.bfloat16),
                w2=w2_k.astype(jnp.bfloat16), aff=aff)


@functools.partial(jax.jit, static_argnames=("cout",))
def pallas_forward(x_nchw, prep, *, cout):
    """Forward of Quant_ResidualBlock_brevitas (Residual33, no halving, no SE)."""
    x = jnp.transpose(x_nchw, (0, 2, 3, 1)).astype(jnp.bfloat16)    # NCHW -> NHWC
    n, h, w, cin = x.shape

    # Build the conv1 K-packed slab in the wrapper (3x the tiny input bytes, zero
    # in-kernel masking): channels [x(r,c-1) | x(r,c) | x(r,c+1)] with zeros at the
    # left/right image borders, flattened spatially, plus W zero rows on top/bottom so
    # the dy-th conv1 tap of output row m is the contiguous slab row dy*W + m.
    zcol = jnp.zeros((n, h, 1, cin), jnp.bfloat16)
    x_left = jnp.concatenate([zcol, x[:, :, :-1, :]], axis=2)
    x_right = jnp.concatenate([x[:, :, 1:, :], zcol], axis=2)
    slab = jnp.concatenate([x_left, x, x_right], axis=3).reshape(n, h * w, 3 * cin)
    zrow = jnp.zeros((n, w, 3 * cin), jnp.bfloat16)
    xs = jnp.concatenate([zrow, slab, zrow], axis=1)                # (N, M+2W, 3*cin)

    out = residual33_block(xs, prep["w1"], prep["wu"], prep["w2"], prep["aff"],
                           H=h, W=w)
    out = out[..., :cout].astype(jnp.float32).reshape(n, h, w, cout)
    return jnp.transpose(out, (0, 3, 1, 2))                         # NHWC -> NCHW


# ----------------------------- pure-JAX reference (for sanity) ------------------------
def reference_forward(x_nchw, prep, cout):
    x = jnp.transpose(x_nchw, (0, 2, 3, 1)).astype(jnp.bfloat16)
    n, h, w, cin = x.shape
    cp = prep["aff"].shape[-1]
    dn = ("NHWC", "HWIO", "NHWC")

    def conv(inp, wgt):
        return jax.lax.conv_general_dilated(
            inp, wgt, (1, 1), "SAME", dimension_numbers=dn,
            preferred_element_type=jnp.float32)

    w1 = prep["w1"].reshape(3, 3, cin, cp)
    w2 = prep["w2"].reshape(3, 3, cp, cp)
    wu = prep["wu"][cin:2 * cin, :].reshape(1, 1, cin, cp)
    aff = prep["aff"]
    g1, t1, g2, t2, gu, tu = (aff[i] for i in range(6))

    y1 = _act_quant(conv(x, w1) * g1 + t1)
    res = conv(x, wu) * gu + tu
    out = _act_quant(conv(y1.astype(jnp.bfloat16), w2) * g2 + t2 + res)
    return jnp.transpose(out[..., :cout], (0, 3, 1, 2))


# ----------------------------- main ----------------------------------------------------
if __name__ == "__main__":
    key = jax.random.PRNGKey(0)
    kx, kp = jax.random.split(key)

    N, Cin, Cout, H, W = 2, 4, 8, 16, 16
    # scale inputs so the uint8 act grid (step ~0.48) is exercised over many codes
    x = 10.0 * jax.random.normal(kx, (N, Cin, H, W), jnp.float32)
    params = init_params(kp, Cin, Cout)
    prep = prepare_params(params)

    out = pallas_forward(x, prep, cout=Cout)
    out = jax.block_until_ready(out)
    assert out.shape == (N, Cout, H, W), out.shape

    ref = reference_forward(x, prep, Cout)
    err = jnp.abs(out - ref)
    max_err = float(jnp.max(err))
    mean_err = float(jnp.mean(err))
    # Both paths use identical bf16 operands with f32 accumulation; differences are
    # limited to isolated one-step flips of the act quantizers (step ~0.48), their
    # small propagation through conv2, and the bf16 output representation error.
    qstep = ALPHA / (2.0 ** ACT_BIT - 1.0)
    assert max_err <= 2.0 * qstep, (max_err, qstep)
    assert mean_err < 0.05, mean_err

    print("KERNEL_OK")
</pallas_src>

<mosaic_0001>
module attributes {stable_mosaic.version = 11 : i64} {
  func.func @kernel(%arg0: i32, %arg1: memref<1x288x12xbf16, #tpu.memory_space<vmem>>, %arg2: memref<3x12x128xbf16, #tpu.memory_space<vmem>>, %arg3: memref<12x128xbf16, #tpu.memory_space<vmem>>, %arg4: memref<3x384x128xbf16, #tpu.memory_space<vmem>>, %arg5: memref<8x128xf32, #tpu.memory_space<vmem>>, %arg6: memref<1x256x128xbf16, #tpu.memory_space<vmem>>, %arg7: memref<288x384xbf16, #tpu.memory_space<vmem>>) attributes {dimension_semantics = [#tpu.dimension_semantics<parallel>], iteration_bounds = array<i64: 2>, scalar_prefetch = 0 : i64, scratch_operands = 1 : i64, tpu.core_type = #tpu.core_type<tc>, window_params = [{transform_indices = @transform_0, window_bounds = array<i64: 1, 288, 12>}, {pipeline_mode = #tpu.pipeline_mode<synchronous>, transform_indices = @transform_1, window_bounds = array<i64: 3, 12, 128>}, {pipeline_mode = #tpu.pipeline_mode<synchronous>, transform_indices = @transform_2, window_bounds = array<i64: 12, 128>}, {pipeline_mode = #tpu.pipeline_mode<synchronous>, transform_indices = @transform_3, window_bounds = array<i64: 3, 384, 128>}, {pipeline_mode = #tpu.pipeline_mode<synchronous>, transform_indices = @transform_4, window_bounds = array<i64: 8, 128>}, {transform_indices = @transform_5, window_bounds = array<i64: 1, 256, 128>}]} {
    %c0 = arith.constant 0 : index
    %c0_0 = arith.constant 0 : index
    %0 = vector.load %arg5[%c0, %c0_0] : memref<8x128xf32, #tpu.memory_space<vmem>>, vector<1x128xf32>
    %c1 = arith.constant 1 : index
    %c0_1 = arith.constant 0 : index
    %1 = vector.load %arg5[%c1, %c0_1] : memref<8x128xf32, #tpu.memory_space<vmem>>, vector<1x128xf32>
    %c2 = arith.constant 2 : index
    %c0_2 = arith.constant 0 : index
    %2 = vector.load %arg5[%c2, %c0_2] : memref<8x128xf32, #tpu.memory_space<vmem>>, vector<1x128xf32>
    %c3 = arith.constant 3 : index
    %c0_3 = arith.constant 0 : index
    %3 = vector.load %arg5[%c3, %c0_3] : memref<8x128xf32, #tpu.memory_space<vmem>>, vector<1x128xf32>
    %c4 = arith.constant 4 : index
    %c0_4 = arith.constant 0 : index
    %4 = vector.load %arg5[%c4, %c0_4] : memref<8x128xf32, #tpu.memory_space<vmem>>, vector<1x128xf32>
    %c5 = arith.constant 5 : index
    %c0_5 = arith.constant 0 : index
    %5 = vector.load %arg5[%c5, %c0_5] : memref<8x128xf32, #tpu.memory_space<vmem>>, vector<1x128xf32>
    %6 = tpu.iota {dimensions = array<i32: 0>} : vector<256x1xi32>
    %c16_i32 = arith.constant 16 : i32
    %c0_i32 = arith.constant 0 : i32
    %7 = arith.cmpi eq, %c16_i32, %c0_i32 : i32
    %c1_i32 = arith.constant 1 : i32
    %8 = arith.select %7, %c1_i32, %c16_i32 : i32
    %9 = vector.broadcast %8 : i32 to vector<256x1xi32>
    %10 = arith.remsi %6, %9 : vector<256x1xi32>
    %c0_i32_6 = arith.constant 0 : i32
    %11 = vector.broadcast %c0_i32_6 : i32 to vector<256x1xi32>
    %12 = arith.cmpi ne, %10, %11 : vector<256x1xi32>
    %c0_i32_7 = arith.constant 0 : i32
    %13 = vector.broadcast %c0_i32_7 : i32 to vector<256x1xi32>
    %14 = arith.cmpi slt, %10, %13 : vector<256x1xi32>
    %c0_i32_8 = arith.constant 0 : i32
    %15 = arith.cmpi slt, %8, %c0_i32_8 : i32
    %16 = vector.broadcast %15 : i1 to vector<256x1xi1>
    %17 = vector.broadcast %16 : vector<256x1xi1> to vector<256x1xi1>
    %18 = arith.xori %14, %17 : vector<256x1xi1>
    %19 = arith.andi %18, %12 : vector<256x1xi1>
    %20 = vector.broadcast %8 : i32 to vector<256x1xi32>
    %21 = arith.addi %10, %20 : vector<256x1xi32>
    %22 = arith.select %19, %21, %10 : vector<256x1xi1>, vector<256x1xi32>
    %c15_i32 = arith.constant 15 : i32
    %23 = vector.broadcast %c15_i32 : i32 to vector<256x1xi32>
    %24 = arith.cmpi ne, %22, %23 : vector<256x1xi32>
    %c0_i32_9 = arith.constant 0 : i32
    %25 = vector.broadcast %c0_i32_9 : i32 to vector<256x1xi32>
    %26 = arith.cmpi ne, %22, %25 : vector<256x1xi32>
    %cst = arith.constant 0.000000e+00 : bf16
    %27 = vector.broadcast %cst : bf16 to vector<17x384xbf16>
    %c0_10 = arith.constant 0 : index
    %c0_11 = arith.constant 0 : index
    %28 = vector.load %arg7[%c0_10, %c0_11] : memref<288x384xbf16, #tpu.memory_space<vmem>>, vector<17x384xbf16>
    tpu.vector_store %arg7[%c0_10, %c0_11], %27 {strides = array<i32>} : memref<288x384xbf16, #tpu.memory_space<vmem>>, vector<17x384xbf16>,
    %c271 = arith.constant 271 : index
    %c0_12 = arith.constant 0 : index
    %29 = vector.load %arg7[%c271, %c0_12] : memref<288x384xbf16, #tpu.memory_space<vmem>>, vector<17x384xbf16>
    tpu.vector_store %arg7[%c271, %c0_12], %27 {strides = array<i32>} : memref<288x384xbf16, #tpu.memory_space<vmem>>, vector<17x384xbf16>,
    %c0_i32_13 = arith.constant 0 : i32
    %c0_i32_14 = arith.constant 0 : i32
    %c0_i32_15 = arith.constant 0 : i32
    %30 = tpu.memref_slice %arg1[%c0_i32_13, %c0_i32_14, %c0_i32_15] : memref<1x288x12xbf16, #tpu.memory_space<vmem>> -> memref<1x288x12xbf16, #tpu.memory_space<vmem>>
    %31 = tpu.memref_squeeze %30 : memref<1x288x12xbf16, #tpu.memory_space<vmem>> -> memref<288x12xbf16, #tpu.memory_space<vmem>>
    %c0_16 = arith.constant 0 : index
    %c0_17 = arith.constant 0 : index
    %32 = vector.load %31[%c0_16, %c0_17] : memref<288x12xbf16, #tpu.memory_space<vmem>>, vector<256x12xbf16>
    %c0_18 = arith.constant 0 : index
    %c0_19 = arith.constant 0 : index
    %c0_20 = arith.constant 0 : index
    %33 = vector.load %arg2[%c0_18, %c0_19, %c0_20] : memref<3x12x128xbf16, #tpu.memory_space<vmem>>, vector<1x12x128xbf16>
    %34 = vector.shape_cast %33 : vector<1x12x128xbf16> to vector<12x128xbf16>
    %cst_21 = arith.constant dense<0.000000e+00> : vector<256x128xf32>
    %35 = tpu.matmul %32, %34, %cst_21 {dimension_numbers = #tpu.dot_dimension_numbers<[1], [0], [0], [1], [0, 0, 1, 1], [], []>} : vector<256x12xbf16>, vector<12x128xbf16>, vector<256x128xf32> -> vector<256x128xf32>
    %c0_i32_22 = arith.constant 0 : i32
    %c0_i32_23 = arith.constant 0 : i32
    %c0_i32_24 = arith.constant 0 : i32
    %36 = tpu.memref_slice %arg1[%c0_i32_22, %c0_i32_23, %c0_i32_24] : memref<1x288x12xbf16, #tpu.memory_space<vmem>> -> memref<1x288x12xbf16, #tpu.memory_space<vmem>>
    %37 = tpu.memref_squeeze %36 : memref<1x288x12xbf16, #tpu.memory_space<vmem>> -> memref<288x12xbf16, #tpu.memory_space<vmem>>
    %c16 = arith.constant 16 : index
    %c0_25 = arith.constant 0 : index
    %38 = vector.load %37[%c16, %c0_25] : memref<288x12xbf16, #tpu.memory_space<vmem>>, vector<256x12xbf16>
    %c1_26 = arith.constant 1 : index
    %c0_27 = arith.constant 0 : index
    %c0_28 = arith.constant 0 : index
    %39 = vector.load %arg2[%c1_26, %c0_27, %c0_28] : memref<3x12x128xbf16, #tpu.memory_space<vmem>>, vector<1x12x128xbf16>
    %40 = vector.shape_cast %39 : vector<1x12x128xbf16> to vector<12x128xbf16>
    %cst_29 = arith.constant dense<0.000000e+00> : vector<256x128xf32>
    %41 = tpu.matmul %38, %40, %cst_29 {dimension_numbers = #tpu.dot_dimension_numbers<[1], [0], [0], [1], [0, 0, 1, 1], [], []>} : vector<256x12xbf16>, vector<12x128xbf16>, vector<256x128xf32> -> vector<256x128xf32>
    %42 = arith.addf %35, %41 : vector<256x128xf32>
    %c0_i32_30 = arith.constant 0 : i32
    %c0_i32_31 = arith.constant 0 : i32
    %c0_i32_32 = arith.constant 0 : i32
    %43 = tpu.memref_slice %arg1[%c0_i32_30, %c0_i32_31, %c0_i32_32] : memref<1x288x12xbf16, #tpu.memory_space<vmem>> -> memref<1x288x12xbf16, #tpu.memory_space<vmem>>
    %44 = tpu.memref_squeeze %43 : memref<1x288x12xbf16, #tpu.memory_space<vmem>> -> memref<288x12xbf16, #tpu.memory_space<vmem>>
    %c32 = arith.constant 32 : index
    %c0_33 = arith.constant 0 : index
    %45 = vector.load %44[%c32, %c0_33] : memref<288x12xbf16, #tpu.memory_space<vmem>>, vector<256x12xbf16>
    %c2_34 = arith.constant 2 : index
    %c0_35 = arith.constant 0 : index
    %c0_36 = arith.constant 0 : index
    %46 = vector.load %arg2[%c2_34, %c0_35, %c0_36] : memref<3x12x128xbf16, #tpu.memory_space<vmem>>, vector<1x12x128xbf16>
    %47 = vector.shape_cast %46 : vector<1x12x128xbf16> to vector<12x128xbf16>
    %cst_37 = arith.constant dense<0.000000e+00> : vector<256x128xf32>
    %48 = tpu.matmul %45, %47, %cst_37 {dimension_numbers = #tpu.dot_dimension_numbers<[1], [0], [0], [1], [0, 0, 1, 1], [], []>} : vector<256x12xbf16>, vector<12x128xbf16>, vector<256x128xf32> -> vector<256x128xf32>
    %49 = arith.addf %42, %48 : vector<256x128xf32>
    %50 = vector.broadcast %0 : vector<1x128xf32> to vector<256x128xf32>
    %51 = arith.mulf %49, %50 : vector<256x128xf32>
    %52 = vector.broadcast %1 : vector<1x128xf32> to vector<256x128xf32>
    %53 = arith.addf %51, %52 : vector<256x128xf32>
    %cst_38 = arith.constant 0.000000e+00 : f32
    %cst_39 = arith.constant 1.230000e+02 : f32
    %54 = vector.broadcast %cst_38 : f32 to vector<256x128xf32>
    %55 = arith.maximumf %54, %53 : vector<256x128xf32>
    %56 = vector.broadcast %cst_39 : f32 to vector<256x128xf32>
    %57 = arith.minimumf %56, %55 : vector<256x128xf32>
    %cst_40 = arith.constant 2.07317066 : f32
    %58 = vector.broadcast %cst_40 : f32 to vector<256x128xf32>
    %59 = arith.mulf %57, %58 : vector<256x128xf32>
    %60 = math.roundeven %59 : vector<256x128xf32>
    %cst_41 = arith.constant 0.482352942 : f32
    %61 = vector.broadcast %cst_41 : f32 to vector<256x128xf32>
    %62 = arith.mulf %60, %61 : vector<256x128xf32>
    %63 = arith.truncf %62 : vector<256x128xf32> to vector<256x128xbf16>
    %cst_42 = arith.constant 0.000000e+00 : bf16
    %64 = vector.broadcast %cst_42 : bf16 to vector<256x128xbf16>
    %c16_43 = arith.constant 16 : index
    %c128 = arith.constant 128 : index
    %65 = vector.load %arg7[%c16_43, %c128] : memref<288x384xbf16, #tpu.memory_space<vmem>>, vector<256x128xbf16>
    tpu.vector_store %arg7[%c16_43, %c128], %63 {strides = array<i32>} : memref<288x384xbf16, #tpu.memory_space<vmem>>, vector<256x128xbf16>,
    %66 = vector.shape_cast %24 : vector<256x1xi1> to vector<256x1xi1>
    %67 = vector.broadcast %66 : vector<256x1xi1> to vector<256x128xi1>
    %68 = arith.select %67, %63, %64 : vector<256x128xi1>, vector<256x128xbf16>
    %c17 = arith.constant 17 : index
    %c0_44 = arith.constant 0 : index
    %69 = vector.load %arg7[%c17, %c0_44] : memref<288x384xbf16, #tpu.memory_space<vmem>>, vector<256x128xbf16>
    tpu.vector_store %arg7[%c17, %c0_44], %68 {strides = array<i32>} : memref<288x384xbf16, #tpu.memory_space<vmem>>, vector<256x128xbf16>,
    %70 = vector.shape_cast %26 : vector<256x1xi1> to vector<256x1xi1>
    %71 = vector.broadcast %70 : vector<256x1xi1> to vector<256x128xi1>
    %72 = arith.select %71, %63, %64 : vector<256x128xi1>, vector<256x128xbf16>
    %c15 = arith.constant 15 : index
    %c256 = arith.constant 256 : index
    %73 = vector.load %arg7[%c15, %c256] : memref<288x384xbf16, #tpu.memory_space<vmem>>, vector<256x128xbf16>
    tpu.vector_store %arg7[%c15, %c256], %72 {strides = array<i32>} : memref<288x384xbf16, #tpu.memory_space<vmem>>, vector<256x128xbf16>,
    %c0_45 = arith.constant 0 : index
    %c0_46 = arith.constant 0 : index
    %74 = vector.load %arg7[%c0_45, %c0_46] : memref<288x384xbf16, #tpu.memory_space<vmem>>, vector<256x384xbf16>
    %c0_47 = arith.constant 0 : index
    %c0_48 = arith.constant 0 : index
    %c0_49 = arith.constant 0 : index
    %75 = vector.load %arg4[%c0_47, %c0_48, %c0_49] : memref<3x384x128xbf16, #tpu.memory_space<vmem>>, vector<1x384x128xbf16>
    %76 = vector.shape_cast %75 : vector<1x384x128xbf16> to vector<384x128xbf16>
    %cst_50 = arith.constant dense<0.000000e+00> : vector<256x128xf32>
    %77 = tpu.matmul %74, %76, %cst_50 {dimension_numbers = #tpu.dot_dimension_numbers<[1], [0], [0], [1], [0, 0, 1, 1], [], []>} : vector<256x384xbf16>, vector<384x128xbf16>, vector<256x128xf32> -> vector<256x128xf32>
    %c16_51 = arith.constant 16 : index
    %c0_52 = arith.constant 0 : index
    %78 = vector.load %arg7[%c16_51, %c0_52] : memref<288x384xbf16, #tpu.memory_space<vmem>>, vector<256x384xbf16>
    %c1_53 = arith.constant 1 : index
    %c0_54 = arith.constant 0 : index
    %c0_55 = arith.constant 0 : index
    %79 = vector.load %arg4[%c1_53, %c0_54, %c0_55] : memref<3x384x128xbf16, #tpu.memory_space<vmem>>, vector<1x384x128xbf16>
    %80 = vector.shape_cast %79 : vector<1x384x128xbf16> to vector<384x128xbf16>
    %cst_56 = arith.constant dense<0.000000e+00> : vector<256x128xf32>
    %81 = tpu.matmul %78, %80, %cst_56 {dimension_numbers = #tpu.dot_dimension_numbers<[1], [0], [0], [1], [0, 0, 1, 1], [], []>} : vector<256x384xbf16>, vector<384x128xbf16>, vector<256x128xf32> -> vector<256x128xf32>
    %82 = arith.addf %77, %81 : vector<256x128xf32>
    %c32_57 = arith.constant 32 : index
    %c0_58 = arith.constant 0 : index
    %83 = vector.load %arg7[%c32_57, %c0_58] : memref<288x384xbf16, #tpu.memory_space<vmem>>, vector<256x384xbf16>
    %c2_59 = arith.constant 2 : index
    %c0_60 = arith.constant 0 : index
    %c0_61 = arith.constant 0 : index
    %84 = vector.load %arg4[%c2_59, %c0_60, %c0_61] : memref<3x384x128xbf16, #tpu.memory_space<vmem>>, vector<1x384x128xbf16>
    %85 = vector.shape_cast %84 : vector<1x384x128xbf16> to vector<384x128xbf16>
    %cst_62 = arith.constant dense<0.000000e+00> : vector<256x128xf32>
    %86 = tpu.matmul %83, %85, %cst_62 {dimension_numbers = #tpu.dot_dimension_numbers<[1], [0], [0], [1], [0, 0, 1, 1], [], []>} : vector<256x384xbf16>, vector<384x128xbf16>, vector<256x128xf32> -> vector<256x128xf32>
    %87 = arith.addf %82, %86 : vector<256x128xf32>
    %c0_i32_63 = arith.constant 0 : i32
    %c0_i32_64 = arith.constant 0 : i32
    %c0_i32_65 = arith.constant 0 : i32
    %88 = tpu.memref_slice %arg1[%c0_i32_63, %c0_i32_64, %c0_i32_65] : memref<1x288x12xbf16, #tpu.memory_space<vmem>> -> memref<1x288x12xbf16, #tpu.memory_space<vmem>>
    %89 = tpu.memref_squeeze %88 : memref<1x288x12xbf16, #tpu.memory_space<vmem>> -> memref<288x12xbf16, #tpu.memory_space<vmem>>
    %c16_66 = arith.constant 16 : index
    %c0_67 = arith.constant 0 : index
    %90 = vector.load %89[%c16_66, %c0_67] : memref<288x12xbf16, #tpu.memory_space<vmem>>, vector<256x12xbf16>
    %c0_68 = arith.constant 0 : index
    %c0_69 = arith.constant 0 : index
    %91 = vector.load %arg3[%c0_68, %c0_69] : memref<12x128xbf16, #tpu.memory_space<vmem>>, vector<12x128xbf16>
    %cst_70 = arith.constant dense<0.000000e+00> : vector<256x128xf32>
    %92 = tpu.matmul %90, %91, %cst_70 {dimension_numbers = #tpu.dot_dimension_numbers<[1], [0], [0], [1], [0, 0, 1, 1], [], []>} : vector<256x12xbf16>, vector<12x128xbf16>, vector<256x128xf32> -> vector<256x128xf32>
    %93 = vector.broadcast %2 : vector<1x128xf32> to vector<256x128xf32>
    %94 = arith.mulf %87, %93 : vector<256x128xf32>
    %95 = vector.broadcast %3 : vector<1x128xf32> to vector<256x128xf32>
    %96 = arith.addf %94, %95 : vector<256x128xf32>
    %97 = vector.broadcast %4 : vector<1x128xf32> to vector<256x128xf32>
    %98 = arith.mulf %92, %97 : vector<256x128xf32>
    %99 = arith.addf %96, %98 : vector<256x128xf32>
    %100 = vector.broadcast %5 : vector<1x128xf32> to vector<256x128xf32>
    %101 = arith.addf %99, %100 : vector<256x128xf32>
    %cst_71 = arith.constant 0.000000e+00 : f32
    %cst_72 = arith.constant 1.230000e+02 : f32
    %102 = vector.broadcast %cst_71 : f32 to vector<256x128xf32>
    %103 = arith.maximumf %102, %101 : vector<256x128xf32>
    %104 = vector.broadcast %cst_72 : f32 to vector<256x128xf32>
    %105 = arith.minimumf %104, %103 : vector<256x128xf32>
    %cst_73 = arith.constant 2.07317066 : f32
    %106 = vector.broadcast %cst_73 : f32 to vector<256x128xf32>
    %107 = arith.mulf %105, %106 : vector<256x128xf32>
    %108 = math.roundeven %107 : vector<256x128xf32>
    %cst_74 = arith.constant 0.482352942 : f32
    %109 = vector.broadcast %cst_74 : f32 to vector<256x128xf32>
    %110 = arith.mulf %108, %109 : vector<256x128xf32>
    %111 = arith.truncf %110 : vector<256x128xf32> to vector<256x128xbf16>
    %c0_75 = arith.constant 0 : index
    %c0_76 = arith.constant 0 : index
    %c0_77 = arith.constant 0 : index
    %112 = vector.load %arg6[%c0_75, %c0_76, %c0_77] : memref<1x256x128xbf16, #tpu.memory_space<vmem>>, vector<1x256x128xbf16>
    %113 = vector.shape_cast %112 : vector<1x256x128xbf16> to vector<256x128xbf16>
    %114 = vector.shape_cast %111 : vector<256x128xbf16> to vector<1x256x128xbf16>
    tpu.vector_store %arg6[%c0_75, %c0_76, %c0_77], %114 {strides = array<i32>} : memref<1x256x128xbf16, #tpu.memory_space<vmem>>, vector<1x256x128xbf16>,
    return
  }
  func.func @transform_0(%arg0: i32) -> (i32, i32, i32) {
    %c0_i32 = arith.constant 0 : i32
    %c0_i32_0 = arith.constant 0 : i32
    %c0_i32_1 = arith.constant 0 : i32
    return %arg0, %c0_i32, %c0_i32_0 : i32, i32, i32
  }
  func.func @transform_1(%arg0: i32) -> (i32, i32, i32) {
    %c0_i32 = arith.constant 0 : i32
    %c0_i32_0 = arith.constant 0 : i32
    %c0_i32_1 = arith.constant 0 : i32
    %c0_i32_2 = arith.constant 0 : i32
    return %c0_i32, %c0_i32_0, %c0_i32_1 : i32, i32, i32
  }
  func.func @transform_2(%arg0: i32) -> (i32, i32) {
    %c0_i32 = arith.constant 0 : i32
    %c0_i32_0 = arith.constant 0 : i32
    %c0_i32_1 = arith.constant 0 : i32
    return %c0_i32, %c0_i32_0 : i32, i32
  }
  func.func @transform_3(%arg0: i32) -> (i32, i32, i32) {
    %c0_i32 = arith.constant 0 : i32
    %c0_i32_0 = arith.constant 0 : i32
    %c0_i32_1 = arith.constant 0 : i32
    %c0_i32_2 = arith.constant 0 : i32
    return %c0_i32, %c0_i32_0, %c0_i32_1 : i32, i32, i32
  }
  func.func @transform_4(%arg0: i32) -> (i32, i32) {
    %c0_i32 = arith.constant 0 : i32
    %c0_i32_0 = arith.constant 0 : i32
    %c0_i32_1 = arith.constant 0 : i32
    return %c0_i32, %c0_i32_0 : i32, i32
  }
  func.func @transform_5(%arg0: i32) -> (i32, i32, i32) {
    %c0_i32 = arith.constant 0 : i32
    %c0_i32_0 = arith.constant 0 : i32
    %c0_i32_1 = arith.constant 0 : i32
    return %arg0, %c0_i32, %c0_i32_0 : i32, i32, i32
  }
}

</mosaic_0001>

<bundles_post_ra>
// kernel: pallas_forward.1
= control target key start
LH: loop header
LB: loop body
LE: loop exit
PB: predicated region body
PF: predicated region fallthrough
CT: control target
= control target key end

     0   :  { %s6943_s18 = smov 0   ;;  %s9307_s0 = inlined_call_operand.vmem [shape: bf16[2,288,12], index: 0, kind: input, shape index: {}]   ;;  %s9308_s1 = inlined_call_operand.vmem [shape: bf16[3,12,128], index: 1, kind: input, shape index: {}]   ;;  %s9309_s2 = inlined_call_operand.vmem [shape: bf16[12,128], index: 2, kind: input, shape index: {}]   ;;  %s9310_s3 = inlined_call_operand.vmem [shape: bf16[3,384,128], index: 3, kind: input, shape index: {}]   ;;  %s9311_s4 = inlined_call_operand.vmem [shape: f32[8,128], index: 4, kind: input, shape index: {}]   ;;  %s9312_s5 = inlined_call_operand.vmem [shape: bf16[2,256,128], index: 5, kind: output, shape index: {}]  }
   0x1 LB: > { %s5196_s19 = sadd.s32 4294967295, %s6909_s18   ;;  %p5200_p0 = scmp.ge.s32.totalorder %s6909_s18, 1  ;;  %s6909_s18 = sphi %s6943_s18, %s15_s18  }
   0x2   : > { %p187_p1 = scmp.lt.s32.totalorder %s6909_s18, 3 }
   0x4   : > { %p188_p2 = pnand %p5200_p0, %p187_p1 }
   0x6   : > { %191 = sbr.rel (%p188_p2) target bundleno = 1083 (0x43b), region = 40 }
   0xd   : > { %v6768_v0 = vld [vmem:[%s9308_s1 + $0x8] sm:$0x3f]   ;;  %vm9314_vm0 = vcmask 1045504   ;;  %p215_p3 = scmp.lt.s32.totalorder %s5196_s19, 1  ;;  %v6770_v2 = vld [vmem:[%s9308_s1] sm:$0x3f]  }
   0xe   : > { %6689 = vmatprep.subr.msk.bf16.mxu0 %vm9314_vm0, %v6768_v0  ;;  %v920_v1 = vsel %vm9314_vm0, %v6768_v0, 0  ;;  %vm9313_vm1 = vcmask 97280   ;;  %v6787_v3 = vld [vmem:[%s9308_s1 + $0x10] sm:$0x3f]   ;;  %v1097_v6 = vsel %vm9314_vm0, %v6770_v2, 0  ;;  %v6804_v39 = vld [vmem:[%s9310_s3 + $0x100] sm:$0xff]  }
   0xf   : > { %6170 = vmatpush3.bf16.msra.mxu0 %v920_v1  ;;  %s9580_s19 = smov (!%p215_p3, %s5196_s19), 1  ;;  %v1429_v22 = vsel %vm9314_vm0, %v6787_v3, 0  ;;  %v6805_v40 = vld [vmem:[%s9310_s3 + $0xc0] sm:$0xff]   ;;  %6449 = vmatprep.subr.bf16.mxu1 %v6804_v39  ;;  %v6806_v41 = vld [vmem:[%s9310_s3 + $0x108] sm:$0xff]   ;;  %v6808_v43 = vld [vmem:[%s9310_s3 + $0x110] sm:$0xff]   ;;  %v6911_v47 = vmov 0  }
  0x10   : > { %6690 = vmatprep.subr.msk.bf16.mxu0 %vm9314_vm0, %v6770_v2  ;;  %s6693_s24 = smul.u32 144, %s9580_s19  ;;  %6457 = vmatpush3.bf16.msra.mxu1 %v6805_v40  ;;  %v6807_v42 = vld [vmem:[%s9310_s3 + $0xc8] sm:$0xff]   ;;  %v6809_v44 = vld [vmem:[%s9310_s3 + $0xd0] sm:$0xff]   ;;  %v6810_v45 = vld [vmem:[%s9310_s3 + $0x118] sm:$0xff]   ;;  %715 = vst [vmem:[#allocation2] sm:$0xff] %v6911_v47  ;;  %vm718_vm2 = vcmask 1040384  }
  0x11   : > { %6450 = vmatprep.subr.bf16.mxu1 %v6806_v41  ;;  %v6811_v46 = vld [vmem:[%s9310_s3 + $0xd8] sm:$0xff]   ;;  %717 = vst [vmem:[#allocation2 + $0x10] sm:$0xff] %v6911_v47  ;;  %742 = vst [vmem:[#allocation2 + $0x198] sm:$0xff] %v6911_v47  ;;  %vm9315_vm3 = vsmask.f32 256  ;;  %v9326_v48 = vmov 0 }
  0x12   : > { %s6966_s27 = scalar_lea.vmem %s9307_s0, %s6693_s24  ;;  %vm7083_vm4 = vmand %vm718_vm2, %vm9315_vm3  ;;  %v721_v49 = vld [vmem:[#allocation2 + $0x18] sm:$0x1]  ;;  %v724_v50 = vld [vmem:[#allocation2 + $0x20] sm:$0x1]  ;;  %vm730_vm5 = vcmask 1047559   ;;  %vm6912_vm10 = vmmov 1  }
  0x13   : > { %v6769_v4 = vld [vmem:[%s6966_s27 + $0x8] sm:$0xff]   ;;  %v6771_v5 = vld [vmem:[%s6966_s27 + $0x10] sm:$0xff]   ;;  %v6772_v7 = vld [vmem:[%s6966_s27 + $0x18] sm:$0xff]   ;;  %v9327_v48 = vsel %vm7083_vm4, 4294967295, %v9326_v48  ;;  %v722_v51 = vsel %vm7083_vm4, 0, %v721_v49  ;;  %v725_v52 = vsel %vm7083_vm4, 0, %v724_v50 }
  0x14   : > { %6171 = vmatprep.mubr.msk.bf16.mxu0 %vm9313_vm1, %v6769_v4  ;;  %v6773_v8 = vld [vmem:[%s6966_s27 + $0x20] sm:$0xff]   ;;  %v6774_v9 = vld [vmem:[%s6966_s27 + $0x28] sm:$0xff]   ;;  %v6775_v10 = vld [vmem:[%s6966_s27 + $0x30] sm:$0xff]   ;;  %6458 = vmatpush3.bf16.msra.mxu1 %v6807_v42  ;;  %9328 = vst [vmem:[#allocation3_spill] sm:$0xff] %v9327_v48  ;;  %vm731_vm6 = vsmask.f32 7966 }
  0x15   : > { %6172 = vmatmul.mubr.msk.bf16.vlgmr.msra.gmra.mrb[0].mxu0 %vm9313_vm1, %v6771_v5  ;;  %v6776_v11 = vld [vmem:[%s6966_s27 + $0x38] sm:$0xff]   ;;  %v6777_v12 = vld [vmem:[%s6966_s27 + $0x40] sm:$0xff]   ;;  %v6778_v13 = vld [vmem:[%s6966_s27 + $0x48] sm:$0xff]   ;;  %6451 = vmatprep.subr.bf16.mxu1 %v6808_v43  ;;  %723 = vst [vmem:[#allocation2 + $0x18] sm:$0x1] %v722_v51  ;;  %s5565_s12 = sshll.u32 %s9580_s19, 7 }
  0x16   : > { %6204 = vmatpush3.bf16.msra.mxu0 %v1097_v6  ;;  %6175 = vmatprep.mubr.msk.bf16.mxu0 %vm9313_vm1, %v6772_v7  ;;  %v6779_v14 = vld [vmem:[%s6966_s27 + $0x50] sm:$0xff]   ;;  %v6780_v15 = vld [vmem:[%s6966_s27 + $0x58] sm:$0xff]   ;;  %v6781_v16 = vld [vmem:[%s6966_s27 + $0x60] sm:$0xff]   ;;  %726 = vst [vmem:[#allocation2 + $0x20] sm:$0x1] %v725_v52  ;;  %s9150_s15 = scalar_lea.vmem %s9312_s5, %s5565_s12 }
  0x17   : > { %6691 = vmatprep.subr.msk.bf16.mxu0 %vm9314_vm0, %v6787_v3  ;;  %v6782_v17 = vld [vmem:[%s6966_s27 + $0x68] sm:$0xff]   ;;  %v6783_v18 = vld [vmem:[%s6966_s27 + $0x70] sm:$0xff]   ;;  %v6784_v19 = vld [vmem:[%s6966_s27 + $0x78] sm:$0xff]   ;;  %v234_v3 = vlaneseq }
  0x18   : > { %v6785_v20 = vld [vmem:[%s6966_s27 + $0x80] sm:$0xff]   ;;  %v6788_v23 = vld [vmem:[%s6966_s27 + $0x10] sm:$0xff]   ;;  %v6789_v24 = vld [vmem:[%s6966_s27 + $0x18] sm:$0xff]   ;;  %6459 = vmatpush3.bf16.msra.mxu1 %v6809_v44 }
  0x19   : > { %v6786_v21 = vld [vmem:[%s6966_s27] sm:$0xff]   ;;  %v6791_v26 = vld [vmem:[%s6966_s27 + $0x28] sm:$0xff]   ;;  %v6792_v27 = vld [vmem:[%s6966_s27 + $0x30] sm:$0xff]   ;;  %6452 = vmatprep.subr.bf16.mxu1 %v6810_v45 }
  0x1a   : > { %v6790_v25 = vld [vmem:[%s6966_s27 + $0x20] sm:$0xff]   ;;  %v6793_v28 = vld [vmem:[%s6966_s27 + $0x38] sm:$0xff]   ;;  %v6795_v30 = vld [vmem:[%s6966_s27 + $0x48] sm:$0xff]  }
  0x1b   : > { %v6794_v29 = vld [vmem:[%s6966_s27 + $0x40] sm:$0xff]   ;;  %v6796_v31 = vld [vmem:[%s6966_s27 + $0x50] sm:$0xff]   ;;  %v6797_v32 = vld [vmem:[%s6966_s27 + $0x58] sm:$0xff]  }
  0x1c   : > { %v6798_v33 = vld [vmem:[%s6966_s27 + $0x60] sm:$0xff]   ;;  %v6799_v34 = vld [vmem:[%s6966_s27 + $0x68] sm:$0xff]   ;;  %v6800_v35 = vld [vmem:[%s6966_s27 + $0x70] sm:$0xff]   ;;  %6460 = vmatpush3.bf16.msra.mxu1 %v6811_v46 }
  0x1d   : > { %6176 = vmatmul.mubr.msk.bf16.gmra.mrb[4].mxu0 %vm9313_vm1, %v6773_v8  ;;  %v6801_v36 = vld [vmem:[%s6966_s27 + $0x78] sm:$0xff]   ;;  %v6802_v37 = vld [vmem:[%s6966_s27 + $0x80] sm:$0xff]   ;;  %v6803_v38 = vld [vmem:[%s6966_s27 + $0x88] sm:$0xff]  }
  0x1e   : > { %6179 = vmatprep.mubr.msk.bf16.mxu0 %vm9313_vm1, %v6774_v9  ;;  %v727_v53 = vld [vmem:[#allocation2 + $0x28] sm:$0x1]  ;;  %vm7091_vm7 = vmand %vm730_vm5, %vm731_vm6  ;;  %v739_v55 = vld [vmem:[#allocation2 + $0x190] sm:$0x80] }
  0x1f   : > { %v728_v56 = vsel %vm7083_vm4, 0, %v727_v53  ;;  %v740_v57 = vsel %vm7091_vm7, 0, %v739_v55  ;;  %v6812_v58 = vld [vmem:[%s9310_s3 + $0x120] sm:$0xff]   ;;  %v6814_v60 = vld [vmem:[%s9310_s3 + $0x128] sm:$0xff]   ;;  %v6816_v62 = vld [vmem:[%s9310_s3 + $0x130] sm:$0xff]  }
  0x20   : > { %729 = vst [vmem:[#allocation2 + $0x28] sm:$0x1] %v728_v56  ;;  %741 = vst [vmem:[#allocation2 + $0x190] sm:$0x80] %v740_v57  ;;  %v6813_v59 = vld [vmem:[%s9310_s3 + $0xe0] sm:$0xff]   ;;  %6453 = vmatprep.subr.bf16.mxu1 %v6812_v58  ;;  %v6815_v61 = vld [vmem:[%s9310_s3 + $0xe8] sm:$0xff]  }
  0x21   : > { %6461 = vmatpush3.bf16.msra.mxu1 %v6813_v59  ;;  %v6817_v63 = vld [vmem:[%s9310_s3 + $0xf0] sm:$0xff]   ;;  %v6818_v0 = vld [vmem:[%s9310_s3 + $0x138] sm:$0xff]   ;;  %v6820_v2 = vld [vmem:[%s9310_s3 + $0x40] sm:$0xff]  }
  0x22   : > { %6454 = vmatprep.subr.bf16.mxu1 %v6814_v60  ;;  %v6819_v1 = vld [vmem:[%s9310_s3 + $0xf8] sm:$0xff]   ;;  %vm1952_vm11 = vmpackc.low %vm6912_vm10, %vm6912_vm10  ;;  %v736_v57 = vld [vmem:[#allocation2 + $0x188] sm:$0x80] }
  0x25   : > { %6180 = vmatmul.mubr.msk.bf16.gmra.mrb[8].mxu0 %vm9313_vm1, %v6775_v10  ;;  %6462 = vmatpush3.bf16.msra.mxu1 %v6815_v61 }
  0x26   : > { %6183 = vmatprep.mubr.msk.bf16.mxu0 %vm9313_vm1, %v6776_v11  ;;  %6455 = vmatprep.subr.bf16.mxu1 %v6816_v62 }
  0x29   : > { %6463 = vmatpush3.bf16.msra.mxu1 %v6817_v63 }
  0x2a   : > { %6456 = vmatprep.subr.bf16.mxu1 %v6818_v0 }
  0x2d   : > { %6184 = vmatmul.mubr.msk.bf16.gmra.mrb[12].mxu0 %vm9313_vm1, %v6777_v12  ;;  %6464 = vmatpush3.bf16.msra.mxu1 %v6819_v1 }
  0x2e   : > { %6187 = vmatprep.mubr.msk.bf16.mxu0 %vm9313_vm1, %v6778_v13 }
  0x35   : > { %6188 = vmatmul.mubr.msk.bf16.gmra.mrb[16].mxu0 %vm9313_vm1, %v6779_v14 }
  0x36   : > { %6191 = vmatprep.mubr.msk.bf16.mxu0 %vm9313_vm1, %v6780_v15 }
  0x3d   : > { %6192 = vmatmul.mubr.msk.bf16.gmra.mrb[20].mxu0 %vm9313_vm1, %v6781_v16 }
  0x3e   : > { %6195 = vmatprep.mubr.msk.bf16.mxu0 %vm9313_vm1, %v6782_v17 }
  0x45   : > { %6196 = vmatmul.mubr.msk.bf16.gmra.mrb[24].mxu0 %vm9313_vm1, %v6783_v18 }
  0x46   : > { %6199 = vmatprep.mubr.msk.bf16.mxu0 %vm9313_vm1, %v6784_v19 }
  0x4d   : > { %6200 = vmatmul.mubr.msk.bf16.gmra.mrb[28].mxu0 %vm9313_vm1, %v6785_v20 }
  0x4e   : > { %6205 = vmatprep.mubr.msk.bf16.mxu0 %vm9313_vm1, %v6786_v21 }
  0x55   : > { %6206 = vmatmul.mubr.msk.bf16.vlgmr.msra.gmra.mrb[0].mxu0 %vm9313_vm1, %v6769_v4  ;;  %v7126_v4 = vshrl.u32 %v234_v3, 7 }
  0x56   : > { %6238 = vmatpush3.bf16.msra.mxu0 %v1429_v22  ;;  %6209 = vmatprep.mubr.msk.bf16.mxu0 %vm9313_vm1, %v6771_v5 }
  0x57   : > { %5744 = vmatprep.subr.bf16.mxu0 %v6804_v39  ;;  %v238_v5 = vadd.s32 24, %v7126_v4  ;;  %v237_v6 = vadd.s32 16, %v7126_v4  ;;  %v246_v20 = vadd.s32 88, %v7126_v4  ;;  %v245_v22 = vadd.s32 80, %v7126_v4 }
  0x58   : > { %v254_v51 = vadd.s32 152, %v7126_v4  ;;  %v253_v56 = vadd.s32 144, %v7126_v4 }
  0x5d   : > { %6210 = vmatmul.mubr.msk.bf16.gmra.mrb[4].mxu0 %vm9313_vm1, %v6772_v7  ;;  %v236_v7 = vadd.s32 8, %v7126_v4 }
  0x5e   : > { %6213 = vmatprep.mubr.msk.bf16.mxu0 %vm9313_vm1, %v6773_v8  ;;  %v292_v8 = vand.u32 15, %v238_v5  ;;  %v404_v5 = vand.u32 15, %v254_v51 }
  0x60   : > { %vm7132_vm8 = vcmp.ne.s32.totalorder %v292_v8, 15  ;;  %vm7317_vm3 = vcmp.ne.s32.totalorder %v404_v5, 15 }
  0x61   : > { %vm1955_vm13 = vmpackc.low %vm7132_vm8, %vm7132_vm8 }
  0x65   : > { %6214 = vmatmul.mubr.msk.bf16.gmra.mrb[8].mxu0 %vm9313_vm1, %v6774_v9  ;;  %v285_v9 = vand.u32 15, %v237_v6  ;;  %v258_v6 = vadd.s32 184, %v7126_v4 }
  0x66   : > { %6217 = vmatprep.mubr.msk.bf16.mxu0 %vm9313_vm1, %v6775_v10  ;;  %v278_v10 = vand.u32 15, %v236_v7 }
  0x67   : > { %vm7137_vm9 = vcmp.ne.s32.totalorder %v285_v9, 0  ;;  %v397_v9 = vand.u32 15, %v253_v56 }
  0x68   : > { %vm7143_vm12 = vcmp.ne.s32.totalorder %v278_v10, 15  ;;  %vm2330_vm14 = vmpackc.low %vm7137_vm9, %vm7137_vm9  ;;  %v257_v10 = vadd.s32 176, %v7126_v4 }
  0x69   : > { %vm1953_vm2 = vmpackc.low %vm7143_vm12, %vm7143_vm12 }
  0x6d   : > { %6218 = vmatmul.mubr.msk.bf16.gmra.mrb[12].mxu0 %vm9313_vm1, %v6776_v11  ;;  %v242_v11 = vadd.s32 56, %v7126_v4 }
  0x6e   : > { %6221 = vmatprep.mubr.msk.bf16.mxu0 %vm9313_vm1, %v6777_v12 }
  0x75   : > { %6222 = vmatmul.mubr.msk.bf16.gmra.mrb[16].mxu0 %vm9313_vm1, %v6778_v13  ;;  %v241_v13 = vadd.s32 48, %v7126_v4 }
  0x76   : > { %6225 = vmatprep.mubr.msk.bf16.mxu0 %vm9313_vm1, %v6779_v14 }
  0x77   : > { %v313_v21 = vand.u32 15, %v241_v13 }
  0x79   : > { %vm7182_vm6 = vcmp.ne.s32.totalorder %v313_v21, 0 }
  0x7a   : > { %vm2334_vm12 = vmpackc.low %vm7182_vm6, %vm7182_vm6 }
  0x7d   : > { %6226 = vmatmul.mubr.msk.bf16.gmra.mrb[20].mxu0 %vm9313_vm1, %v6780_v15  ;;  %v271_v15 = vand.u32 15, %v7126_v4 }
  0x7e   : > { %6229 = vmatprep.mubr.msk.bf16.mxu0 %vm9313_vm1, %v6781_v16  ;;  %v240_v16 = vadd.s32 40, %v7126_v4 }
  0x7f   : > { %vm7156_vm15 = vcmp.ne.s32.totalorder %v271_v15, 0  ;;  %v256_v15 = vadd.s32 168, %v7126_v4 }
  0x80   : > { %vm2328_vm8 = vmpackc.low %vm7156_vm15, %vm7156_vm15 }
  0x81   : > { %v7218_v52 = vsel %vm2328_vm8, 65537, %v6911_v47 }
  0x85   : > { %6230 = vmatmul.mubr.msk.bf16.gmra.mrb[24].mxu0 %vm9313_vm1, %v6782_v17 }
  0x86   : > { %6233 = vmatprep.mubr.msk.bf16.mxu0 %vm9313_vm1, %v6783_v18  ;;  %v239_v18 = vadd.s32 32, %v7126_v4 }
  0x8d   : > { %6234 = vmatmul.mubr.msk.bf16.gmra.mrb[28].mxu0 %vm9313_vm1, %v6784_v19  ;;  %v320_v19 = vand.u32 15, %v242_v11  ;;  %v7283_v11 = vld [vmem:[%s9310_s3 + $0x140] sm:$0xff]  }
  0x8e   : > { %6239 = vmatprep.mubr.msk.bf16.mxu0 %vm9313_vm1, %v6788_v23  ;;  %6271 = vmatprep.subr.bf16.mxu1 %v7283_v11  ;;  %v262_v23 = vadd.s32 216, %v7126_v4 }
  0x8f   : > { %vm7174_vm5 = vcmp.ne.s32.totalorder %v320_v19, 15  ;;  %v255_v19 = vadd.s32 160, %v7126_v4 }
  0x90   : > { %vm1959_vm10 = vmpackc.low %vm7174_vm5, %vm7174_vm5  ;;  %v460_v49 = vand.u32 15, %v262_v23 }
  0x95   : > { %6240 = vmatmul.mubr.msk.bf16.vlgmr.msra.gmra.mrb[0].mxu0 %vm9313_vm1, %v6789_v24  ;;  %v306_v24 = vand.u32 15, %v240_v16 }
  0x96   : > { %6243 = vmatprep.mubr.msk.bf16.mxu0 %vm9313_vm1, %v6790_v25  ;;  %5745 = vmatpush3.bf16.msra.mxu0 %v6805_v40  ;;  %v244_v25 = vadd.s32 72, %v7126_v4 }
  0x97   : > { %5746 = vmatprep.subr.bf16.mxu0 %v6806_v41  ;;  %vm7192_vm9 = vcmp.ne.s32.totalorder %v306_v24, 15  ;;  %v248_v41 = vadd.s32 104, %v7126_v4 }
  0x98   : > { %v334_v40 = vand.u32 15, %v244_v25 }
  0x9a   : > { %5747 = vmatpush3.bf16.msra.mxu0 %v6807_v42 }
  0x9b   : > { %5748 = vmatprep.subr.bf16.mxu0 %v6808_v43 }
  0x9d   : > { %6244 = vmatmul.mubr.msk.bf16.gmra.mrb[4].mxu0 %vm9313_vm1, %v6791_v26  ;;  %v7165_v26 = vsel %vm1952_vm11, 65537, %v6911_v47 }
  0x9e   : > { %6247 = vmatprep.mubr.msk.bf16.mxu0 %vm9313_vm1, %v6792_v27  ;;  %5749 = vmatpush3.bf16.msra.mxu0 %v6809_v44  ;;  %v7168_v27 = vsel %vm1955_vm13, 65537, %v6911_v47  ;;  %v5310_v7 = vcombine.low %v7218_v52, %v7165_v26 }
  0x9f   : > { %5750 = vmatprep.subr.bf16.mxu0 %v6810_v45  ;;  %v247_v45 = vadd.s32 96, %v7126_v4 }
  0xa2   : > { %5751 = vmatpush3.bf16.msra.mxu0 %v6811_v46 }
  0xa3   : > { %5752 = vmatprep.subr.bf16.mxu0 %v6812_v58  ;;  %v266_v58 = vadd.s32 248, %v7126_v4 }
  0xa5   : > { %6248 = vmatmul.mubr.msk.bf16.gmra.mrb[8].mxu0 %vm9313_vm1, %v6793_v28  ;;  %v299_v28 = vand.u32 15, %v239_v18 }
  0xa6   : > { %6251 = vmatprep.mubr.msk.bf16.mxu0 %vm9313_vm1, %v6794_v29  ;;  %5753 = vmatpush3.bf16.msra.mxu0 %v6813_v59  ;;  %v243_v29 = vadd.s32 64, %v7126_v4  ;;  %v362_v59 = vand.u32 15, %v248_v41  ;;  %v259_v41 = vadd.s32 192, %v7126_v4 }
  0xa7   : > { %5754 = vmatprep.subr.bf16.mxu0 %v6814_v60  ;;  %vm7202_vm11 = vcmp.ne.s32.totalorder %v299_v28, 0  ;;  %v252_v60 = vadd.s32 136, %v7126_v4  ;;  %v425_v28 = vand.u32 15, %v257_v10 }
  0xa8   : > { %v327_v44 = vand.u32 15, %v243_v29  ;;  %vm7290_vm6 = vcmp.ne.s32.totalorder %v362_v59, 15  ;;  %v261_v29 = vadd.s32 208, %v7126_v4 }
  0xa9   : > { %v390_v14 = vand.u32 15, %v252_v60 }
  0xaa   : > { %5755 = vmatpush3.bf16.msra.mxu0 %v6815_v61  ;;  %v737_v61 = vsel %vm7091_vm7, 0, %v736_v57  ;;  %vm7249_vm0 = vcmp.ne.s32.totalorder %v327_v44, 0 }
  0xab   : > { %5756 = vmatprep.subr.bf16.mxu0 %v6816_v62  ;;  %v7244_v62 = vsel %vm1959_vm10, 65537, %v6911_v47  ;;  %738 = vst [vmem:[#allocation2 + $0x188] sm:$0x80] %v737_v61  ;;  %vm7341_vm4 = vcmp.ne.s32.totalorder %v390_v14, 15 }
  0xac   : > { %v5297_v12 = vcombine.low %v7165_v26, %v7244_v62 }
  0xad   : > { %6252 = vmatmul.mubr.msk.bf16.gmra.mrb[12].mxu0 %vm9313_vm1, %v6795_v30  ;;  %v7172_v30 = vsel %vm2330_vm14, 65537, %v6911_v47  ;;  %vm1957_vm14 = vmpackc.low %vm7192_vm9, %vm7192_vm9 }
  0xae   : > { %6255 = vmatprep.mubr.msk.bf16.mxu0 %vm9313_vm1, %v6796_v31  ;;  %5757 = vmatpush3.bf16.msra.mxu0 %v6817_v63  ;;  %v5311_v42 = vcombine.low %v7172_v30, %v7165_v26  ;;  %v733_v31 = vld [vmem:[#allocation2 + $0x180] sm:$0x80] }
  0xaf   : > { %5758 = vmatprep.subr.bf16.mxu0 %v6818_v0  ;;  %v355_v0 = vand.u32 15, %v247_v45 }
  0xb1   : > { %vm7300_vm8 = vcmp.ne.s32.totalorder %v355_v0, 0  ;;  %v439_v0 = vand.u32 15, %v259_v41 }
  0xb2   : > { %5759 = vmatpush3.bf16.msra.mxu0 %v6819_v1  ;;  %v251_v1 = vadd.s32 128, %v7126_v4 }
  0xb3   : > { %5880 = vmatprep.subr.bf16.mxu0 %v6820_v2  ;;  %v7260_v2 = vsel %vm2334_vm12, 65537, %v6911_v47 }
  0xb4   : > { %v5313_v16 = vcombine.low %v7260_v2, %v7165_v26  ;;  %v383_v18 = vand.u32 15, %v251_v1 }
  0xb5   : > { %6256 = vmatmul.mubr.msk.bf16.gmra.mrb[16].mxu0 %vm9313_vm1, %v6797_v32  ;;  %v348_v32 = vand.u32 15, %v246_v20  ;;  %v7312_v20 = vsel %vm1957_vm14, 65537, %v6911_v47  ;;  %vm7333_vm14 = vcmp.ne.s32.totalorder %v397_v9, 0 }
  0xb6   : > { %6259 = vmatprep.mubr.msk.bf16.mxu0 %vm9313_vm1, %v6798_v33  ;;  %v250_v33 = vadd.s32 120, %v7126_v4  ;;  %vm7359_vm5 = vcmp.ne.s32.totalorder %v383_v18, 0  ;;  %v5296_v56 = vcombine.low %v7165_v26, %v7312_v20 }
  0xb7   : > { %vm7212_vm13 = vcmp.ne.s32.totalorder %v348_v32, 15 }
  0xb8   : > { %v376_v50 = vand.u32 15, %v250_v33  ;;  %v418_v33 = vand.u32 15, %v256_v15 }
  0xba   : > { %vm7265_vm10 = vcmp.ne.s32.totalorder %v376_v50, 15 }
  0xbd   : > { %6260 = vmatmul.mubr.msk.bf16.gmra.mrb[20].mxu0 %vm9313_vm1, %v6799_v34  ;;  %v7180_v34 = vsel %vm1953_vm2, 65537, %v6911_v47  ;;  %vm2332_vm2 = vmpackc.low %vm7202_vm11, %vm7202_vm11 }
  0xbe   : > { %6263 = vmatprep.mubr.msk.bf16.mxu0 %vm9313_vm1, %v6800_v35  ;;  %v5294_v46 = vcombine.low %v7165_v26, %v7180_v34  ;;  %v7328_v24 = vsel %vm2332_vm2, 65537, %v6911_v47  ;;  %v260_v35 = vadd.s32 200, %v7126_v4  ;;  %vm9369_vm11 = vmpackc.low %vm7212_vm13, %vm7212_vm13 }
  0xbf   : > { %vm9387_vm2 = vmpackc.low %vm7290_vm6, %vm7290_vm6 }
  0xc0   : > { %v446_v59 = vand.u32 15, %v260_v35  ;;  %v7459_v10 = vsel %vm9387_vm2, 65537, %v6911_v47  ;;  %vm9391_vm6 = vmpackc.low %vm7317_vm3, %vm7317_vm3 }
  0xc1   : > { %v7482_v13 = vsel %vm9391_vm6, 65537, %v6911_v47  ;;  %vm9393_vm2 = vmpackc.low %vm7341_vm4, %vm7341_vm4 }
  0xc2   : > { %v7498_v17 = vsel %vm9393_vm2, 65537, %v6911_v47  ;;  %vm9396_vm4 = vmpackc.low %vm7359_vm5, %vm7359_vm5  ;;  %vm2240_vm2 = vcmask 1047552  }
  0xc3   : > { %v7518_v21 = vsel %vm9396_vm4, 65537, %v6911_v47  ;;  %vm2472_vm4 = vsmask.f32 7424 }
  0xc5   : > { %6264 = vmatmul.mubr.msk.bf16.gmra.mrb[24].mxu0 %vm9313_vm1, %v6801_v36  ;;  %v341_v36 = vand.u32 15, %v245_v22  ;;  %v432_v22 = vand.u32 15, %v258_v6 }
  0xc6   : > { %6267 = vmatprep.mubr.msk.bf16.mxu0 %vm9313_vm1, %v6802_v37  ;;  %v249_v37 = vadd.s32 112, %v7126_v4 }
  0xc7   : > { %vm7223_vm15 = vcmp.ne.s32.totalorder %v341_v36, 0  ;;  %v734_v36 = vsel %vm7091_vm7, 0, %v733_v31  ;;  %vm7383_vm9 = vcmp.ne.s32.totalorder %v432_v22, 15  ;;  %v488_v31 = vand.u32 15, %v266_v58 }
  0xc8   : > { %v369_v55 = vand.u32 15, %v249_v37  ;;  %v7354_v37 = vsel %vm9369_vm11, 65537, %v6911_v47  ;;  %735 = vst [vmem:[#allocation2 + $0x180] sm:$0x80] %v734_v36  ;;  %vm9372_vm13 = vmpackc.low %vm7223_vm15, %vm7223_vm15 }
  0xc9   : > { %v7370_v43 = vsel %vm9372_vm13, 65537, %v6911_v47  ;;  %vm9376_vm15 = vmpackc.low %vm7249_vm0, %vm7249_vm0  ;;  %vm7441_vm13 = vcmp.ne.s32.totalorder %v460_v49, 15 }
  0xca   : > { %vm7275_vm12 = vcmp.ne.s32.totalorder %v369_v55, 0  ;;  %v7393_v50 = vsel %vm9376_vm15, 65537, %v6911_v47  ;;  %v453_v55 = vand.u32 15, %v261_v29  ;;  %vm1979_vm6 = vmpackc.low %vm7441_vm13, %vm7441_vm13 }
  0xcb   : > { %vm9386_vm15 = vmpackc.low %vm7275_vm12, %vm7275_vm12 }
  0xcc   : > { %v7451_v9 = vsel %vm9386_vm15, 65537, %v6911_v47  ;;  %vm7472_vm15 = vcmp.ne.s32.totalorder %v453_v55, 0 }
  0xcd   : > { %6268 = vmatmul.mubr.msk.bf16.gmra.mrb[28].mxu0 %vm9313_vm1, %v6803_v38  ;;  %v5295_v38 = vcombine.low %v7165_v26, %v7168_v27  ;;  %vm7231_vm1 = vcmp.ne.s32.totalorder %v334_v40, 15  ;;  %v411_v40 = vand.u32 15, %v255_v19  ;;  %v7510_v19 = vld [vmem:[%s9311_s4] ss:$0 sm:$0xff]  ;;  %vm2354_vm5 = vmpackc.low %vm7472_vm15, %vm7472_vm15  ;;  %vm7674_vm15 = vcmp.ne.s32.totalorder %v488_v31, 15 }
  0xce   : > { %vm9373_vm11 = vmpackc.low %vm7231_vm1, %vm7231_vm1  ;;  %v7609_v6 = vsel %vm2354_vm5, 65537, %v6911_v47 }
  0xcf   : > { %v7378_v44 = vsel %vm9373_vm11, 65537, %v6911_v47  ;;  %vm9377_vm1 = vmpackc.low %vm7265_vm10, %vm7265_vm10  ;;  %vm7406_vm11 = vcmp.ne.s32.totalorder %v425_v28, 0  ;;  %vm7417_vm10 = vcmp.ne.s32.totalorder %v418_v33, 15  ;;  %v7558_v33 = vld [vmem:[%s9311_s4 + $0x1] ss:$0 sm:$0xff]  ;;  %vm7640_vm13 = vcmp.ne.s16.totalorder %v5295_v38, 0 }
  0xd0   : > { %v7401_v51 = vsel %vm9377_vm1, 65537, %v6911_v47  ;;  %vm7428_vm1 = vcmp.ne.s32.totalorder %v411_v40, 0  ;;  %vm2350_vm0 = vmpackc.low %vm7406_vm11, %vm7406_vm11 }
  0xd1   : > { %vm9388_vm11 = vmpackc.low %vm7300_vm8, %vm7300_vm8  ;;  %v7529_v23 = vsel %vm2350_vm0, 65537, %v6911_v47 }
  0xd2   : > { %v7467_v14 = vsel %vm9388_vm11, 65537, %v6911_v47  ;;  %vm1973_vm12 = vmpackc.low %vm7417_vm10, %vm7417_vm10  ;;  %vm7503_vm11 = vcmp.ne.s32.totalorder %v446_v59, 15  ;;  %vm7647_vm10 = vcmp.ne.s16.totalorder %v5311_v42, 0 }
  0xd3   : > { %vm9392_vm8 = vmpackc.low %vm7333_vm14, %vm7333_vm14  ;;  %v7550_v32 = vsel %vm1973_vm12, 65537, %v6911_v47  ;;  %vm7669_vm12 = vcmp.ne.s16.totalorder %v5310_v7, 0 }
  0xd4   : > { %v7490_v15 = vsel %vm9392_vm8, 65537, %v6911_v47  ;;  %vm2348_vm3 = vmpackc.low %vm7428_vm1, %vm7428_vm1  ;;  %vm7534_vm8 = vcmp.ne.s32.totalorder %v439_v0, 0  ;;  %vm7662_vm1 = vcmp.ne.s16.totalorder %v5294_v46, 0 }
  0xd5   : > { %vm9397_vm14 = vmpackc.low %vm7383_vm9, %vm7383_vm9  ;;  %v7572_v41 = vsel %vm2348_vm3, 65537, %v6911_v47  ;;  %vm2241_vm3 = vsmask.f32 7938 }
  0xd6   : > { %v7526_v22 = vsel %vm9397_vm14, 65537, %v6911_v47  ;;  %vm1977_vm9 = vmpackc.low %vm7503_vm11, %vm7503_vm11  ;;  %vm7697_vm14 = vcmp.ne.s16.totalorder %v5297_v12, 0 }
  0xd7   : > { %vm2352_vm0 = vmpackc.low %vm7534_vm8, %vm7534_vm8  ;;  %vm7733_vm8 = vcmp.ne.s16.totalorder %v5296_v56, 0 }
  0xd8   : > { %vm1983_vm11 = vmpackc.low %vm7674_vm15, %vm7674_vm15 }
 0x168   : > { %v6241_v35 = vpop.f32.mrb[0].mxu0 }
 0x169   : > { %v1630_v45 = vmul.f32 %v6241_v35, %v7510_v19  ;;  %v1465_v49 = vpop.f32.mrb[1].mxu0  ;;  %v7596_v35 = vsel %vm1979_vm6, 65537, %v6911_v47  ;;  %vm7704_vm6 = vcmp.ne.s16.totalorder %v5313_v16, 0 }
 0x16a   : > { %v1628_v59 = vmul.f32 %v7510_v19, %v1465_v49  ;;  %v6242_v63 = vpop.f32.mrb[2].mxu0 }
 0x16b   : > { %v1666_v25 = vadd.f32 %v7558_v33, %v1630_v45  ;;  %v1631_v55 = vmul.f32 %v6242_v63, %v7510_v19  ;;  %v1468_v53 = vpop.f32.mrb[3].mxu0  ;;  %v7619_v45 = vsel %vm1977_vm9, 65537, %v6911_v47  ;;  %v7622_v63 = vsel %vm2352_vm0, 65537, %v6911_v47  ;;  %vm7747_vm9 = vmand %vm2240_vm2, %vm2241_vm3 }
 0x16c   : > { %v1664_v0 = vadd.f32 %v7558_v33, %v1628_v59  ;;  %v1629_v40 = vmul.f32 %v7510_v19, %v1468_v53  ;;  %9400 = vst [vmem:[#allocation4_spill] sm:$0xff] %v7622_v63  ;;  %v7628_v59 = vadd.s32 240, %v7126_v4  ;;  %vm9424_vm0 = vsmask.f32 256 }
 0x16d   : > { %v1698_v49 = vmax.f32 %v1666_v25, 0.0  ;;  %v1667_v8 = vadd.f32 %v7558_v33, %v1631_v55  ;;  %vm9438_vm15 = vmmov %vm9424_vm0 }
 0x16e   : > { %v1696_v53 = vmax.f32 %v1664_v0, 0.0  ;;  %v1665_v36 = vadd.f32 %v7558_v33, %v1629_v40 }
 0x16f   : > { %v1730_v29 = vmin.f32 %v1698_v49, 123.0  ;;  %v1699_v28 = vmax.f32 %v1667_v8, 0.0  ;;  %v7652_v8 = vadd.s32 224, %v7126_v4 }
 0x170   : > { %v1728_v5 = vmin.f32 %v1696_v53, 123.0  ;;  %v1697_v58 = vmax.f32 %v1665_v36, 0.0  ;;  %v6245_v49 = vpop.f32.mrb[4].mxu0  ;;  %v7655_v53 = vadd.s32 232, %v7126_v4  ;;  %v9419_v36 = vcombine.low %v7328_v24, %v7165_v26  ;;  %v2243_v24 = vld [vmem:[#allocation2 + $0x18] sm:$0xff] }
 0x171   : > { %9405 = vst [vmem:[#allocation5_spill] sm:$0xff] %v7652_v8  ;;  %v1762_v27 = vmul.f32 2.0731707, %v1730_v29  ;;  %v1731_v38 = vmin.f32 %v1699_v28, 123.0  ;;  %v1634_v55 = vmul.f32 %v6245_v49, %v7510_v19  ;;  %v1481_v25 = vpop.f32.mrb[5].mxu0  ;;  %v6821_v8 = vld [vmem:[%s9310_s3] sm:$0xff]  }
 0x172   : > { %v1760_v30 = vmul.f32 2.0731707, %v1728_v5  ;;  %v1729_v42 = vmin.f32 %v1697_v58, 123.0  ;;  %v1632_v28 = vmul.f32 %v7510_v19, %v1481_v25  ;;  %v6246_v29 = vpop.f32.mrb[6].mxu0  ;;  %vm7740_vm5 = vcmp.ne.s16.totalorder %v9419_v36, 0 }
 0x173   : > { %v6696_v58 = vround.rtne.f32 %v1762_v27  ;;  %v1763_v34 = vmul.f32 2.0731707, %v1731_v38  ;;  %v1670_v46 = vadd.f32 %v7558_v33, %v1634_v55  ;;  %v1635_v49 = vmul.f32 %v6246_v29, %v7510_v19  ;;  %v1484_v39 = vpop.f32.mrb[7].mxu0 }
 0x174   : > { %v6694_v18 = vround.rtne.f32 %v1760_v30  ;;  %v1761_v52 = vmul.f32 2.0731707, %v1729_v42  ;;  %v1668_v7 = vadd.f32 %v7558_v33, %v1632_v28  ;;  %v1633_v3 = vmul.f32 %v7510_v19, %v1484_v39 }
 0x175   : > { %v6697_v1 = vround.rtne.f32 %v1763_v34  ;;  %v1702_v25 = vmax.f32 %v1670_v46, 0.0  ;;  %v1671_v31 = vadd.f32 %v7558_v33, %v1635_v49  ;;  %v1826_v60 = vmul.f32 0.48235294, %v6696_v58 }
 0x176   : > { %v6695_v27 = vround.rtne.f32 %v1761_v52  ;;  %v1700_v55 = vmax.f32 %v1668_v7, 0.0  ;;  %v1669_v38 = vadd.f32 %v7558_v33, %v1633_v3  ;;  %v1824_v30 = vmul.f32 0.48235294, %v6694_v18 }
 0x177   : > { %v1827_v42 = vmul.f32 0.48235294, %v6697_v1  ;;  %v1734_v39 = vmin.f32 %v1702_v25, 123.0  ;;  %v1703_v28 = vmax.f32 %v1671_v31, 0.0  ;;  %v7690_v3 = vsel %vm1983_vm11, 65537, %v6911_v47  ;;  %v6823_v1 = vld [vmem:[%s9310_s3 + $0x8] sm:$0xff]  }
 0x178   : > { %v1825_v29 = vmul.f32 0.48235294, %v6695_v27  ;;  %v1732_v34 = vmin.f32 %v1700_v55, 123.0  ;;  %v1701_v46 = vmax.f32 %v1669_v38, 0.0  ;;  %v6249_v49 = vpop.f32.mrb[8].mxu0  ;;  %9412 = vst [vmem:[#allocation6_spill] sm:$0xff] %v7690_v3 }
 0x179   : > { %v1857_v52 = vpack.c.bf16 %v1827_v42, %v1826_v60  ;;  %v1766_v61 = vmul.f32 2.0731707, %v1734_v39  ;;  %v1735_v57 = vmin.f32 %v1703_v28, 123.0  ;;  %v1497_v7 = vpop.f32.mrb[9].mxu0  ;;  %v1638_v25 = vmul.f32 %v6249_v49, %v7510_v19 }
 0x17a   : > { %v7692_v5 = vpack.c.bf16 %v1825_v29, %v1824_v30  ;;  %v1764_v18 = vmul.f32 2.0731707, %v1732_v34  ;;  %v1733_v47 = vmin.f32 %v1701_v46, 123.0  ;;  %v6250_v31 = vpop.f32.mrb[10].mxu0  ;;  %v1636_v42 = vmul.f32 %v7510_v19, %v1497_v7 }
 0x17b   : > { %1873 = vst [vmem:[#allocation2 + $0x38] sm:$0xff] %v1857_v52  ;;  %v2081_v27 = vsel %vm7640_vm13, %v1857_v52, 0  ;;  %v7713_v62 = vsel %vm7647_vm10, %v1857_v52, 0  ;;  %v6700_v12 = vround.rtne.f32 %v1766_v61  ;;  %v1767_v55 = vmul.f32 2.0731707, %v1735_v57  ;;  %v7715_v38 = vpop.f32.mrb[11].mxu0  ;;  %vm9431_vm10 = vmmov %vm9424_vm0 }
 0x17c   : > { %v2104_v2 = vshrl.u32 %v2081_v27, 16  ;;  %v2107_v16 = vshll.u32 %v2081_v27, 16  ;;  %v2481_v30 = vshll.u32 %v7713_v62, 16  ;;  %1872 = vst [vmem:[#allocation2 + $0x20] sm:$0xff] %v7692_v5  ;;  %2963 = vmatprep.mubr.bf16.mxu0 %v7692_v5  ;;  %v2485_v0 = vshrl.u32 %v7713_v62, 16 }
 0x17d   : > { %v2080_v40 = vsel %vm7662_vm1, %v7692_v5, 0  ;;  %v2456_v57 = vsel %vm7669_vm12, %v7692_v5, 0  ;;  %v6698_v61 = vround.rtne.f32 %v1764_v18  ;;  %v1830_v34 = vmul.f32 0.48235294, %v6700_v12  ;;  %v2617_v18 = vld [vmem:[#allocation2 + $0x10] sm:$0x80] }
 0x17e   : > { %v7728_v39 = vrot.slane %v2104_v2, 7  ;;  %v2483_v28 = vrot.slane %v2481_v30, 1  ;;  %v2097_v29 = vshrl.u32 %v2080_v40, 16  ;;  %v2100_v4 = vshll.u32 %v2080_v40, 16 }
 0x17f   : > { %v2474_v52 = vshll.u32 %v2456_v57, 16  ;;  %v2477_v7 = vshrl.u32 %v2456_v57, 16  ;;  %v6701_v27 = vround.rtne.f32 %v1767_v55  ;;  %v1828_v20 = vmul.f32 0.48235294, %v6698_v61 }
 0x180   : > { %v2109_v62 = vor.u32 %v2107_v16, %v7728_v39  ;;  %v2099_v12 = vrot.slane %v2097_v29, 7  ;;  %v1765_v56 = vmul.f32 2.0731707, %v1733_v47  ;;  %v6253_v2 = vpop.f32.mrb[12].mxu0  ;;  %v1674_v40 = vadd.f32 %v7558_v33, %v1638_v25 }
 0x181   : > { %v2476_v36 = vrot.slane %v2474_v52, 1  ;;  %v1831_v58 = vmul.f32 0.48235294, %v6701_v27  ;;  %v1672_v57 = vadd.f32 %v7558_v33, %v1636_v42  ;;  %v7753_v55 = vpop.f32.mrb[13].mxu0  ;;  %v1639_v29 = vmul.f32 %v6250_v31, %v7510_v19 }
 0x182   : > { %v2102_v16 = vor.u32 %v2100_v4, %v2099_v12  ;;  %v2110_v61 = vsel %vm9424_vm0, %v2099_v12, %v2109_v62  ;;  %v6699_v47 = vround.rtne.f32 %v1765_v56  ;;  %v7757_v48 = vpop.f32.mrb[14].mxu0  ;;  %v1706_v27 = vmax.f32 %v1674_v40, 0.0  ;;  %v6822_v4 = vld [vmem:[%s9310_s3 + $0x48] sm:$0xff]   ;;  %v7783_v56 = vld [vmem:[#allocation2 + $0x38] sm:$0xff] }
 0x183   : > { %2246 = vst [vmem:[#allocation2 + $0x30] sm:$0xff] %v2110_v61  ;;  %v2479_v52 = vor.u32 %v2477_v7, %v2476_v36  ;;  %v2618_v25 = vsel %vm7091_vm7, %v2476_v36, %v2617_v18  ;;  %v1859_v42 = vpack.c.bf16 %v1831_v58, %v1830_v34  ;;  %v7764_v63 = vpop.f32.mrb[15].mxu0  ;;  %v1704_v12 = vmax.f32 %v1672_v57, 0.0 }
 0x184   : > { %v7771_v31 = vsel %vm7747_vm9, %v2102_v16, %v2243_v24  ;;  %2619 = vst [vmem:[#allocation2 + $0x10] sm:$0x80] %v2618_v25  ;;  %v1829_v62 = vmul.f32 0.48235294, %v6699_v47  ;;  %v1675_v7 = vadd.f32 %v7558_v33, %v1639_v29  ;;  %v1738_v18 = vmin.f32 %v1706_v27, 123.0 }
 0x185   : > { %2245 = vst [vmem:[#allocation2 + $0x18] sm:$0xff] %v7771_v31  ;;  %v2484_v54 = vsel %vm2472_vm4, %v2479_v52, %v2483_v28  ;;  %1875 = vst [vmem:[#allocation2 + $0x68] sm:$0xff] %v1859_v42  ;;  %v2083_v58 = vsel %vm7697_vm14, %v1859_v42, 0  ;;  %v7780_v34 = vsel %vm7704_vm6, %v1859_v42, 0  ;;  %2964 = vmatmul.mubr.bf16.vlgmr.msra.gmra.mrb[32].mxu0 %v7771_v31  ;;  %v2487_v30 = vor.u32 %v2485_v0, %v2483_v28  ;;  %v6825_v0 = vld [vmem:[%s9310_s3 + $0x50] sm:$0xff]  }
 0x186   : > { %2620 = vst [vmem:[#allocation2 + $0x28] sm:$0xff] %v2484_v54  ;;  %v2120_v24 = vshrl.u32 %v2083_v58, 16  ;;  %v2497_v36 = vshll.u32 %v7780_v34, 16  ;;  %2971 = vmatprep.mubr.bf16.mxu0 %v7783_v56  ;;  %5881 = vmatpush3.bf16.msra.mxu0 %v6821_v8  ;;  %v2123_v40 = vshll.u32 %v2083_v58, 16  ;;  %v7792_v57 = vpack.c.bf16 %v1829_v62, %v1828_v20  ;;  %v6827_v54 = vld [vmem:[%s9310_s3 + $0x58] sm:$0xff]  }
 0x187   : > { %v1770_v16 = vmul.f32 2.0731707, %v1738_v18  ;;  %v1736_v61 = vmin.f32 %v1704_v12, 123.0  ;;  %5882 = vmatprep.subr.bf16.mxu0 %v6822_v4  ;;  %v1707_v8 = vmax.f32 %v1675_v7, 0.0  ;;  %v1637_v47 = vmul.f32 %v7510_v19, %v7715_v38  ;;  %v6826_v38 = vld [vmem:[%s9310_s3 + $0x10] sm:$0xff]  }
 0x188   : > { %v7797_v28 = vrot.slane %v2120_v24, 7  ;;  %v1642_v29 = vmul.f32 %v6253_v2, %v7510_v19  ;;  %v7802_v52 = vpop.f32.mrb[16].mxu0  ;;  %1874 = vst [vmem:[#allocation2 + $0x50] sm:$0xff] %v7792_v57  ;;  %v2082_v20 = vsel %vm7733_vm8, %v7792_v57, 0  ;;  %v2458_v25 = vsel %vm7740_vm5, %v7792_v57, 0  ;;  %vm9455_vm8 = vmmov %vm9424_vm0 }
 0x189   : > { %v6704_v42 = vround.rtne.f32 %v1770_v16  ;;  %v7811_v27 = vmul.f32 2.0731707, %v1736_v61  ;;  %v7813_v4 = vpop.f32.mrb[17].mxu0  ;;  %v7819_v62 = vrot.slane %v2497_v36, 1  ;;  %v2112_v12 = vshrl.u32 %v2082_v20, 16  ;;  %vm9456_vm5 = vmmov %vm9424_vm0 }
 0x18a   : > { %v2125_v2 = vor.u32 %v2123_v40, %v7797_v28  ;;  %v7822_v7 = vpop.f32.mrb[18].mxu0  ;;  %v7824_v49 = vld [vmem:[#allocation2 + $0x30] sm:$0xff]  ;;  %5883 = vmatpush3.bf16.msra.mxu0 %v6823_v1  ;;  %v2115_v58 = vshll.u32 %v2082_v20, 16  ;;  %v2489_v18 = vshll.u32 %v2458_v25, 16  ;;  %v2493_v24 = vshrl.u32 %v2458_v25, 16 }
 0x18b   : > { %v1834_v16 = vmul.f32 0.48235294, %v6704_v42  ;;  %v9425_v36 = vcombine.low %v7165_v26, %v7354_v37  ;;  %v9428_v61 = vcombine.low %v7370_v43, %v7165_v26  ;;  %v7843_v60 = vpop.f32.mrb[19].mxu0  ;;  %5884 = vmatprep.subr.bf16.mxu0 %v6825_v0  ;;  %v2114_v20 = vrot.slane %v2112_v12, 7  ;;  %v6834_v1 = vld [vmem:[%s9310_s3 + $0x70] sm:$0xff]  }
 0x18c   : > { %v1739_v25 = vmin.f32 %v1707_v8, 123.0  ;;  %v1673_v42 = vadd.f32 %v7558_v33, %v1637_v47  ;;  %v1678_v37 = vadd.f32 %v7558_v33, %v1642_v29  ;;  %v6702_v46 = vround.rtne.f32 %v7811_v27  ;;  %v6828_v47 = vld [vmem:[%s9310_s3 + $0x18] sm:$0xff]   ;;  %v6835_v27 = vld [vmem:[%s9310_s3 + $0x30] sm:$0xff]  }
 0x18d   : > { %vm7832_vm7 = vcmp.ne.s16.totalorder %v9425_v36, 0  ;;  %vm7839_vm13 = vcmp.ne.s16.totalorder %v9428_v61, 0  ;;  %v2491_v36 = vrot.slane %v2489_v18, 1  ;;  %v1640_v3 = vmul.f32 %v7510_v19, %v7753_v55  ;;  %2972 = vmatmul.mubr.bf16.gmra.mrb[36].mxu0 %v7824_v49 }
 0x18e   : > { %v1643_v43 = vmul.f32 %v7757_v48, %v7510_v19  ;;  %v2117_v61 = vor.u32 %v2115_v58, %v2114_v20  ;;  %v2126_v0 = vsel %vm9431_vm10, %v2114_v20, %v2125_v2  ;;  %v1771_v12 = vmul.f32 2.0731707, %v1739_v25  ;;  %2979 = vmatprep.mubr.bf16.mxu0 %v7792_v57  ;;  %5885 = vmatpush3.bf16.msra.mxu0 %v6826_v38 }
 0x18f   : > { %v1705_v8 = vmax.f32 %v1673_v42, 0.0  ;;  %2248 = vst [vmem:[#allocation2 + $0x60] sm:$0xff] %v2126_v0  ;;  %v2492_v55 = vsel %vm2472_vm4, %v2487_v30, %v2491_v36  ;;  %v2495_v29 = vor.u32 %v2493_v24, %v2491_v36  ;;  %v9432_v48 = vcombine.low %v7165_v26, %v7378_v44  ;;  %5886 = vmatprep.subr.bf16.mxu0 %v6827_v54  ;;  %v6829_v30 = vld [vmem:[%s9310_s3 + $0x60] sm:$0xff]  }
 0x190   : > { %v9435_v2 = vcombine.low %v7393_v50, %v7165_v26  ;;  %v1710_v58 = vmax.f32 %v1678_v37, 0.0  ;;  %v1676_v18 = vadd.f32 %v7558_v33, %v1640_v3  ;;  %v2118_v44 = vsel %vm9438_vm15, %v7728_v39, %v2117_v61  ;;  %2621 = vst [vmem:[#allocation2 + $0x40] sm:$0xff] %v2492_v55  ;;  %v7880_v25 = vpop.f32.mrb[20].mxu0  ;;  %v6830_v39 = vld [vmem:[%s9310_s3 + $0x20] sm:$0xff]  }
 0x191   : > { %vm7862_vm1 = vcmp.ne.s16.totalorder %v9432_v48, 0  ;;  %v6705_v24 = vround.rtne.f32 %v1771_v12  ;;  %v1737_v20 = vmin.f32 %v1705_v8, 123.0  ;;  %v1679_v50 = vadd.f32 %v7558_v33, %v1643_v43  ;;  %2247 = vst [vmem:[#allocation2 + $0x48] sm:$0xff] %v2118_v44  ;;  %v7886_v36 = vpop.f32.mrb[21].mxu0 }
 0x192   : > { %vm7869_vm12 = vcmp.ne.s16.totalorder %v9435_v2, 0  ;;  %v2500_v42 = vsel %vm2472_vm4, %v2495_v29, %v7819_v62  ;;  %v1742_v3 = vmin.f32 %v1710_v58, 123.0  ;;  %v1708_v54 = vmax.f32 %v1676_v18, 0.0  ;;  %v7893_v8 = vpop.f32.mrb[22].mxu0  ;;  %5887 = vmatpush3.bf16.msra.mxu0 %v6828_v47 }
 0x193   : > { %v1641_v37 = vmul.f32 %v7510_v19, %v7764_v63  ;;  %2622 = vst [vmem:[#allocation2 + $0x58] sm:$0xff] %v2500_v42  ;;  %v1835_v61 = vmul.f32 0.48235294, %v6705_v24  ;;  %v1769_v43 = vmul.f32 2.0731707, %v1737_v20  ;;  %v1711_v0 = vmax.f32 %v1679_v50, 0.0  ;;  %5888 = vmatprep.subr.bf16.mxu0 %v6829_v30 }
 0x194   : > { %v1646_v12 = vmul.f32 %v7802_v52, %v7510_v19  ;;  %v1774_v55 = vmul.f32 2.0731707, %v1742_v3  ;;  %v1740_v29 = vmin.f32 %v1708_v54, 123.0  ;;  %v9439_v63 = vcombine.low %v7165_v26, %v7401_v51  ;;  %v7912_v18 = vpop.f32.mrb[23].mxu0  ;;  %v6832_v51 = vld [vmem:[%s9310_s3 + $0x68] sm:$0xff]  }
 0x195   : > { %v9442_v2 = vcombine.low %v7451_v9, %v7165_v26  ;;  %v1677_v52 = vadd.f32 %v7558_v33, %v1641_v37  ;;  %v1644_v47 = vmul.f32 %v7510_v19, %v7813_v4  ;;  %v1832_v44 = vmul.f32 0.48235294, %v6702_v46  ;;  %v6833_v4 = vld [vmem:[%s9310_s3 + $0x28] sm:$0xff]  }
 0x196   : > { %vm7898_vm3 = vcmp.ne.s16.totalorder %v9439_v63, 0  ;;  %v7917_v24 = vpack.c.bf16 %v1835_v61, %v1834_v16  ;;  %v6703_v9 = vround.rtne.f32 %v1769_v43  ;;  %v1743_v20 = vmin.f32 %v1711_v0, 123.0  ;;  %5889 = vmatpush3.bf16.msra.mxu0 %v6830_v39 }
 0x197   : > { %vm7905_vm11 = vcmp.ne.s16.totalorder %v9442_v2, 0  ;;  %v6708_v50 = vround.rtne.f32 %v1774_v55  ;;  %v7919_v42 = vmul.f32 2.0731707, %v1740_v29  ;;  %v1709_v3 = vmax.f32 %v1677_v52, 0.0  ;;  %5890 = vmatprep.subr.bf16.mxu0 %v6832_v51 }
 0x198   : > { %9445 = vst [vmem:[#allocation7_spill] sm:$0xff] %v7917_v24  ;;  %v1682_v54 = vadd.f32 %v7558_v33, %v1646_v12  ;;  %1877 = vst [vmem:[#allocation2 + $0x98] sm:$0xff] %v7917_v24  ;;  %v2085_v46 = vsel %vm7832_vm7, %v7917_v24, 0  ;;  %v7932_v16 = vsel %vm7839_vm13, %v7917_v24, 0  ;;  %v1833_v30 = vmul.f32 0.48235294, %v6703_v9  ;;  %3003 = vmatprep.mubr.bf16.mxu1 %v7917_v24 }
 0x199   : > { %v1775_v37 = vmul.f32 2.0731707, %v1743_v20  ;;  %v9446_v61 = vshrl.u32 %v7780_v34, 16  ;;  %v2136_v0 = vshrl.u32 %v2085_v46, 16  ;;  %v2513_v12 = vshll.u32 %v7932_v16, 16  ;;  %v7946_v2 = vpop.f32.mrb[24].mxu0 }
 0x19a   : > { %v7940_v40 = vadd.f32 %v7558_v33, %v1644_v47  ;;  %v2139_v55 = vshll.u32 %v2085_v46, 16  ;;  %v2517_v29 = vshrl.u32 %v7932_v16, 16  ;;  %v1860_v63 = vpack.c.bf16 %v1833_v30, %v1832_v44  ;;  %v7948_v34 = vld [vmem:[#allocation2 + $0x48] sm:$0xff]  ;;  %v7954_v20 = vpop.f32.mrb[25].mxu0  ;;  %5891 = vmatpush3.bf16.msra.mxu0 %v6833_v4 }
 0x19b   : > { %v2503_v43 = vor.u32 %v9446_v61, %v7819_v62  ;;  %v6709_v39 = vround.rtne.f32 %v1775_v37  ;;  %9447 = vst [vmem:[#allocation8_spill] sm:$0xff] %v7948_v34  ;;  %v7950_v62 = vld [vmem:[#allocation2 + $0x68] sm:$0xff]  ;;  %v7952_v52 = vrot.slane %v2136_v0, 7  ;;  %v1838_v47 = vmul.f32 0.48235294, %v6708_v50  ;;  %2980 = vmatmul.mubr.bf16.gmra.mrb[40].mxu0 %v7948_v34  ;;  %v7981_v0 = vpop.f32.mrb[26].mxu0  ;;  %5892 = vmatprep.subr.bf16.mxu0 %v6834_v1 }
 0x19c   : > { %9448 = vst [vmem:[#allocation9_spill] sm:$0xff] %v7950_v62  ;;  %v1741_v9 = vmin.f32 %v1709_v3, 123.0  ;;  %v1714_v51 = vmax.f32 %v1682_v54, 0.0  ;;  %1876 = vst [vmem:[#allocation2 + $0x80] sm:$0xff] %v1860_v63  ;;  %v2084_v44 = vsel %vm7862_vm1, %v1860_v63, 0  ;;  %v2460_v46 = vsel %vm7869_vm12, %v1860_v63, 0  ;;  %2987 = vmatprep.mubr.bf16.mxu0 %v7950_v62 }
 0x19d   : > { %v6706_v16 = vround.rtne.f32 %v7919_v42  ;;  %v1839_v30 = vmul.f32 0.48235294, %v6709_v39  ;;  %v9449_v37 = vcombine.low %v7165_v26, %v7459_v10  ;;  %v9452_v3 = vcombine.low %v7467_v14, %v7165_v26  ;;  %v6836_v14 = vld [vmem:[%s9310_s3 + $0x78] sm:$0xff]   ;;  %vm9472_vm1 = vmmov %vm9456_vm5  ;;  %v6842_v50 = vld [vmem:[%s9310_s3 + $0x170] sm:$0xff]  }
 0x19e   : > { %v2141_v10 = vor.u32 %v2139_v55, %v7952_v52  ;;  %v2515_v38 = vrot.slane %v2513_v12, 1  ;;  %v2128_v42 = vshrl.u32 %v2084_v44, 16  ;;  %v2131_v61 = vshll.u32 %v2084_v44, 16  ;;  %5893 = vmatpush3.bf16.msra.mxu0 %v6835_v27  ;;  %vm9473_vm12 = vmmov %vm9472_vm1 }
 0x19f   : > { %vm7965_vm14 = vcmp.ne.s16.totalorder %v9449_v37, 0  ;;  %vm7972_vm6 = vcmp.ne.s16.totalorder %v9452_v3, 0  ;;  %v2505_v63 = vshll.u32 %v2460_v46, 16  ;;  %v2509_v39 = vshrl.u32 %v2460_v46, 16  ;;  %v7986_v3 = vpop.f32.mrb[27].mxu0  ;;  %5894 = vmatprep.subr.bf16.mxu0 %v6836_v14 }
 0x1a0   : > { %v1863_v37 = vpack.c.bf16 %v1839_v30, %v1838_v47  ;;  %v1773_v4 = vmul.f32 2.0731707, %v1741_v9  ;;  %v2130_v24 = vrot.slane %v2128_v42, 7  ;;  %v1746_v62 = vmin.f32 %v1714_v51, 123.0  ;;  %v6831_v9 = vld [vmem:[%s9310_s3 + $0x148] sm:$0xff]  }
 0x1a1   : > { %v1712_v55 = vmax.f32 %v7940_v40, 0.0  ;;  %v1647_v12 = vmul.f32 %v7822_v7, %v7510_v19  ;;  %v2507_v44 = vrot.slane %v2505_v63, 1  ;;  %v6838_v40 = vld [vmem:[%s9310_s3 + $0x38] sm:$0xff]   ;;  %v1836_v48 = vmul.f32 0.48235294, %v6706_v16  ;;  %v8012_v63 = vpop.f32.mrb[28].mxu0 }
 0x1a2   : > { %1879 = vst [vmem:[#allocation2 + $0xc8] sm:$0xff] %v1863_v37  ;;  %v2087_v1 = vsel %vm7898_vm3, %v1863_v37, 0  ;;  %v7995_v34 = vsel %vm7905_vm11, %v1863_v37, 0  ;;  %v6707_v47 = vround.rtne.f32 %v1773_v4  ;;  %v2133_v7 = vor.u32 %v2131_v61, %v2130_v24  ;;  %v8014_v61 = vld [vmem:[#allocation2 + $0x60] sm:$0xff]  ;;  %5895 = vmatpush3.bf16.msra.mxu0 %v6838_v40 }
 0x1a3   : > { %v8004_v51 = vsel %vm9455_vm8, %v2130_v24, %v2141_v10  ;;  %v2152_v46 = vshrl.u32 %v2087_v1, 16  ;;  %v8006_v58 = vor.u32 %v2517_v29, %v2515_v38  ;;  %v2508_v30 = vsel %vm2472_vm4, %v2503_v43, %v2507_v44  ;;  %v8021_v43 = vpop.f32.mrb[29].mxu0  ;;  %2988 = vmatmul.mubr.bf16.gmra.mrb[44].mxu0 %v8014_v61  ;;  %vm9487_vm8 = vmmov %vm9472_vm1 }
 0x1a4   : > { %2250 = vst [vmem:[#allocation2 + $0x90] sm:$0xff] %v8004_v51  ;;  %v2511_v42 = vor.u32 %v2509_v39, %v2507_v44  ;;  %v2529_v27 = vshll.u32 %v7995_v34, 16  ;;  %3004 = vmatmul.mubr.bf16.vlgmr.msra.gmra.mrb[0].mxu1 %v8004_v51  ;;  %v2134_v24 = vsel %vm9456_vm5, %v7797_v28, %v2133_v7  ;;  %2623 = vst [vmem:[#allocation2 + $0x70] sm:$0xff] %v2508_v30  ;;  %v1837_v29 = vmul.f32 0.48235294, %v6707_v47  ;;  %v6837_v47 = vld [vmem:[%s9310_s3 + $0x150] sm:$0xff]  }
 0x1a5   : > { %v8018_v16 = vrot.slane %v2152_v46, 7  ;;  %v1778_v10 = vmul.f32 2.0731707, %v1746_v62  ;;  %6272 = vmatpush3.bf16.msra.mxu1 %v7283_v11  ;;  %2249 = vst [vmem:[#allocation2 + $0x78] sm:$0xff] %v2134_v24  ;;  %v2155_v39 = vshll.u32 %v2087_v1, 16  ;;  %v1744_v37 = vmin.f32 %v1712_v55, 123.0  ;;  %vm9488_vm5 = vmmov %vm9472_vm1 }
 0x1a6   : > { %v2516_v14 = vsel %vm2472_vm4, %v2511_v42, %v2515_v38  ;;  %v1683_v4 = vadd.f32 %v7558_v33, %v1647_v12  ;;  %v9457_v28 = vand.u32 15, %v7628_v59  ;;  %v8032_v62 = vpop.f32.mrb[30].mxu0  ;;  %v8034_v11 = vld [vmem:[#allocation2 + $0x80] sm:$0xff]  ;;  %6273 = vmatprep.subr.bf16.mxu1 %v6831_v9  ;;  %v8040_v55 = vpack.c.bf16 %v1837_v29, %v1836_v48 }
 0x1a7   : > { %2624 = vst [vmem:[#allocation2 + $0x88] sm:$0xff] %v2516_v14  ;;  %v6712_v59 = vround.rtne.f32 %v1778_v10  ;;  %v1645_v12 = vmul.f32 %v7510_v19, %v7843_v60  ;;  %v8044_v1 = vpop.f32.mrb[31].mxu0  ;;  %2995 = vmatprep.mubr.bf16.mxu0 %v8034_v11  ;;  %v2157_v7 = vor.u32 %v2155_v39, %v8018_v16  ;;  %v8048_v46 = vrot.slane %v2529_v27, 1 }
 0x1a8   : > { %vm8028_vm9 = vcmp.ne.s32.totalorder %v9457_v28, 0  ;;  %v1715_v30 = vmax.f32 %v1683_v4, 0.0  ;;  %v1650_v40 = vmul.f32 %v7880_v25, %v7510_v19  ;;  %1878 = vst [vmem:[#allocation2 + $0xb0] sm:$0xff] %v8040_v55  ;;  %v2086_v48 = vsel %vm7965_vm14, %v8040_v55, 0  ;;  %3011 = vmatprep.mubr.bf16.mxu1 %v8040_v55 }
 0x1a9   : > { %v2462_v60 = vsel %vm7972_vm6, %v8040_v55, 0  ;;  %v1776_v42 = vmul.f32 2.0731707, %v1744_v37  ;;  %v1681_v24 = vadd.f32 %v7558_v33, %v1645_v12  ;;  %6274 = vmatpush3.bf16.msra.mxu1 %v6831_v9  ;;  %v2144_v27 = vshrl.u32 %v2086_v48, 16  ;;  %v6839_v9 = vld [vmem:[%s9310_s3 + $0x158] sm:$0xff]   ;;  %vm2358_vm15 = vmpackc.low %vm8028_vm9, %vm8028_vm9 }
 0x1aa   : > { %v2147_v29 = vshll.u32 %v2086_v48, 16  ;;  %v2521_v10 = vshll.u32 %v2462_v60, 16  ;;  %v1842_v25 = vmul.f32 0.48235294, %v6712_v59  ;;  %v9460_v14 = vcombine.low %v7165_v26, %v7482_v13  ;;  %6275 = vmatprep.subr.bf16.mxu1 %v6837_v47 }
 0x1ab   : > { %v9463_v54 = vcombine.low %v7490_v15, %v7165_v26  ;;  %v2525_v37 = vshrl.u32 %v2462_v60, 16  ;;  %v1747_v4 = vmin.f32 %v1715_v30, 123.0  ;;  %v1713_v28 = vmax.f32 %v1681_v24, 0.0 }
 0x1ac   : > { %vm8064_vm0 = vcmp.ne.s16.totalorder %v9460_v14, 0  ;;  %v1686_v13 = vadd.f32 %v7558_v33, %v1650_v40  ;;  %v2146_v59 = vrot.slane %v2144_v27, 7  ;;  %v2523_v12 = vrot.slane %v2521_v10, 1  ;;  %v8102_v38 = vld [vmem:[#allocation2 + $0x78] sm:$0xff] }
 0x1ad   : > { %vm8071_vm7 = vcmp.ne.s16.totalorder %v9463_v54, 0  ;;  %v9466_v48 = vcombine.low %v7165_v26, %v7498_v17  ;;  %v9469_v14 = vcombine.low %v7518_v21, %v7165_v26  ;;  %v1648_v30 = vmul.f32 %v7510_v19, %v7886_v36  ;;  %6276 = vmatpush3.bf16.msra.mxu1 %v6837_v47  ;;  %2996 = vmatmul.mubr.bf16.gmra.mrb[48].mxu0 %v8102_v38  ;;  %v6840_v47 = vld [vmem:[%s9310_s3 + $0x160] sm:$0xff]  }
 0x1ae   : > { %v1651_v40 = vmul.f32 %v7893_v8, %v7510_v19  ;;  %v6710_v60 = vround.rtne.f32 %v1776_v42  ;;  %v1779_v24 = vmul.f32 2.0731707, %v1747_v4  ;;  %v1745_v17 = vmin.f32 %v1713_v28, 123.0  ;;  %6277 = vmatprep.subr.bf16.mxu1 %v6839_v9  ;;  %v8119_v28 = vld [vmem:[#allocation2] sm:$0xff] }
 0x1af   : > { %vm8082_vm13 = vcmp.ne.s16.totalorder %v9466_v48, 0  ;;  %vm8089_vm10 = vcmp.ne.s16.totalorder %v9469_v14, 0  ;;  %v1718_v27 = vmax.f32 %v1686_v13, 0.0  ;;  %v2149_v10 = vor.u32 %v2147_v29, %v2146_v59  ;;  %3429 = vmatprep.mubr.bf16.mxu0 %v8119_v28 }
 0x1b0   : > { %v8098_v48 = vsel %vm9472_vm1, %v2146_v59, %v2157_v7  ;;  %v2524_v21 = vsel %vm2472_vm4, %v8006_v58, %v2523_v12  ;;  %v2527_v14 = vor.u32 %v2525_v37, %v2523_v12  ;;  %v6713_v36 = vround.rtne.f32 %v1779_v24 }
 0x1b1   : > { %2252 = vst [vmem:[#allocation2 + $0xc0] sm:$0xff] %v8098_v48  ;;  %2625 = vst [vmem:[#allocation2 + $0xa0] sm:$0xff] %v2524_v21  ;;  %v1777_v8 = vmul.f32 2.0731707, %v1745_v17  ;;  %v1750_v42 = vmin.f32 %v1718_v27, 123.0  ;;  %v1684_v4 = vadd.f32 %v7558_v33, %v1648_v30  ;;  %v8112_v58 = vsel %vm9473_vm12, %v7952_v52, %v2149_v10  ;;  %v8127_v30 = vld [vmem:[#allocation2 + $0xc8] sm:$0xff]  ;;  %6278 = vmatpush3.bf16.msra.mxu1 %v6839_v9 }
 0x1b2   : > { %v2532_v7 = vsel %vm2472_vm4, %v2527_v14, %v8048_v46  ;;  %v1687_v29 = vadd.f32 %v7558_v33, %v1651_v40  ;;  %v1649_v37 = vmul.f32 %v7510_v19, %v7912_v18  ;;  %2251 = vst [vmem:[#allocation2 + $0xa8] sm:$0xff] %v8112_v58  ;;  %v1843_v13 = vmul.f32 0.48235294, %v6713_v36  ;;  %3012 = vmatmul.mubr.bf16.gmra.mrb[4].mxu1 %v8112_v58  ;;  %v6841_v36 = vld [vmem:[%s9310_s3 + $0x168] sm:$0xff]  }
 0x1b3   : > { %2626 = vst [vmem:[#allocation2 + $0xb8] sm:$0xff] %v2532_v7  ;;  %v6711_v59 = vround.rtne.f32 %v1777_v8  ;;  %v1782_v12 = vmul.f32 2.0731707, %v1750_v42  ;;  %v1716_v52 = vmax.f32 %v1684_v4, 0.0  ;;  %v1654_v24 = vmul.f32 %v7946_v2, %v7510_v19  ;;  %3019 = vmatprep.mubr.bf16.mxu1 %v8127_v30  ;;  %6279 = vmatprep.subr.bf16.mxu1 %v6840_v47 }
 0x1b4   : > { %v1719_v18 = vmax.f32 %v1687_v29, 0.0  ;;  %v1685_v40 = vadd.f32 %v7558_v33, %v1649_v37  ;;  %v1652_v17 = vmul.f32 %v7510_v19, %v7954_v20  ;;  %v1840_v27 = vmul.f32 0.48235294, %v6710_v60 }
 0x1b5   : > { %v8135_v10 = vpack.c.bf16 %v1843_v13, %v1842_v25  ;;  %v1841_v21 = vmul.f32 0.48235294, %v6711_v59  ;;  %v1748_v14 = vmin.f32 %v1716_v52, 123.0  ;;  %v9474_v8 = vshrl.u32 %v7995_v34, 16  ;;  %6280 = vmatpush3.bf16.msra.mxu1 %v6840_v47  ;;  %3430 = vmatmul.mubr.bf16.vlgmr.msra.gmra.mrb[52].mxu0 %v8119_v28 }
 0x1b6   : > { %v6716_v42 = vround.rtne.f32 %v1782_v12  ;;  %v1751_v4 = vmin.f32 %v1719_v18, 123.0  ;;  %v9475_v19 = vcombine.low %v7165_v26, %v7526_v22  ;;  %v9478_v25 = vcombine.low %v7529_v23, %v7165_v26  ;;  %6281 = vmatprep.subr.bf16.mxu1 %v6841_v36  ;;  %3437 = vmatprep.mubr.bf16.mxu0 %v7692_v5 }
 0x1b7   : > { %v2535_v2 = vor.u32 %v9474_v8, %v8048_v46  ;;  %v8163_v34 = vsel %vm2358_vm15, 65537, %v8119_v28  ;;  %1881 = vst [vmem:[#allocation2 + $0xf8] sm:$0xff] %v8135_v10  ;;  %v2089_v22 = vsel %vm8064_vm0, %v8135_v10, 0  ;;  %v8172_v23 = vsel %vm8071_vm7, %v8135_v10, 0 }
 0x1b8   : > { %vm8146_vm3 = vcmp.ne.s16.totalorder %v9475_v19, 0  ;;  %vm8153_vm11 = vcmp.ne.s16.totalorder %v9478_v25, 0  ;;  %v8174_v46 = vpack.c.bf16 %v1841_v21, %v1840_v27  ;;  %v1717_v60 = vmax.f32 %v1685_v40, 0.0 }
 0x1b9   : > { %v2168_v7 = vshrl.u32 %v2089_v22, 16  ;;  %v2545_v44 = vshll.u32 %v8172_v23, 16  ;;  %v1690_v29 = vadd.f32 %v7558_v33, %v1654_v24  ;;  %v1688_v37 = vadd.f32 %v7558_v33, %v1652_v17  ;;  %6282 = vmatpush3.bf16.msra.mxu1 %v6841_v36 }
 0x1ba   : > { %1880 = vst [vmem:[#allocation2 + $0xe0] sm:$0xff] %v8174_v46  ;;  %v2088_v39 = vsel %vm8082_vm13, %v8174_v46, 0  ;;  %v2464_v13 = vsel %vm8089_vm10, %v8174_v46, 0  ;;  %v1780_v59 = vmul.f32 2.0731707, %v1748_v14  ;;  %v2171_v47 = vshll.u32 %v2089_v22, 16  ;;  %3020 = vmatmul.mubr.bf16.gmra.mrb[8].mxu1 %v8098_v48  ;;  %6283 = vmatprep.subr.bf16.mxu1 %v6842_v50  ;;  %vm9498_vm13 = vmmov %vm9472_vm1 }
 0x1bb   : > { %v1783_v12 = vmul.f32 2.0731707, %v1751_v4  ;;  %v8190_v33 = vrot.slane %v2168_v7, 7  ;;  %v2160_v52 = vshrl.u32 %v2088_v39, 16  ;;  %v1846_v18 = vmul.f32 0.48235294, %v6716_v42  ;;  %3027 = vmatprep.mubr.bf16.mxu1 %v8174_v46  ;;  %vm9499_vm10 = vmmov %vm9472_vm1 }
 0x1bc   : > { %v2547_v40 = vrot.slane %v2545_v44, 1  ;;  %v2163_v24 = vshll.u32 %v2088_v39, 16  ;;  %v2537_v15 = vshll.u32 %v2464_v13, 16  ;;  %v2541_v21 = vshrl.u32 %v2464_v13, 16 }
 0x1bd   : > { %v6717_v17 = vround.rtne.f32 %v1783_v12  ;;  %v2173_v54 = vor.u32 %v2171_v47, %v8190_v33  ;;  %v2162_v27 = vrot.slane %v2160_v52, 7  ;;  %v1749_v14 = vmin.f32 %v1717_v60, 123.0  ;;  %6284 = vmatpush3.bf16.msra.mxu1 %v6842_v50  ;;  %3438 = vmatmul.mubr.bf16.gmra.mrb[56].mxu0 %v7771_v31 }
 0x1be   : > { %v9481_v8 = vcombine.low %v7165_v26, %v7550_v32  ;;  %v9484_v5 = vcombine.low %v7572_v41, %v7165_v26  ;;  %v2539_v19 = vrot.slane %v2537_v15, 1  ;;  %v6714_v25 = vround.rtne.f32 %v1780_v59  ;;  %v6843_v32 = vld [vmem:[%s9310_s3 + $0x178] sm:$0xff]   ;;  %3445 = vmatprep.mubr.bf16.mxu0 %v7783_v56 }
 0x1bf   : > { %v1847_v22 = vmul.f32 0.48235294, %v6717_v17  ;;  %v1722_v60 = vmax.f32 %v1690_v29, 0.0  ;;  %v2165_v7 = vor.u32 %v2163_v24, %v2162_v27  ;;  %v8214_v44 = vsel %vm9487_vm8, %v2162_v27, %v2173_v54  ;;  %v6894_v24 = vld [vmem:[%s9311_s4] ss:$0 sm:$0xff]  ;;  %6285 = vmatprep.subr.bf16.mxu1 %v6843_v32  ;;  %vm9519_vm8 = vmmov %vm9488_vm5 }
 0x1c0   : > { %vm8198_vm14 = vcmp.ne.s16.totalorder %v9481_v8, 0  ;;  %vm8205_vm6 = vcmp.ne.s16.totalorder %v9484_v5, 0  ;;  %v1781_v41 = vmul.f32 2.0731707, %v1749_v14  ;;  %v1720_v39 = vmax.f32 %v1688_v37, 0.0  ;;  %2254 = vst [vmem:[#allocation2 + $0xf0] sm:$0xff] %v8214_v44 }
 0x1c1   : > { %v2540_v13 = vsel %vm2472_vm4, %v2535_v2, %v2539_v19  ;;  %v2543_v36 = vor.u32 %v2541_v21, %v2539_v19  ;;  %v8218_v12 = vpack.c.bf16 %v1847_v22, %v1846_v18  ;;  %v1754_v59 = vmin.f32 %v1722_v60, 123.0  ;;  %v6895_v21 = vld [vmem:[%s9311_s4 + $0x1] ss:$0 sm:$0xff]  ;;  %6286 = vmatpush3.bf16.msra.mxu1 %v6843_v32 }
 0x1c2   : > { %v8222_v29 = vsel %vm9488_vm5, %v8018_v16, %v2165_v7  ;;  %2627 = vst [vmem:[#allocation2 + $0xd0] sm:$0xff] %v2540_v13  ;;  %v6715_v47 = vround.rtne.f32 %v1781_v41  ;;  %v1752_v52 = vmin.f32 %v1720_v39, 123.0  ;;  %v1655_v37 = vmul.f32 %v6894_v24, %v7981_v0  ;;  %v8243_v0 = vld [vmem:[%s9310_s3 + $0x80] sm:$0xff]  }
 0x1c3   : > { %2253 = vst [vmem:[#allocation2 + $0xd8] sm:$0xff] %v8222_v29  ;;  %v2548_v2 = vsel %vm2472_vm4, %v2543_v36, %v2547_v40  ;;  %1883 = vst [vmem:[#allocation2 + $0x128] sm:$0xff] %v8218_v12  ;;  %v2091_v16 = vsel %vm8146_vm3, %v8218_v12, 0  ;;  %v8237_v18 = vsel %vm8153_vm11, %v8218_v12, 0  ;;  %v1786_v15 = vmul.f32 2.0731707, %v1754_v59  ;;  %3028 = vmatmul.mubr.bf16.gmra.mrb[12].mxu1 %v8222_v29  ;;  %6319 = vmatprep.subr.bf16.mxu1 %v8243_v0 }
 0x1c4   : > { %v2549_v50 = vshrl.u32 %v8172_v23, 16  ;;  %2628 = vst [vmem:[#allocation2 + $0xe8] sm:$0xff] %v2548_v2  ;;  %v2184_v17 = vshrl.u32 %v2091_v16, 16  ;;  %v2561_v20 = vshll.u32 %v8237_v18, 16  ;;  %v5325_v9 = vcombine.low %v8163_v34, %v7165_v26  ;;  %3035 = vmatprep.mubr.bf16.mxu1 %v8135_v10 }
 0x1c5   : > { %v1844_v54 = vmul.f32 0.48235294, %v6714_v25  ;;  %v1845_v27 = vmul.f32 0.48235294, %v6715_v47  ;;  %v6720_v31 = vround.rtne.f32 %v1786_v15  ;;  %v1691_v14 = vadd.f32 %v6895_v21, %v1655_v37  ;;  %3446 = vmatmul.mubr.bf16.gmra.mrb[60].mxu0 %v7824_v49 }
 0x1c6   : > { %v2551_v23 = vor.u32 %v2549_v50, %v2547_v40  ;;  %v8254_v8 = vrot.slane %v2184_v17, 7  ;;  %v1653_v5 = vmul.f32 %v6894_v24, %v7986_v3  ;;  %v1658_v19 = vmul.f32 %v6894_v24, %v8012_v63  ;;  %3453 = vmatprep.mubr.bf16.mxu0 %v7792_v57 }
 0x1c7   : > { %v9489_v22 = vand.u32 15, %v7655_v53  ;;  %v2187_v25 = vshll.u32 %v2091_v16, 16  ;;  %v8265_v60 = vpack.c.bf16 %v1845_v27, %v1844_v54  ;;  %v1784_v7 = vmul.f32 2.0731707, %v1752_v52 }
 0x1c8   : > { %v1723_v40 = vmax.f32 %v1691_v14, 0.0  ;;  %v8268_v41 = vrot.slane %v2561_v20, 1  ;;  %v1850_v3 = vmul.f32 0.48235294, %v6720_v31  ;;  %v9492_v53 = vcombine.low %v7165_v26, %v7596_v35 }
 0x1c9   : > { %vm8260_vm9 = vcmp.ne.s32.totalorder %v9489_v22, 15  ;;  %v1689_v39 = vadd.f32 %v6895_v21, %v1653_v5  ;;  %v1694_v13 = vadd.f32 %v6895_v21, %v1658_v19  ;;  %v2189_v32 = vor.u32 %v2187_v25, %v8254_v8  ;;  %1882 = vst [vmem:[#allocation2 + $0x110] sm:$0xff] %v8265_v60 }
 0x1ca   : > { %vm8273_vm0 = vcmp.ne.s16.totalorder %v9492_v53, 0  ;;  %v2090_v36 = vsel %vm8198_vm14, %v8265_v60, 0  ;;  %v2466_v59 = vsel %vm8205_vm6, %v8265_v60, 0  ;;  %v1755_v47 = vmin.f32 %v1723_v40, 123.0  ;;  %vm1981_vm1 = vmpackc.low %vm8260_vm9, %vm8260_vm9 }
 0x1cb   : > { %v2176_v35 = vshrl.u32 %v2090_v36, 16  ;;  %v2179_v52 = vshll.u32 %v2090_v36, 16  ;;  %v2553_v37 = vshll.u32 %v2466_v59, 16  ;;  %v2557_v2 = vshrl.u32 %v2466_v59, 16  ;;  %3036 = vmatmul.mubr.bf16.gmra.mrb[16].mxu1 %v8214_v44 }
 0x1cc   : > { %v1787_v16 = vmul.f32 2.0731707, %v1755_v47  ;;  %v9495_v15 = vcombine.low %v7609_v6, %v7165_v26  ;;  %v1721_v17 = vmax.f32 %v1689_v39, 0.0  ;;  %v1726_v4 = vmax.f32 %v1694_v13, 0.0  ;;  %3043 = vmatprep.mubr.bf16.mxu1 %v8265_v60 }
 0x1cd   : > { %v1656_v20 = vmul.f32 %v6894_v24, %v8021_v43  ;;  %v2178_v42 = vrot.slane %v2176_v35, 7  ;;  %v2555_v54 = vrot.slane %v2553_v37, 1  ;;  %v1659_v27 = vmul.f32 %v6894_v24, %v8032_v62  ;;  %v9507_v35 = vld [vmem:[#allocation5_spill] sm:$0xff] }
 0x1ce   : > { %vm8288_vm7 = vcmp.ne.s16.totalorder %v9495_v15, 0  ;;  %v1657_v31 = vmul.f32 %v6894_v24, %v8044_v1  ;;  %v6721_v14 = vround.rtne.f32 %v1787_v16  ;;  %v1753_v6 = vmin.f32 %v1721_v17, 123.0  ;;  %v9511_v17 = vld [vmem:[#allocation8_spill] sm:$0xff] }
 0x1cf   : > { %v1758_v5 = vmin.f32 %v1726_v4, 123.0  ;;  %v1692_v19 = vadd.f32 %v6895_v21, %v1656_v20  ;;  %v2181_v22 = vor.u32 %v2179_v52, %v2178_v42  ;;  %v8299_v25 = vsel %vm9498_vm13, %v2178_v42, %v2189_v32  ;;  %3454 = vmatmul.mubr.bf16.gmra.mrb[64].mxu0 %v9511_v17  ;;  %v9512_v20 = vld [vmem:[#allocation6_spill] sm:$0xff] }
 0x1d0   : > { %v8302_v49 = vsel %vm2472_vm4, %v2551_v23, %v2555_v54  ;;  %v2559_v43 = vor.u32 %v2557_v2, %v2555_v54  ;;  %2256 = vst [vmem:[#allocation2 + $0x120] sm:$0xff] %v8299_v25  ;;  %v6718_v57 = vround.rtne.f32 %v1784_v7  ;;  %v1851_v62 = vmul.f32 0.48235294, %v6721_v14  ;;  %v2636_v54 = vld [vmem:[#allocation2 + $0x190] sm:$0xff] }
 0x1d1   : > { %2629 = vst [vmem:[#allocation2 + $0x100] sm:$0xff] %v8302_v49  ;;  %v1785_v1 = vmul.f32 2.0731707, %v1753_v6  ;;  %v1695_v24 = vadd.f32 %v6895_v21, %v1659_v27  ;;  %v8309_v40 = vsel %vm9499_vm10, %v8190_v33, %v2181_v22  ;;  %v1724_v23 = vmax.f32 %v1692_v19, 0.0 }
 0x1d2   : > { %v8313_v53 = vsel %vm2472_vm4, %v2559_v43, %v8268_v41  ;;  %v1693_v39 = vadd.f32 %v6895_v21, %v1657_v31  ;;  %2255 = vst [vmem:[#allocation2 + $0x108] sm:$0xff] %v8309_v40  ;;  %v8317_v13 = vpack.c.bf16 %v1851_v62, %v1850_v3  ;;  %v1790_v32 = vmul.f32 2.0731707, %v1758_v5  ;;  %v9503_v21 = vld [vmem:[#allocation4_spill] sm:$0xff]  ;;  %v9518_v31 = vld [vmem:[#allocation9_spill] sm:$0xff] }
 0x1d3   : > { %2630 = vst [vmem:[#allocation2 + $0x118] sm:$0xff] %v8313_v53  ;;  %v6719_v7 = vround.rtne.f32 %v1785_v1  ;;  %v1727_v36 = vmax.f32 %v1695_v24, 0.0  ;;  %v9500_v33 = vcombine.low %v7165_v26, %v7619_v45  ;;  %v9504_v47 = vcombine.low %v9503_v21, %v7165_v26  ;;  %3461 = vmatprep.mubr.bf16.mxu0 %v9518_v31  ;;  %3044 = vmatmul.mubr.bf16.gmra.mrb[20].mxu1 %v8309_v40 }
 0x1d4   : > { %v9508_v52 = vand.u32 15, %v9507_v35  ;;  %v1725_v37 = vmax.f32 %v1693_v39, 0.0  ;;  %v1848_v2 = vmul.f32 0.48235294, %v6718_v57  ;;  %1885 = vst [vmem:[#allocation2 + $0x158] sm:$0xff] %v8317_v13  ;;  %v2093_v45 = vsel %vm8273_vm0, %v8317_v13, 0  ;;  %3051 = vmatprep.mubr.bf16.mxu1 %v8218_v12 }
 0x1d5   : > { %vm8325_vm12 = vcmp.ne.s16.totalorder %v9500_v33, 0  ;;  %vm8332_vm15 = vcmp.ne.s16.totalorder %v9504_v47, 0  ;;  %v1849_v16 = vmul.f32 0.48235294, %v6719_v7  ;;  %v1756_v15 = vmin.f32 %v1724_v23, 123.0 }
 0x1d6   : > { %vm8338_vm3 = vcmp.ne.s32.totalorder %v9508_v52, 0  ;;  %v2200_v4 = vshrl.u32 %v2093_v45, 16  ;;  %v9513_v42 = vcombine.low %v7165_v26, %v9512_v20  ;;  %vm8357_vm14 = vcmp.ne.s16.totalorder %v5325_v9, 0 }
 0x1d7   : > { %v2013_v63 = vsel %vm1981_vm1, 65537, %v8119_v28  ;;  %v2565_v14 = vshrl.u32 %v8237_v18, 16  ;;  %v8364_v6 = vpack.c.bf16 %v1849_v16, %v1848_v2  ;;  %v6724_v5 = vround.rtne.f32 %v1790_v32  ;;  %vm2356_vm6 = vmpackc.low %vm8338_vm3, %vm8338_vm3  ;;  %3462 = vmatmul.mubr.bf16.gmra.mrb[68].mxu0 %v8014_v61 }
 0x1d8   : > { %vm8350_vm11 = vcmp.ne.s16.totalorder %v9513_v42, 0  ;;  %v1759_v19 = vmin.f32 %v1727_v36, 123.0  ;;  %v8370_v34 = vrot.slane %v2200_v4, 7  ;;  %v2203_v9 = vshll.u32 %v2093_v45, 16  ;;  %3469 = vmatprep.mubr.bf16.mxu0 %v8034_v11 }
 0x1d9   : > { %v8375_v22 = vsel %vm8288_vm7, %v8317_v13, 0  ;;  %v1757_v43 = vmin.f32 %v1725_v37, 123.0  ;;  %1884 = vst [vmem:[#allocation2 + $0x140] sm:$0xff] %v8364_v6  ;;  %v2092_v18 = vsel %vm8325_vm12, %v8364_v6, 0  ;;  %v2468_v57 = vsel %vm8332_vm15, %v8364_v6, 0  ;;  %vm2635_vm7 = vmand %vm2240_vm2, %vm2472_vm4 }
 0x1da   : > { %v1788_v62 = vmul.f32 2.0731707, %v1756_v15  ;;  %v1791_v1 = vmul.f32 2.0731707, %v1759_v19  ;;  %v2205_v24 = vor.u32 %v2203_v9, %v8370_v34  ;;  %v2192_v50 = vshrl.u32 %v2092_v18, 16  ;;  %vm9523_vm2 = vmmov %vm9488_vm5 }
 0x1db   : > { %v5308_v23 = vcombine.low %v7165_v26, %v2013_v63  ;;  %v2388_v39 = vsel %vm2356_vm6, 65537, %v8119_v28  ;;  %v2567_v7 = vor.u32 %v2565_v14, %v8268_v41  ;;  %v2577_v32 = vshll.u32 %v8375_v22, 16  ;;  %3052 = vmatmul.mubr.bf16.gmra.mrb[24].mxu1 %v8299_v25  ;;  %v2261_v14 = vld [vmem:[#allocation2 + $0x198] sm:$0x1]  ;;  %vm9524_vm10 = vmmov %vm9523_vm2 }
 0x1dc   : > { %v2569_v36 = vshll.u32 %v2468_v57, 16  ;;  %v6725_v33 = vround.rtne.f32 %v1791_v1  ;;  %v2194_v59 = vrot.slane %v2192_v50, 7  ;;  %v2195_v21 = vshll.u32 %v2092_v18, 16  ;;  %3059 = vmatprep.mubr.bf16.mxu1 %v8364_v6  ;;  %v9520_v1 = vld [vmem:[#allocation3_spill] sm:$0xff] }
 0x1dd   : > { %v1854_v47 = vmul.f32 0.48235294, %v6724_v5  ;;  %v1789_v3 = vmul.f32 2.0731707, %v1757_v43  ;;  %v2573_v52 = vshrl.u32 %v2468_v57, 16  ;;  %v6722_v56 = vround.rtne.f32 %v1788_v62 }
 0x1de   : > { %v2571_v35 = vrot.slane %v2569_v36, 1  ;;  %v1855_v37 = vmul.f32 0.48235294, %v6725_v33  ;;  %v2197_v2 = vor.u32 %v2195_v21, %v2194_v59  ;;  %v8392_v45 = vsel %vm9519_vm8, %v2194_v59, %v2205_v24 }
 0x1df   : > { %v6723_v28 = vround.rtne.f32 %v1789_v3  ;;  %v5324_v41 = vcombine.low %v2388_v39, %v7165_v26  ;;  %v2579_v16 = vrot.slane %v2577_v32, 1  ;;  %2258 = vst [vmem:[#allocation2 + $0x150] sm:$0xff] %v8392_v45  ;;  %v1852_v11 = vmul.f32 0.48235294, %v6722_v56  ;;  %3470 = vmatmul.mubr.bf16.gmra.mrb[72].mxu0 %v8102_v38  ;;  %v9522_v39 = vld [vmem:[#allocation7_spill] sm:$0xff] }
 0x1e0   : > { %v8398_v15 = vsel %vm2472_vm4, %v2567_v7, %v2571_v35  ;;  %v2575_v17 = vor.u32 %v2573_v52, %v2571_v35  ;;  %v1871_v4 = vpack.c.bf16 %v1855_v37, %v1854_v47  ;;  %v8403_v61 = vsel %vm9488_vm5, %v8254_v8, %v2197_v2  ;;  %3477 = vmatprep.mubr.bf16.mxu0 %v9522_v39  ;;  %v8497_v2 = vld [vmem:[#allocation2 + $0xa0] sm:$0xff] }
 0x1e1   : > { %2631 = vst [vmem:[#allocation2 + $0x130] sm:$0xff] %v8398_v15  ;;  %v1853_v20 = vmul.f32 0.48235294, %v6723_v28  ;;  %2257 = vst [vmem:[#allocation2 + $0x138] sm:$0xff] %v8403_v61  ;;  %vm2078_vm9 = vcmp.ne.s16.totalorder %v5308_v23, 0  ;;  %vm2454_vm0 = vcmp.ne.s16.totalorder %v5324_v41, 0  ;;  %vm9521_vm13 = vnez %v9520_v1 }
 0x1e2   : > { %v8409_v26 = vsel %vm2472_vm4, %v2575_v17, %v2579_v16  ;;  %1887 = vst [vmem:[#allocation2 + $0x188] sm:$0xff] %v1871_v4  ;;  %v2095_v42 = vsel %vm8350_vm11, %v1871_v4, 0  ;;  %v2471_v63 = vsel %vm8357_vm14, %v1871_v4, 0  ;;  %v2581_v7 = vshrl.u32 %v8375_v22, 16  ;;  %v8501_v28 = vld [vmem:[#allocation2 + $0xb8] sm:$0xff]  ;;  %v8511_v41 = vld [vmem:[#allocation2 + $0xd0] sm:$0xff] }
 0x1e3   : > { %2632 = vst [vmem:[#allocation2 + $0x148] sm:$0xff] %v8409_v26  ;;  %v2216_v8 = vshrl.u32 %v2095_v42, 16  ;;  %v2593_v31 = vshll.u32 %v2471_v63, 16  ;;  %v8416_v5 = vpack.c.bf16 %v1853_v20, %v1852_v11  ;;  %v2219_v9 = vshll.u32 %v2095_v42, 16  ;;  %3060 = vmatmul.mubr.bf16.gmra.mrb[28].mxu1 %v8403_v61  ;;  %v6855_v17 = vld [vmem:[%s9310_s3 + $0x188] sm:$0xff]   ;;  %v6858_v20 = vld [vmem:[%s9310_s3 + $0x1d8] sm:$0xff]  }
 0x1e4   : > { %v2597_v18 = vshrl.u32 %v2471_v63, 16  ;;  %3067 = vmatprep.mubr.bf16.mxu1 %v8317_v13  ;;  %v2583_v38 = vor.u32 %v2581_v7, %v2579_v16  ;;  %v8515_v16 = vld [vmem:[#allocation2 + $0xe8] sm:$0xff]  ;;  %v6859_v11 = vld [vmem:[%s9310_s3 + $0x198] sm:$0xff]   ;;  %v6860_v42 = vld [vmem:[%s9310_s3 + $0x1e0] sm:$0xff]   ;;  %vm9527_vm12 = vcmask 97280  }
 0x1e5   : > { %v2218_v19 = vrot.slane %v2216_v8, 7  ;;  %v2595_v43 = vrot.slane %v2593_v31, 1  ;;  %1886 = vst [vmem:[#allocation2 + $0x170] sm:$0xff] %v8416_v5  ;;  %v2094_v27 = vsel %vm2078_vm9, %v8416_v5, 0  ;;  %v2470_v57 = vsel %vm2454_vm0, %v8416_v5, 0  ;;  %v6861_v63 = vld [vmem:[%s9310_s3 + $0x1a0] sm:$0xff]   ;;  %vm9528_vm15 = vmmov %vm9527_vm12 }
 0x1e6   : > { %v2208_v23 = vshrl.u32 %v2094_v27, 16  ;;  %v2585_v32 = vshll.u32 %v2470_v57, 16  ;;  %v2211_v59 = vshll.u32 %v2094_v27, 16  ;;  %v2589_v47 = vshrl.u32 %v2470_v57, 16  ;;  %v6862_v8 = vld [vmem:[%s9310_s3 + $0x1e8] sm:$0xff]   ;;  %vm9529_vm3 = vmmov %vm9527_vm12 }
 0x1e7   : > { %v2221_v62 = vor.u32 %v2219_v9, %v2218_v19  ;;  %v2262_v24 = vsel %vm9521_vm13, %v2218_v19, %v2261_v14  ;;  %v2599_v50 = vor.u32 %v2597_v18, %v2595_v43  ;;  %3478 = vmatmul.mubr.bf16.gmra.mrb[76].mxu0 %v8004_v51  ;;  %v8456_v51 = vld [vmem:[#allocation2 + $0x28] sm:$0xff]  ;;  %v6864_v14 = vld [vmem:[%s9310_s3 + $0x1f0] sm:$0xff]   ;;  %v6866_v19 = vld [vmem:[%s9310_s3 + $0x1f8] sm:$0xff]  }
 0x1e8   : > { %2263 = vst [vmem:[#allocation2 + $0x198] sm:$0x1] %v2262_v24  ;;  %v2210_v33 = vrot.slane %v2208_v23, 7  ;;  %v2587_v21 = vrot.slane %v2585_v32, 1  ;;  %3485 = vmatprep.mubr.bf16.mxu0 %v8040_v55  ;;  %v6845_v55 = vld [vmem:[%s9310_s3 + $0x88] sm:$0xff]   ;;  %v6867_v9 = vld [vmem:[%s9310_s3 + $0x1b8] sm:$0xff]   ;;  %vm9530_vm11 = vmmov %vm9529_vm3 }
 0x1e9   : > { %v8429_v36 = vsel %vm2635_vm7, %v2599_v50, %v2636_v54  ;;  %v6863_v31 = vld [vmem:[%s9310_s3 + $0x1a8] sm:$0xff]   ;;  %vm9531_vm14 = vmmov %vm9529_vm3 }
 0x1ea   : > { %2638 = vst [vmem:[#allocation2 + $0x190] sm:$0xff] %v8429_v36  ;;  %v2213_v3 = vor.u32 %v2211_v59, %v2210_v33  ;;  %v2222_v35 = vsel %vm9523_vm2, %v2210_v33, %v2221_v62  ;;  %v8435_v22 = vsel %vm2472_vm4, %v2583_v38, %v2587_v21  ;;  %v2591_v52 = vor.u32 %v2589_v47, %v2587_v21  ;;  %vm9532_vm6 = vmmov %vm9529_vm3 }
 0x1eb   : > { %2260 = vst [vmem:[#allocation2 + $0x180] sm:$0xff] %v2222_v35  ;;  %2633 = vst [vmem:[#allocation2 + $0x160] sm:$0xff] %v8435_v22  ;;  %3068 = vmatmul.mubr.bf16.gmra.mrb[32].mxu1 %v8392_v45 }
 0x1ec   : > { %v8439_v56 = vsel %vm9524_vm10, %v8370_v34, %v2213_v3  ;;  %v8444_v37 = vsel %vm2472_vm4, %v2591_v52, %v2595_v43  ;;  %3075 = vmatprep.mubr.bf16.mxu1 %v8416_v5  ;;  %vm9525_vm4 = vcmask 1045504   ;;  %v8487_v34 = vld [vmem:[#allocation2 + $0x88] sm:$0xff]  ;;  %v6868_v43 = vld [vmem:[%s9310_s3 + $0x200] sm:$0xff]   ;;  %vm9533_vm8 = vmmov %vm9529_vm3 }
 0x1ed   : > { %2259 = vst [vmem:[#allocation2 + $0x168] sm:$0xff] %v8439_v56  ;;  %2634 = vst [vmem:[#allocation2 + $0x178] sm:$0xff] %v8444_v37 }
 0x1ee   : > { %vm9526_vm1 = vmmov %vm9525_vm4 }
 0x1ef   : > { %3486 = vmatmul.mubr.bf16.gmra.mrb[80].mxu0 %v8112_v58  ;;  %v8463_v58 = vld [vmem:[#allocation2 + $0x40] sm:$0xff]  ;;  %vm9534_vm5 = vmmov %vm9529_vm3 }
 0x1f0   : > { %3493 = vmatprep.mubr.bf16.mxu0 %v8127_v30  ;;  %v6846_v30 = vld [vmem:[%s9310_s3 + $0x90] sm:$0xff]   ;;  %vm9535_vm9 = vmmov %vm9529_vm3 }
 0x1f1   : > { %vm9536_vm0 = vmmov %vm9529_vm3 }
 0x1f2   : > { %vm9537_vm7 = vmmov %vm9536_vm0 }
 0x1f3   : > { %3076 = vmatmul.mubr.bf16.gmra.mrb[36].mxu1 %v8439_v56  ;;  %vm9538_vm13 = vmmov %vm9536_vm0 }
 0x1f4   : > { %3083 = vmatprep.mubr.bf16.mxu1 %v1871_v4  ;;  %v6856_v4 = vld [vmem:[%s9310_s3 + $0x1d0] sm:$0xff]   ;;  %vm9539_vm2 = vmmov %vm9536_vm0 }
 0x1f5   : > { %vm9540_vm10 = vmmov %vm9536_vm0 }
 0x1f7   : > { %3494 = vmatmul.mubr.bf16.gmra.mrb[84].mxu0 %v8098_v48  ;;  %v8467_v48 = vld [vmem:[#allocation2 + $0x58] sm:$0xff] }
 0x1f8   : > { %3501 = vmatprep.mubr.bf16.mxu0 %v8174_v46  ;;  %v6869_v46 = vld [vmem:[%s9309_s2] sm:$0x3f]  }
 0x1f9   : > { %6692 = vmatprep.subr.msk.bf16.mxu0 %vm9525_vm4, %v6869_v46  ;;  %vm9541_vm4 = vmmov %vm9536_vm0 }
 0x1fb   : > { %3084 = vmatmul.mubr.bf16.gmra.mrb[40].mxu1 %v2222_v35 }
 0x1fc   : > { %6287 = vmatprep.mubr.bf16.mxu1 %v8456_v51 }
 0x1ff   : > { %3502 = vmatmul.mubr.bf16.gmra.mrb[88].mxu0 %v8222_v29  ;;  %v6847_v29 = vld [vmem:[%s9310_s3 + $0x98] sm:$0xff]  }
 0x200   : > { %3509 = vmatprep.mubr.bf16.mxu0 %v8135_v10  ;;  %v4482_v10 = vsel %vm9526_vm1, %v6869_v46, 0  ;;  %vm9542_vm1 = vmmov %vm9536_vm0 }
 0x201   : > { %6416 = vmatpush3.bf16.msra.mxu0 %v4482_v10  ;;  %v3719_v10 = vld [vmem:[#allocation2 + $0x30] sm:$0xff] }
 0x203   : > { %6288 = vmatmul.mubr.bf16.vlgmr.msra.gmra.mrb[44].mxu1 %v8463_v58 }
 0x204   : > { %6320 = vmatpush3.bf16.msra.mxu1 %v8243_v0  ;;  %6291 = vmatprep.mubr.bf16.mxu1 %v8467_v48  ;;  %v8483_v0 = vld [vmem:[#allocation2 + $0x70] sm:$0xff] }
 0x205   : > { %6321 = vmatprep.subr.bf16.mxu1 %v6845_v55 }
 0x207   : > { %3510 = vmatmul.mubr.bf16.gmra.mrb[92].mxu0 %v8214_v44  ;;  %v6848_v44 = vld [vmem:[%s9310_s3 + $0xa0] sm:$0xff]  }
 0x208   : > { %6322 = vmatpush3.bf16.msra.mxu1 %v6845_v55  ;;  %3517 = vmatprep.mubr.bf16.mxu0 %v8265_v60  ;;  %v6849_v60 = vld [vmem:[%s9310_s3 + $0xa8] sm:$0xff]  }
 0x209   : > { %6323 = vmatprep.subr.bf16.mxu1 %v6846_v30 }
 0x20b   : > { %6292 = vmatmul.mubr.bf16.gmra.mrb[48].mxu1 %v8483_v0 }
 0x20c   : > { %6295 = vmatprep.mubr.bf16.mxu1 %v8487_v34  ;;  %6324 = vmatpush3.bf16.msra.mxu1 %v6846_v30 }
 0x20d   : > { %6325 = vmatprep.subr.bf16.mxu1 %v6847_v29 }
 0x20f   : > { %3518 = vmatmul.mubr.bf16.gmra.mrb[96].mxu0 %v8309_v40  ;;  %v6850_v40 = vld [vmem:[%s9310_s3 + $0xb0] sm:$0xff]  }
 0x210   : > { %6326 = vmatpush3.bf16.msra.mxu1 %v6847_v29  ;;  %3525 = vmatprep.mubr.bf16.mxu0 %v8218_v12  ;;  %v6851_v12 = vld [vmem:[%s9310_s3 + $0xb8] sm:$0xff]   ;;  %v3723_v29 = vld [vmem:[#allocation2 + $0x50] sm:$0xff] }
 0x211   : > { %6327 = vmatprep.subr.bf16.mxu1 %v6848_v44 }
 0x213   : > { %6296 = vmatmul.mubr.bf16.gmra.mrb[52].mxu1 %v8497_v2 }
 0x214   : > { %6299 = vmatprep.mubr.bf16.mxu1 %v8501_v28  ;;  %6328 = vmatpush3.bf16.msra.mxu1 %v6848_v44  ;;  %v6877_v44 = vld [vmem:[%s6966_s27 + $0x8] sm:$0xff]  }
 0x215   : > { %6329 = vmatprep.subr.bf16.mxu1 %v6849_v60 }
 0x217   : > { %3526 = vmatmul.mubr.bf16.gmra.mrb[100].mxu0 %v8299_v25  ;;  %v6852_v25 = vld [vmem:[%s9310_s3 + $0x1c0] sm:$0xff]  }
 0x218   : > { %6330 = vmatpush3.bf16.msra.mxu1 %v6849_v60  ;;  %3533 = vmatprep.mubr.bf16.mxu0 %v8364_v6  ;;  %v6853_v6 = vld [vmem:[%s9310_s3 + $0x180] sm:$0xff]  }
 0x219   : > { %6331 = vmatprep.subr.bf16.mxu1 %v6850_v40 }
 0x21b   : > { %6300 = vmatmul.mubr.bf16.gmra.mrb[56].mxu1 %v8511_v41 }
 0x21c   : > { %6303 = vmatprep.mubr.bf16.mxu1 %v8515_v16  ;;  %6332 = vmatpush3.bf16.msra.mxu1 %v6850_v40  ;;  %v6878_v40 = vld [vmem:[%s6966_s27 + $0x10] sm:$0xff]  }
 0x21d   : > { %6333 = vmatprep.subr.bf16.mxu1 %v6851_v12 }
 0x21f   : > { %3534 = vmatmul.mubr.bf16.gmra.mrb[104].mxu0 %v8403_v61  ;;  %v6857_v61 = vld [vmem:[%s9310_s3 + $0x190] sm:$0xff]  }
 0x220   : > { %6334 = vmatpush3.bf16.msra.mxu1 %v6851_v12  ;;  %3541 = vmatprep.mubr.bf16.mxu0 %v8317_v13  ;;  %v2641_v13 = vld [vmem:[#allocation2 + $0x10] sm:$0xff] }
 0x221   : > { %6016 = vmatprep.subr.bf16.mxu1 %v6852_v25  ;;  %v6871_v25 = vld [vmem:[%s9310_s3 + $0x210] sm:$0xff]  }
 0x223   : > { %6304 = vmatmul.mubr.bf16.gmra.mrb[60].mxu1 %v8302_v49 }
 0x224   : > { %6307 = vmatprep.mubr.bf16.mxu1 %v8313_v53 }
 0x227   : > { %3542 = vmatmul.mubr.bf16.gmra.mrb[108].mxu0 %v8392_v45  ;;  %v6854_v45 = vld [vmem:[%s9310_s3 + $0x1c8] sm:$0xff]  }
 0x228   : > { %3549 = vmatprep.mubr.bf16.mxu0 %v8416_v5  ;;  %v6865_v5 = vld [vmem:[%s9310_s3 + $0x1b0] sm:$0xff]  }
 0x22b   : > { %6308 = vmatmul.mubr.bf16.gmra.mrb[64].mxu1 %v8398_v15 }
 0x22c   : > { %6311 = vmatprep.mubr.bf16.mxu1 %v8409_v26 }
 0x22f   : > { %3550 = vmatmul.mubr.bf16.gmra.mrb[112].mxu0 %v8439_v56 }
 0x230   : > { %6417 = vmatprep.mubr.msk.bf16.mxu0 %vm9527_vm12, %v6877_v44 }
 0x233   : > { %6312 = vmatmul.mubr.bf16.gmra.mrb[68].mxu1 %v8435_v22 }
 0x234   : > { %6315 = vmatprep.mubr.bf16.mxu1 %v8444_v37 }
 0x237   : > { %6418 = vmatmul.mubr.msk.bf16.vlgmr.msra.gmra.mrb[116].mxu0 %vm9528_vm15, %v6878_v40 }
 0x23b   : > { %6316 = vmatmul.mubr.bf16.gmra.mrb[72].mxu1 %v8429_v36 }
 0x23c   : > { %6335 = vmatprep.mubr.bf16.mxu1 %v2641_v13 }
 0x243   : > { %6336 = vmatmul.mubr.bf16.vlgmr.msra.gmra.mrb[44].mxu1 %v8456_v51 }
 0x244   : > { %6017 = vmatpush3.bf16.msra.mxu1 %v6853_v6  ;;  %6339 = vmatprep.mubr.bf16.mxu1 %v8463_v58 }
 0x245   : > { %6018 = vmatprep.subr.bf16.mxu1 %v6854_v45 }
 0x248   : > { %6019 = vmatpush3.bf16.msra.mxu1 %v6855_v17 }
 0x249   : > { %6020 = vmatprep.subr.bf16.mxu1 %v6856_v4 }
 0x24b   : > { %6340 = vmatmul.mubr.bf16.gmra.mrb[48].mxu1 %v8467_v48 }
 0x24c   : > { %6343 = vmatprep.mubr.bf16.mxu1 %v8483_v0  ;;  %6021 = vmatpush3.bf16.msra.mxu1 %v6857_v61 }
 0x24d   : > { %6022 = vmatprep.subr.bf16.mxu1 %v6858_v20 }
 0x250   : > { %6023 = vmatpush3.bf16.msra.mxu1 %v6859_v11 }
 0x251   : > { %6024 = vmatprep.subr.bf16.mxu1 %v6860_v42 }
 0x253   : > { %6344 = vmatmul.mubr.bf16.gmra.mrb[52].mxu1 %v8487_v34 }
 0x254   : > { %6347 = vmatprep.mubr.bf16.mxu1 %v8497_v2  ;;  %6025 = vmatpush3.bf16.msra.mxu1 %v6861_v63  ;;  %v6872_v63 = vld [vmem:[%s9310_s3 + $0x218] sm:$0xff]  }
 0x255   : > { %6026 = vmatprep.subr.bf16.mxu1 %v6862_v8 }
 0x258   : > { %6027 = vmatpush3.bf16.msra.mxu1 %v6863_v31  ;;  %v5760_v18 = vpop.f32.mrb[32].mxu0  ;;  %v6896_v31 = vld [vmem:[#allocation2 + $0x48] sm:$0xff] }
 0x259   : > { %6028 = vmatprep.subr.bf16.mxu1 %v6864_v14  ;;  %v5761_v54 = vpop.f32.mrb[33].mxu0  ;;  %v6879_v14 = vld [vmem:[%s6966_s27 + $0x18] sm:$0xff]  }
 0x25a   : > { %v8589_v27 = vadd.f32 %v5761_v54, %v5760_v18  ;;  %v5763_v57 = vpop.f32.mrb[34].mxu0  ;;  %v6873_v18 = vld [vmem:[%s9310_s3 + $0x220] sm:$0xff]   ;;  %6421 = vmatprep.mubr.msk.bf16.mxu0 %vm9529_vm3, %v6879_v14 }
 0x25b   : > { %6348 = vmatmul.mubr.bf16.gmra.mrb[56].mxu1 %v8501_v28  ;;  %v5764_v62 = vpop.f32.mrb[35].mxu0 }
 0x25c   : > { %6351 = vmatprep.mubr.bf16.mxu1 %v8511_v41  ;;  %6029 = vmatpush3.bf16.msra.mxu1 %v6865_v5  ;;  %v8591_v1 = vadd.f32 %v5764_v62, %v5763_v57  ;;  %v6897_v5 = vld [vmem:[#allocation2 + $0x68] sm:$0xff] }
 0x25d   : > { %6030 = vmatprep.subr.bf16.mxu1 %v6866_v19 }
 0x260   : > { %6031 = vmatpush3.bf16.msra.mxu1 %v6867_v9  ;;  %v5766_v24 = vpop.f32.mrb[36].mxu0  ;;  %v6880_v9 = vld [vmem:[%s6966_s27 + $0x20] sm:$0xff]  }
 0x261   : > { %6367 = vmatprep.subr.bf16.mxu1 %v6868_v43  ;;  %v5767_v50 = vpop.f32.mrb[37].mxu0  ;;  %6422 = vmatmul.mubr.msk.bf16.gmra.mrb[120].mxu0 %vm9530_vm11, %v6880_v9 }
 0x262   : > { %v8595_v23 = vadd.f32 %v5767_v50, %v5766_v24  ;;  %v5769_v39 = vpop.f32.mrb[38].mxu0 }
 0x263   : > { %6352 = vmatmul.mubr.bf16.gmra.mrb[60].mxu1 %v8515_v16  ;;  %v5770_v7 = vpop.f32.mrb[39].mxu0 }
 0x264   : > { %6355 = vmatprep.mubr.bf16.mxu1 %v8302_v49  ;;  %v8597_v32 = vadd.f32 %v5770_v7, %v5769_v39 }
 0x26b   : > { %6356 = vmatmul.mubr.bf16.gmra.mrb[64].mxu1 %v8313_v53  ;;  %v3720_v53 = vld [vmem:[#allocation2 + $0x38] sm:$0xff] }
 0x26c   : > { %6359 = vmatprep.mubr.bf16.mxu1 %v8398_v15 }
 0x26e   : > { %v5772_v36 = vpop.f32.mrb[40].mxu0 }
 0x26f   : > { %v5773_v33 = vpop.f32.mrb[41].mxu0 }
 0x270   : > { %v8603_v59 = vadd.f32 %v5773_v33, %v5772_v36  ;;  %v5775_v49 = vpop.f32.mrb[42].mxu0 }
 0x271   : > { %v5776_v38 = vpop.f32.mrb[43].mxu0 }
 0x272   : > { %v8605_v21 = vadd.f32 %v5776_v38, %v5775_v49  ;;  %v6874_v38 = vld [vmem:[%s9310_s3 + $0x228] sm:$0xff]  }
 0x273   : > { %6360 = vmatmul.mubr.bf16.gmra.mrb[68].mxu1 %v8409_v26 }
 0x274   : > { %6363 = vmatprep.mubr.bf16.mxu1 %v8435_v22 }
 0x276   : > { %v5778_v35 = vpop.f32.mrb[44].mxu0 }
 0x277   : > { %v5790_v47 = vpop.f32.mrb[0].mxu1  ;;  %v5779_v26 = vpop.f32.mrb[45].mxu0 }
 0x278   : > { %v5791_v3 = vpop.f32.mrb[1].mxu1  ;;  %v8610_v56 = vadd.f32 %v5779_v26, %v5778_v35  ;;  %v5781_v51 = vpop.f32.mrb[46].mxu0  ;;  %v6898_v35 = vld [vmem:[#allocation2 + $0x60] sm:$0xff]  ;;  %v6882_v26 = vld [vmem:[%s6966_s27 + $0x30] sm:$0xff]  }
 0x279   : > { %v8608_v15 = vadd.f32 %v5791_v3, %v5790_v47  ;;  %v5793_v52 = vpop.f32.mrb[2].mxu1  ;;  %v5782_v30 = vpop.f32.mrb[47].mxu0 }
 0x27a   : > { %v5794_v22 = vpop.f32.mrb[3].mxu1  ;;  %v8614_v46 = vadd.f32 %v5782_v30, %v5781_v51  ;;  %v6875_v51 = vld [vmem:[%s9310_s3 + $0x230] sm:$0xff]  }
 0x27b   : > { %6364 = vmatmul.mubr.bf16.gmra.mrb[72].mxu1 %v8444_v37  ;;  %v8612_v55 = vadd.f32 %v5794_v22, %v5793_v52  ;;  %v6870_v37 = vld [vmem:[%s9310_s3 + $0x208] sm:$0xff]   ;;  %v6899_v52 = vld [vmem:[#allocation2 + $0x80] sm:$0xff] }
 0x27c   : > { %3992 = vmatprep.mubr.bf16.mxu1 %v3720_v53  ;;  %v6881_v53 = vld [vmem:[%s6966_s27 + $0x28] sm:$0xff]  }
 0x27d   : > { %6425 = vmatprep.mubr.msk.bf16.mxu0 %vm9531_vm14, %v6881_v53 }
 0x27e   : > { %6426 = vmatmul.mubr.msk.bf16.gmra.mrb[124].mxu0 %vm9532_vm6, %v6882_v26 }
 0x280   : > { %v5784_v60 = vpop.f32.mrb[48].mxu0 }
 0x281   : > { %v5785_v12 = vpop.f32.mrb[49].mxu0 }
 0x282   : > { %v8625_v6 = vadd.f32 %v5785_v12, %v5784_v60  ;;  %v5787_v45 = vpop.f32.mrb[50].mxu0 }
 0x283   : > { %3993 = vmatmul.mubr.bf16.vlgmr.msra.gmra.mrb[76].mxu1 %v3719_v10  ;;  %v5788_v4 = vpop.f32.mrb[51].mxu0 }
 0x284   : > { %6368 = vmatpush3.bf16.msra.mxu1 %v6868_v43  ;;  %4000 = vmatprep.mubr.bf16.mxu1 %v3723_v29  ;;  %v8630_v11 = vadd.f32 %v5788_v4, %v5787_v45  ;;  %v6900_v4 = vld [vmem:[#allocation2 + $0x78] sm:$0xff] }
 0x285   : > { %6369 = vmatprep.subr.bf16.mxu1 %v6870_v37  ;;  %v5796_v13 = vpop.f32.mrb[4].mxu1 }
 0x286   : > { %v5797_v17 = vpop.f32.mrb[5].mxu1 }
 0x287   : > { %v8628_v61 = vadd.f32 %v5797_v17, %v5796_v13  ;;  %v5799_v20 = vpop.f32.mrb[6].mxu1  ;;  %v6876_v13 = vld [vmem:[%s9310_s3 + $0x238] sm:$0xff]  }
 0x288   : > { %6370 = vmatpush3.bf16.msra.mxu1 %v6870_v37  ;;  %v5800_v42 = vpop.f32.mrb[7].mxu1  ;;  %v5896_v19 = vpop.f32.mrb[52].mxu0 }
 0x289   : > { %6371 = vmatprep.subr.bf16.mxu1 %v6871_v25  ;;  %v8635_v8 = vadd.f32 %v5800_v42, %v5799_v20  ;;  %v5897_v43 = vpop.f32.mrb[53].mxu0  ;;  %v3732_v20 = vld [vmem:[#allocation2 + $0x98] sm:$0xff] }
 0x28a   : > { %v5898_v57 = vadd.f32 %v5897_v43, %v5896_v19  ;;  %v5899_v62 = vpop.f32.mrb[54].mxu0  ;;  %v6883_v42 = vld [vmem:[%s6966_s27 + $0x38] sm:$0xff]  }
 0x28b   : > { %4001 = vmatmul.mubr.bf16.gmra.mrb[80].mxu1 %v6896_v31  ;;  %v5900_v50 = vpop.f32.mrb[55].mxu0  ;;  %6429 = vmatprep.mubr.msk.bf16.mxu0 %vm9533_vm8, %v6883_v42 }
 0x28c   : > { %4008 = vmatprep.mubr.bf16.mxu1 %v6897_v5  ;;  %6372 = vmatpush3.bf16.msra.mxu1 %v6871_v25  ;;  %v8647_v36 = vadd.f32 %v5898_v57, %v8589_v27  ;;  %v5901_v33 = vadd.f32 %v5900_v50, %v5899_v62  ;;  %v3731_v50 = vld [vmem:[#allocation2 + $0x90] sm:$0xff] }
 0x28d   : > { %6373 = vmatprep.subr.bf16.mxu1 %v6872_v63  ;;  %v5802_v54 = vpop.f32.mrb[8].mxu1 }
 0x28e   : > { %v5803_v24 = vpop.f32.mrb[9].mxu1  ;;  %v8655_v3 = vadd.f32 %v5901_v33, %v8591_v1  ;;  %v3735_v33 = vld [vmem:[#allocation2 + $0xb0] sm:$0xff] }
 0x28f   : > { %v8644_v39 = vadd.f32 %v5803_v24, %v5802_v54  ;;  %v5805_v7 = vpop.f32.mrb[10].mxu1 }
 0x290   : > { %6374 = vmatpush3.bf16.msra.mxu1 %v6872_v63  ;;  %v5806_v49 = vpop.f32.mrb[11].mxu1  ;;  %v5902_v27 = vpop.f32.mrb[56].mxu0  ;;  %v6884_v63 = vld [vmem:[%s6966_s27 + $0x40] sm:$0xff]  }
 0x291   : > { %6375 = vmatprep.subr.bf16.mxu1 %v6873_v18  ;;  %v8652_v47 = vadd.f32 %v5806_v49, %v5805_v7  ;;  %v5903_v22 = vpop.f32.mrb[57].mxu0  ;;  %6430 = vmatmul.mubr.msk.bf16.gmra.mrb[128].mxu0 %vm9534_vm5, %v6884_v63  ;;  %v6885_v49 = vld [vmem:[%s6966_s27 + $0x48] sm:$0xff]  }
 0x292   : > { %v5904_v37 = vadd.f32 %v5903_v22, %v5902_v27  ;;  %v5905_v1 = vpop.f32.mrb[58].mxu0  ;;  %6433 = vmatprep.mubr.msk.bf16.mxu0 %vm9535_vm9, %v6885_v49  ;;  %v6890_v49 = vld [vmem:[%s6966_s27 + $0x70] sm:$0xff]  }
 0x293   : > { %4009 = vmatmul.mubr.bf16.gmra.mrb[84].mxu1 %v6898_v35  ;;  %v5906_v29 = vpop.f32.mrb[59].mxu0  ;;  %v6886_v35 = vld [vmem:[%s6966_s27 + $0x50] sm:$0xff]  }
 0x294   : > { %4016 = vmatprep.mubr.bf16.mxu1 %v6899_v52  ;;  %6376 = vmatpush3.bf16.msra.mxu1 %v6873_v18  ;;  %v8667_v40 = vadd.f32 %v5904_v37, %v8595_v23  ;;  %v5907_v12 = vadd.f32 %v5906_v29, %v5905_v1  ;;  %v3734_v29 = vld [vmem:[#allocation2 + $0xa8] sm:$0xff] }
 0x295   : > { %6377 = vmatprep.subr.bf16.mxu1 %v6874_v38 }
 0x296   : > { %v5808_v30 = vpop.f32.mrb[12].mxu1  ;;  %v8675_v17 = vadd.f32 %v5907_v12, %v8597_v32  ;;  %v6887_v12 = vld [vmem:[%s6966_s27 + $0x58] sm:$0xff]  }
 0x297   : > { %v5809_v10 = vpop.f32.mrb[13].mxu1 }
 0x298   : > { %v8664_v44 = vadd.f32 %v5809_v10, %v5808_v30  ;;  %v5811_v60 = vpop.f32.mrb[14].mxu1  ;;  %6378 = vmatpush3.bf16.msra.mxu1 %v6874_v38  ;;  %v5908_v23 = vpop.f32.mrb[60].mxu0 }
 0x299   : > { %v5812_v25 = vpop.f32.mrb[15].mxu1  ;;  %6379 = vmatprep.subr.bf16.mxu1 %v6875_v51  ;;  %v5909_v31 = vpop.f32.mrb[61].mxu0  ;;  %6434 = vmatmul.mubr.msk.bf16.gmra.mrb[132].mxu0 %vm9536_vm0, %v6886_v35 }
 0x29a   : > { %v8672_v45 = vadd.f32 %v5812_v25, %v5811_v60  ;;  %v5910_v5 = vadd.f32 %v5909_v31, %v5908_v23  ;;  %v5911_v19 = vpop.f32.mrb[62].mxu0  ;;  %v6901_v25 = vld [vmem:[#allocation2 + $0xc8] sm:$0xff]  ;;  %6437 = vmatprep.mubr.msk.bf16.mxu0 %vm9537_vm7, %v6887_v12  ;;  %v3744_v12 = vld [vmem:[#allocation2 + $0xf8] sm:$0xff] }
 0x29b   : > { %4017 = vmatmul.mubr.bf16.gmra.mrb[88].mxu1 %v6900_v4  ;;  %v5912_v9 = vpop.f32.mrb[63].mxu0  ;;  %v6888_v4 = vld [vmem:[%s6966_s27 + $0x60] sm:$0xff]  }
 0x29c   : > { %4024 = vmatprep.mubr.bf16.mxu1 %v3732_v20  ;;  %6380 = vmatpush3.bf16.msra.mxu1 %v6875_v51  ;;  %v8684_v54 = vadd.f32 %v5910_v5, %v8603_v59  ;;  %v5913_v57 = vadd.f32 %v5912_v9, %v5911_v19 }
 0x29d   : > { %6381 = vmatprep.subr.bf16.mxu1 %v6876_v13 }
 0x29e   : > { %v5814_v14 = vpop.f32.mrb[16].mxu1  ;;  %v8689_v7 = vadd.f32 %v5913_v57, %v8605_v21 }
 0x29f   : > { %v5815_v32 = vpop.f32.mrb[17].mxu1 }
 0x2a0   : > { %v8681_v43 = vadd.f32 %v5815_v32, %v5814_v14  ;;  %v5817_v18 = vpop.f32.mrb[18].mxu1  ;;  %6382 = vmatpush3.bf16.msra.mxu1 %v6876_v13 }
 0x2a1   : > { %v5818_v62 = vpop.f32.mrb[19].mxu1  ;;  %6438 = vmatmul.mubr.msk.bf16.gmra.mrb[136].mxu0 %vm9538_vm13, %v6888_v4 }
 0x2a2   : > { %v8686_v24 = vadd.f32 %v5818_v62, %v5817_v18  ;;  %v5914_v38 = vpop.f32.mrb[64].mxu0  ;;  %v3737_v18 = vld [vmem:[#allocation2 + $0xc0] sm:$0xff] }
 0x2a3   : > { %4025 = vmatmul.mubr.bf16.gmra.mrb[92].mxu1 %v3731_v50  ;;  %v5915_v53 = vpop.f32.mrb[65].mxu0  ;;  %v3741_v62 = vld [vmem:[#allocation2 + $0xe0] sm:$0xff]  ;;  %v6889_v50 = vld [vmem:[%s6966_s27 + $0x68] sm:$0xff]  }
 0x2a4   : > { %4032 = vmatprep.mubr.bf16.mxu1 %v3735_v33  ;;  %v5916_v52 = vadd.f32 %v5915_v53, %v5914_v38  ;;  %v5917_v27 = vpop.f32.mrb[66].mxu0  ;;  %6441 = vmatprep.mubr.msk.bf16.mxu0 %vm9539_vm2, %v6889_v50 }
 0x2a5   : > { %v5918_v22 = vpop.f32.mrb[67].mxu0 }
 0x2a6   : > { %v5820_v59 = vpop.f32.mrb[20].mxu1  ;;  %v8698_v30 = vadd.f32 %v5916_v52, %v8610_v56  ;;  %v5919_v37 = vadd.f32 %v5918_v22, %v5917_v27 }
 0x2a7   : > { %v5821_v26 = vpop.f32.mrb[21].mxu1 }
 0x2a8   : > { %v8695_v21 = vadd.f32 %v5821_v26, %v5820_v59  ;;  %v5823_v51 = vpop.f32.mrb[22].mxu1  ;;  %v8703_v60 = vadd.f32 %v5919_v37, %v8614_v46 }
 0x2a9   : > { %v5824_v1 = vpop.f32.mrb[23].mxu1  ;;  %6442 = vmatmul.mubr.msk.bf16.gmra.mrb[140].mxu0 %vm9540_vm10, %v6890_v49 }
 0x2aa   : > { %v8700_v10 = vadd.f32 %v5824_v1, %v5823_v51  ;;  %v5920_v13 = vpop.f32.mrb[68].mxu0  ;;  %v3740_v1 = vld [vmem:[#allocation2 + $0xd8] sm:$0xff] }
 0x2ab   : > { %4033 = vmatmul.mubr.bf16.gmra.mrb[96].mxu1 %v3734_v29  ;;  %v5921_v20 = vpop.f32.mrb[69].mxu0 }
 0x2ac   : > { %4040 = vmatprep.mubr.bf16.mxu1 %v6901_v25  ;;  %v5922_v56 = vadd.f32 %v5921_v20, %v5920_v13  ;;  %v5923_v23 = vpop.f32.mrb[70].mxu0  ;;  %v6891_v25 = vld [vmem:[%s6966_s27 + $0x78] sm:$0xff]   ;;  %v6892_v13 = vld [vmem:[%s6966_s27 + $0x80] sm:$0xff]  }
 0x2ad   : > { %v5924_v31 = vpop.f32.mrb[71].mxu0  ;;  %6445 = vmatprep.mubr.msk.bf16.mxu0 %vm9541_vm4, %v6891_v25 }
 0x2ae   : > { %v5826_v42 = vpop.f32.mrb[24].mxu1  ;;  %v8712_v5 = vadd.f32 %v5922_v56, %v8625_v6  ;;  %v5925_v19 = vadd.f32 %v5924_v31, %v5923_v23 }
 0x2af   : > { %v5827_v63 = vpop.f32.mrb[25].mxu1 }
 0x2b0   : > { %v8709_v46 = vadd.f32 %v5827_v63, %v5826_v42  ;;  %v5829_v14 = vpop.f32.mrb[26].mxu1  ;;  %v8717_v57 = vadd.f32 %v5925_v19, %v8630_v11 }
 0x2b1   : > { %v5830_v32 = vpop.f32.mrb[27].mxu1  ;;  %6446 = vmatmul.mubr.msk.bf16.gmra.mrb[144].mxu0 %vm9542_vm1, %v6892_v13  ;;  %v3750_v13 = vld [vmem:[#allocation2 + $0x128] sm:$0xff] }
 0x2b2   : > { %v8714_v9 = vadd.f32 %v5830_v32, %v5829_v14  ;;  %v5926_v33 = vpop.f32.mrb[72].mxu0 }
 0x2b3   : > { %4041 = vmatmul.mubr.bf16.gmra.mrb[100].mxu1 %v3737_v18  ;;  %v5927_v38 = vpop.f32.mrb[73].mxu0 }
 0x2b4   : > { %4048 = vmatprep.mubr.bf16.mxu1 %v3741_v62  ;;  %v5928_v6 = vadd.f32 %v5927_v38, %v5926_v33  ;;  %v5929_v53 = vpop.f32.mrb[74].mxu0  ;;  %v3743_v62 = vld [vmem:[#allocation2 + $0xf0] sm:$0xff] }
 0x2b5   : > { %v5930_v52 = vpop.f32.mrb[75].mxu0  ;;  %v3747_v33 = vld [vmem:[#allocation2 + $0x110] sm:$0xff] }
 0x2b6   : > { %v5832_v35 = vpop.f32.mrb[28].mxu1  ;;  %v8726_v26 = vadd.f32 %v5928_v6, %v8608_v15  ;;  %v5931_v22 = vadd.f32 %v5930_v52, %v5929_v53 }
 0x2b7   : > { %v5833_v59 = vpop.f32.mrb[29].mxu1 }
 0x2b8   : > { %v8723_v11 = vadd.f32 %v5833_v59, %v5832_v35  ;;  %v5835_v27 = vpop.f32.mrb[30].mxu1  ;;  %v8731_v29 = vadd.f32 %v5931_v22, %v8612_v55 }
 0x2b9   : > { %v5836_v51 = vpop.f32.mrb[31].mxu1 }
 0x2ba   : > { %v8728_v37 = vadd.f32 %v5836_v51, %v5835_v27  ;;  %v5932_v4 = vpop.f32.mrb[76].mxu0 }
 0x2bb   : > { %4049 = vmatmul.mubr.bf16.gmra.mrb[104].mxu1 %v3740_v1  ;;  %v5933_v20 = vpop.f32.mrb[77].mxu0 }
 0x2bc   : > { %4056 = vmatprep.mubr.bf16.mxu1 %v3744_v12  ;;  %v5934_v15 = vadd.f32 %v5933_v20, %v5932_v4  ;;  %v5935_v56 = vpop.f32.mrb[78].mxu0  ;;  %v3746_v12 = vld [vmem:[#allocation2 + $0x108] sm:$0xff] }
 0x2bd   : > { %v5936_v63 = vpop.f32.mrb[79].mxu0 }
 0x2be   : > { %v5838_v42 = vpop.f32.mrb[32].mxu1  ;;  %v8740_v14 = vadd.f32 %v5934_v15, %v8628_v61  ;;  %v5937_v19 = vadd.f32 %v5936_v63, %v5935_v56 }
 0x2bf   : > { %v5839_v23 = vpop.f32.mrb[33].mxu1 }
 0x2c0   : > { %v8737_v31 = vadd.f32 %v5839_v23, %v5838_v42  ;;  %v5841_v55 = vpop.f32.mrb[34].mxu1  ;;  %v8745_v50 = vadd.f32 %v5937_v19, %v8635_v8 }
 0x2c1   : > { %v5842_v32 = vpop.f32.mrb[35].mxu1 }
 0x2c2   : > { %v8742_v18 = vadd.f32 %v5842_v32, %v5841_v55  ;;  %v5938_v49 = vpop.f32.mrb[80].mxu0 }
 0x2c3   : > { %4057 = vmatmul.mubr.bf16.gmra.mrb[108].mxu1 %v3743_v62  ;;  %v5939_v38 = vpop.f32.mrb[81].mxu0 }
 0x2c4   : > { %4064 = vmatprep.mubr.bf16.mxu1 %v3747_v33  ;;  %v5940_v6 = vadd.f32 %v5939_v38, %v5938_v49  ;;  %v5941_v53 = vpop.f32.mrb[82].mxu0  ;;  %v3749_v33 = vld [vmem:[#allocation2 + $0x120] sm:$0xff] }
 0x2c5   : > { %v5942_v52 = vpop.f32.mrb[83].mxu0  ;;  %v3753_v38 = vld [vmem:[#allocation2 + $0x140] sm:$0xff] }
 0x2c6   : > { %v5844_v35 = vpop.f32.mrb[36].mxu1  ;;  %v8750_v22 = vadd.f32 %v5940_v6, %v8644_v39  ;;  %v5943_v51 = vadd.f32 %v5942_v52, %v5941_v53 }
 0x2c7   : > { %v5845_v59 = vpop.f32.mrb[37].mxu1 }
 0x2c8   : > { %v8747_v61 = vadd.f32 %v5845_v59, %v5844_v35  ;;  %v5847_v27 = vpop.f32.mrb[38].mxu1  ;;  %v8755_v25 = vadd.f32 %v5943_v51, %v8652_v47  ;;  %v3752_v51 = vld [vmem:[#allocation2 + $0x138] sm:$0xff] }
 0x2c9   : > { %v5848_v1 = vpop.f32.mrb[39].mxu1 }
 0x2ca   : > { %v8752_v8 = vadd.f32 %v5848_v1, %v5847_v27  ;;  %v5944_v4 = vpop.f32.mrb[84].mxu0 }
 0x2cb   : > { %4065 = vmatmul.mubr.bf16.gmra.mrb[112].mxu1 %v3746_v12  ;;  %v5945_v20 = vpop.f32.mrb[85].mxu0  ;;  %v3756_v12 = vld [vmem:[#allocation2 + $0x158] sm:$0xff] }
 0x2cc   : > { %4072 = vmatprep.mubr.bf16.mxu1 %v3750_v13  ;;  %v5946_v15 = vadd.f32 %v5945_v20, %v5944_v4  ;;  %v5947_v56 = vpop.f32.mrb[86].mxu0 }
 0x2cd   : > { %v5948_v63 = vpop.f32.mrb[87].mxu0 }
 0x2ce   : > { %v5850_v42 = vpop.f32.mrb[40].mxu1  ;;  %v8760_v19 = vadd.f32 %v5946_v15, %v8664_v44  ;;  %v5949_v32 = vadd.f32 %v5948_v63, %v5947_v56  ;;  %v3759_v63 = vld [vmem:[#allocation2 + $0x170] sm:$0xff] }
 0x2cf   : > { %v5851_v23 = vpop.f32.mrb[41].mxu1 }
 0x2d0   : > { %v8757_v39 = vadd.f32 %v5851_v23, %v5850_v42  ;;  %v5853_v55 = vpop.f32.mrb[42].mxu1  ;;  %v8765_v49 = vadd.f32 %v5949_v32, %v8672_v45  ;;  %v3755_v23 = vld [vmem:[#allocation2 + $0x150] sm:$0xff] }
 0x2d1   : > { %v5854_v62 = vpop.f32.mrb[43].mxu1 }
 0x2d2   : > { %v8762_v47 = vadd.f32 %v5854_v62, %v5853_v55  ;;  %v5950_v35 = vpop.f32.mrb[88].mxu0 }
 0x2d3   : > { %4073 = vmatmul.mubr.bf16.gmra.mrb[116].mxu1 %v3749_v33  ;;  %v5951_v6 = vpop.f32.mrb[89].mxu0 }
 0x2d4   : > { %4080 = vmatprep.mubr.bf16.mxu1 %v3753_v38  ;;  %v5952_v53 = vadd.f32 %v5951_v6, %v5950_v35  ;;  %v5953_v59 = vpop.f32.mrb[90].mxu0  ;;  %v3758_v6 = vld [vmem:[#allocation2 + $0x168] sm:$0xff] }
 0x2d5   : > { %v5954_v52 = vpop.f32.mrb[91].mxu0 }
 0x2d6   : > { %v8768_v27 = vadd.f32 %v5952_v53, %v8681_v43  ;;  %v5955_v44 = vadd.f32 %v5954_v52, %v5953_v59  ;;  %v3762_v53 = vld [vmem:[#allocation2 + $0x188] sm:$0xff] }
 0x2d8   : > { %v8771_v1 = vadd.f32 %v5955_v44, %v8686_v24 }
 0x2da   : > { %v5956_v45 = vpop.f32.mrb[92].mxu0 }
 0x2db   : > { %4081 = vmatmul.mubr.bf16.gmra.mrb[120].mxu1 %v3752_v51  ;;  %v5957_v13 = vpop.f32.mrb[93].mxu0 }
 0x2dc   : > { %4088 = vmatprep.mubr.bf16.mxu1 %v3756_v12  ;;  %v5958_v4 = vadd.f32 %v5957_v13, %v5956_v45  ;;  %v5959_v20 = vpop.f32.mrb[94].mxu0  ;;  %v3761_v13 = vld [vmem:[#allocation2 + $0x180] sm:$0xff] }
 0x2dd   : > { %v5960_v42 = vpop.f32.mrb[95].mxu0 }
 0x2de   : > { %v8774_v15 = vadd.f32 %v5958_v4, %v8695_v21  ;;  %v5961_v56 = vadd.f32 %v5960_v42, %v5959_v20  ;;  %v6902_v4 = vld [vmem:[#allocation2] sm:$0xff] }
 0x2e0   : > { %v8777_v43 = vadd.f32 %v5961_v56, %v8700_v10 }
 0x2e2   : > { %v5962_v24 = vpop.f32.mrb[96].mxu0 }
 0x2e3   : > { %4089 = vmatmul.mubr.bf16.gmra.mrb[124].mxu1 %v3755_v23  ;;  %v5963_v55 = vpop.f32.mrb[97].mxu0 }
 0x2e4   : > { %4096 = vmatprep.mubr.bf16.mxu1 %v3759_v63  ;;  %v5964_v32 = vadd.f32 %v5963_v55, %v5962_v24  ;;  %v5965_v62 = vpop.f32.mrb[98].mxu0  ;;  %v3764_v55 = vld [vmem:[#allocation2 + $0x198] sm:$0xff] }
 0x2e5   : > { %v5966_v33 = vpop.f32.mrb[99].mxu0 }
 0x2e6   : > { %v8780_v38 = vadd.f32 %v5964_v32, %v8709_v46  ;;  %v5967_v35 = vadd.f32 %v5966_v33, %v5965_v62 }
 0x2e8   : > { %v8783_v21 = vadd.f32 %v5967_v35, %v8714_v9 }
 0x2ea   : > { %v5968_v10 = vpop.f32.mrb[100].mxu0 }
 0x2eb   : > { %4097 = vmatmul.mubr.bf16.gmra.mrb[128].mxu1 %v3758_v6  ;;  %v5969_v59 = vpop.f32.mrb[101].mxu0 }
 0x2ec   : > { %4104 = vmatprep.mubr.bf16.mxu1 %v3762_v53  ;;  %v5970_v52 = vadd.f32 %v5969_v59, %v5968_v10  ;;  %v5971_v44 = vpop.f32.mrb[102].mxu0 }
 0x2ed   : > { %v5972_v51 = vpop.f32.mrb[103].mxu0 }
 0x2ee   : > { %v8786_v12 = vadd.f32 %v5970_v52, %v8723_v11  ;;  %v5973_v45 = vadd.f32 %v5972_v51, %v5971_v44 }
 0x2f0   : > { %v8789_v46 = vadd.f32 %v5973_v45, %v8728_v37  ;;  %v3760_v45 = vld [vmem:[#allocation2 + $0x178] sm:$0xff] }
 0x2f2   : > { %v5974_v9 = vpop.f32.mrb[104].mxu0 }
 0x2f3   : > { %4105 = vmatmul.mubr.bf16.gmra.mrb[132].mxu1 %v3761_v13  ;;  %v5975_v20 = vpop.f32.mrb[105].mxu0 }
 0x2f4   : > { %4112 = vmatprep.mubr.bf16.mxu1 %v6902_v4  ;;  %v5976_v42 = vadd.f32 %v5975_v20, %v5974_v9  ;;  %v5977_v56 = vpop.f32.mrb[106].mxu0 }
 0x2f5   : > { %v5978_v23 = vpop.f32.mrb[107].mxu0 }
 0x2f6   : > { %v8792_v63 = vadd.f32 %v5976_v42, %v8737_v31  ;;  %v5979_v24 = vadd.f32 %v5978_v23, %v5977_v56 }
 0x2f8   : > { %v8795_v11 = vadd.f32 %v5979_v24, %v8742_v18 }
 0x2fa   : > { %v5980_v37 = vpop.f32.mrb[108].mxu0 }
 0x2fb   : > { %4113 = vmatmul.mubr.bf16.gmra.mrb[136].mxu1 %v3764_v55  ;;  %v5981_v32 = vpop.f32.mrb[109].mxu0 }
 0x2fc   : > { %6383 = vmatprep.mubr.bf16.mxu1 %v8463_v58  ;;  %v5982_v62 = vadd.f32 %v5981_v32, %v5980_v37  ;;  %v5983_v33 = vpop.f32.mrb[110].mxu0 }
 0x2fd   : > { %v5984_v35 = vpop.f32.mrb[111].mxu0 }
 0x2fe   : > { %v8799_v6 = vadd.f32 %v5982_v62, %v8747_v61  ;;  %v5985_v53 = vadd.f32 %v5984_v35, %v5983_v33 }
 0x300   : > { %v8802_v31 = vadd.f32 %v5985_v53, %v8752_v8  ;;  %v3751_v8 = vld [vmem:[#allocation2 + $0x130] sm:$0xff] }
 0x302   : > { %v5986_v18 = vpop.f32.mrb[112].mxu0 }
 0x303   : > { %6384 = vmatmul.mubr.bf16.vlgmr.msra.gmra.mrb[44].mxu1 %v8467_v48  ;;  %v5987_v10 = vpop.f32.mrb[113].mxu0  ;;  %v3745_v48 = vld [vmem:[#allocation2 + $0x100] sm:$0xff] }
 0x304   : > { %6387 = vmatprep.mubr.bf16.mxu1 %v8483_v0  ;;  %v5988_v59 = vadd.f32 %v5987_v10, %v5986_v18  ;;  %v5989_v58 = vpop.f32.mrb[114].mxu0  ;;  %v3748_v0 = vld [vmem:[#allocation2 + $0x118] sm:$0xff] }
 0x305   : > { %v5990_v52 = vpop.f32.mrb[115].mxu0 }
 0x306   : > { %v8807_v44 = vadd.f32 %v5988_v59, %v8757_v39  ;;  %v5991_v51 = vadd.f32 %v5990_v52, %v5989_v58  ;;  %v3754_v39 = vld [vmem:[#allocation2 + $0x148] sm:$0xff] }
 0x308   : > { %v8810_v61 = vadd.f32 %v5991_v51, %v8762_v47  ;;  %v3757_v47 = vld [vmem:[#allocation2 + $0x160] sm:$0xff] }
 0x30a   : > { %v8820_v42 = vpop.f32.mrb[116].mxu0 }
 0x30b   : > { %6388 = vmatmul.mubr.bf16.gmra.mrb[48].mxu1 %v8487_v34  ;;  %v3763_v34 = vld [vmem:[#allocation2 + $0x190] sm:$0xff]  ;;  %v8831_v59 = vpop.f32.mrb[117].mxu0 }
 0x30c   : > { %6391 = vmatprep.mubr.bf16.mxu1 %v8497_v2  ;;  %v8833_v58 = vpop.f32.mrb[118].mxu0 }
 0x313   : > { %6392 = vmatmul.mubr.bf16.gmra.mrb[52].mxu1 %v8501_v28 }
 0x314   : > { %6395 = vmatprep.mubr.bf16.mxu1 %v8511_v41 }
 0x31b   : > { %6396 = vmatmul.mubr.bf16.gmra.mrb[56].mxu1 %v8515_v16 }
 0x31c   : > { %6399 = vmatprep.mubr.bf16.mxu1 %v3745_v48 }
 0x323   : > { %6400 = vmatmul.mubr.bf16.gmra.mrb[60].mxu1 %v3748_v0 }
 0x324   : > { %6403 = vmatprep.mubr.bf16.mxu1 %v3751_v8 }
 0x32b   : > { %6404 = vmatmul.mubr.bf16.gmra.mrb[64].mxu1 %v3754_v39 }
 0x32c   : > { %6407 = vmatprep.mubr.bf16.mxu1 %v3757_v47 }
 0x333   : > { %6408 = vmatmul.mubr.bf16.gmra.mrb[68].mxu1 %v3760_v45 }
 0x334   : > { %6411 = vmatprep.mubr.bf16.mxu1 %v3763_v34 }
 0x33b   : > { %6412 = vmatmul.mubr.bf16.gmra.mrb[72].mxu1 %v6902_v4 }
 0x356   : > { %v6032_v2 = vpop.f32.mrb[76].mxu1 }
 0x357   : > { %v6033_v28 = vpop.f32.mrb[77].mxu1 }
 0x358   : > { %v6034_v41 = vadd.f32 %v6033_v28, %v6032_v2  ;;  %v6035_v13 = vpop.f32.mrb[78].mxu1 }
 0x359   : > { %v6036_v16 = vpop.f32.mrb[79].mxu1 }
 0x35a   : > { %v6037_v9 = vadd.f32 %v6036_v16, %v6035_v13  ;;  %v8818_v20 = vadd.f32 %v8647_v36, %v6034_v41 }
 0x35c   : > { %v8823_v56 = vadd.f32 %v8655_v3, %v6037_v9 }
 0x35e   : > { %v6038_v23 = vpop.f32.mrb[80].mxu1 }
 0x35f   : > { %v6039_v24 = vpop.f32.mrb[81].mxu1 }
 0x360   : > { %v6040_v55 = vadd.f32 %v6039_v24, %v6038_v23  ;;  %v6041_v37 = vpop.f32.mrb[82].mxu1 }
 0x361   : > { %v6042_v32 = vpop.f32.mrb[83].mxu1 }
 0x362   : > { %v6043_v4 = vadd.f32 %v6042_v32, %v6041_v37  ;;  %v8826_v62 = vadd.f32 %v8667_v40, %v6040_v55 }
 0x364   : > { %v8829_v33 = vadd.f32 %v8675_v17, %v6043_v4  ;;  %v8841_v17 = vpop.f32.mrb[119].mxu0 }
 0x365   : > { %v8843_v39 = vpop.f32.mrb[120].mxu0 }
 0x366   : > { %v6044_v35 = vpop.f32.mrb[84].mxu1  ;;  %v8845_v45 = vpop.f32.mrb[121].mxu0 }
 0x367   : > { %v6045_v36 = vpop.f32.mrb[85].mxu1 }
 0x368   : > { %v6046_v53 = vadd.f32 %v6045_v36, %v6044_v35  ;;  %v6047_v18 = vpop.f32.mrb[86].mxu1 }
 0x369   : > { %v6048_v10 = vpop.f32.mrb[87].mxu1 }
 0x36a   : > { %v6049_v3 = vadd.f32 %v6048_v10, %v6047_v18  ;;  %v8836_v52 = vadd.f32 %v8684_v54, %v6046_v53  ;;  %v8850_v54 = vpop.f32.mrb[122].mxu0 }
 0x36b   : > { %v8855_v13 = vpop.f32.mrb[123].mxu0 }
 0x36c   : > { %v8839_v51 = vadd.f32 %v8689_v7, %v6049_v3  ;;  %v8857_v23 = vpop.f32.mrb[124].mxu0 }
 0x36d   : > { %v8865_v32 = vpop.f32.mrb[125].mxu0 }
 0x36e   : > { %9543 = vst [vmem:[#allocation4_spill] sm:$0xff] %v8839_v51  ;;  %v6050_v40 = vpop.f32.mrb[88].mxu1  ;;  %v8867_v4 = vpop.f32.mrb[126].mxu0 }
 0x36f   : > { %v6051_v48 = vpop.f32.mrb[89].mxu1  ;;  %v8869_v10 = vpop.f32.mrb[127].mxu0 }
 0x370   : > { %v6052_v0 = vadd.f32 %v6051_v48, %v6050_v40  ;;  %v6053_v8 = vpop.f32.mrb[90].mxu1  ;;  %v8877_v48 = vpop.f32.mrb[128].mxu0 }
 0x371   : > { %v6054_v47 = vpop.f32.mrb[91].mxu1 }
 0x372   : > { %v6055_v34 = vadd.f32 %v6054_v47, %v6053_v8  ;;  %v8848_v2 = vadd.f32 %v8698_v30, %v6052_v0  ;;  %v8879_v8 = vpop.f32.mrb[129].mxu0 }
 0x374   : > { %v8853_v7 = vadd.f32 %v8703_v60, %v6055_v34 }
 0x376   : > { %9544 = vst [vmem:[#allocation5_spill] sm:$0xff] %v8853_v7  ;;  %v6056_v28 = vpop.f32.mrb[92].mxu1 }
 0x377   : > { %v6057_v41 = vpop.f32.mrb[93].mxu1 }
 0x378   : > { %v6058_v16 = vadd.f32 %v6057_v41, %v6056_v28  ;;  %v6059_v9 = vpop.f32.mrb[94].mxu1  ;;  %v8881_v28 = vpop.f32.mrb[130].mxu0 }
 0x379   : > { %v6060_v24 = vpop.f32.mrb[95].mxu1 }
 0x37a   : > { %v6061_v55 = vadd.f32 %v6060_v24, %v6059_v9  ;;  %v8860_v37 = vadd.f32 %v8712_v5, %v6058_v16  ;;  %v8883_v16 = vpop.f32.mrb[131].mxu0 }
 0x37c   : > { %9545 = vst [vmem:[#allocation8_spill] sm:$0xff] %v8860_v37  ;;  %v8863_v30 = vadd.f32 %v8717_v57, %v6061_v55  ;;  %v8891_v55 = vpop.f32.mrb[132].mxu0 }
 0x37e   : > { %9546 = vst [vmem:[#allocation6_spill] sm:$0xff] %v8863_v30  ;;  %v6062_v60 = vpop.f32.mrb[96].mxu1 }
 0x37f   : > { %v6063_v35 = vpop.f32.mrb[97].mxu1 }
 0x380   : > { %v6064_v36 = vadd.f32 %v6063_v35, %v6062_v60  ;;  %v6065_v53 = vpop.f32.mrb[98].mxu1  ;;  %v8893_v35 = vpop.f32.mrb[133].mxu0 }
 0x381   : > { %v6066_v18 = vpop.f32.mrb[99].mxu1 }
 0x382   : > { %v6067_v3 = vadd.f32 %v6066_v18, %v6065_v53  ;;  %v8872_v40 = vadd.f32 %v8726_v26, %v6064_v36  ;;  %v8895_v18 = vpop.f32.mrb[134].mxu0 }
 0x384   : > { %9547 = vst [vmem:[#allocation9_spill] sm:$0xff] %v8872_v40  ;;  %v8875_v5 = vadd.f32 %v8731_v29, %v6067_v3 }
 0x386   : > { %9548 = vst [vmem:[#allocation3_spill] sm:$0xff] %v8875_v5  ;;  %v6068_v57 = vpop.f32.mrb[100].mxu1 }
 0x387   : > { %v6069_v0 = vpop.f32.mrb[101].mxu1 }
 0x388   : > { %v6070_v47 = vadd.f32 %v6069_v0, %v6068_v57  ;;  %v6071_v34 = vpop.f32.mrb[102].mxu1  ;;  %v8897_v57 = vpop.f32.mrb[135].mxu0 }
 0x389   : > { %v6072_v41 = vpop.f32.mrb[103].mxu1 }
 0x38a   : > { %v6073_v9 = vadd.f32 %v6072_v41, %v6071_v34  ;;  %v8886_v26 = vadd.f32 %v8740_v14, %v6070_v47  ;;  %v8905_v34 = vpop.f32.mrb[136].mxu0 }
 0x38c   : > { %9549 = vst [vmem:[#allocation7_spill] sm:$0xff] %v8886_v26  ;;  %v8889_v29 = vadd.f32 %v8745_v50, %v6073_v9  ;;  %v8907_v9 = vpop.f32.mrb[137].mxu0 }
 0x38e   : > { %9550 = vst [vmem:[#allocation10_spill] sm:$0xff] %v8889_v29  ;;  %v6074_v24 = vpop.f32.mrb[104].mxu1  ;;  %v8909_v29 = vpop.f32.mrb[138].mxu0 }
 0x38f   : > { %v6075_v60 = vpop.f32.mrb[105].mxu1  ;;  %v8911_v30 = vpop.f32.mrb[139].mxu0 }
 0x390   : > { %v6076_v36 = vadd.f32 %v6075_v60, %v6074_v24  ;;  %v6077_v53 = vpop.f32.mrb[106].mxu1 }
 0x391   : > { %v6078_v3 = vpop.f32.mrb[107].mxu1 }
 0x392   : > { %v6079_v0 = vadd.f32 %v6078_v3, %v6077_v53  ;;  %v8900_v14 = vadd.f32 %v8750_v22, %v6076_v36  ;;  %v8919_v3 = vpop.f32.mrb[140].mxu0 }
 0x394   : > { %9551 = vst [vmem:[#allocation11_spill] sm:$0xff] %v8900_v14  ;;  %v8903_v50 = vadd.f32 %v8755_v25, %v6079_v0 }
 0x396   : > { %9552 = vst [vmem:[#allocation12_spill] sm:$0xff] %v8903_v50  ;;  %v6080_v47 = vpop.f32.mrb[108].mxu1  ;;  %v8921_v50 = vpop.f32.mrb[141].mxu0 }
 0x397   : > { %v6081_v41 = vpop.f32.mrb[109].mxu1  ;;  %v8923_v14 = vpop.f32.mrb[142].mxu0 }
 0x398   : > { %v6082_v24 = vadd.f32 %v6081_v41, %v6080_v47  ;;  %v6083_v60 = vpop.f32.mrb[110].mxu1  ;;  %v8925_v37 = vpop.f32.mrb[143].mxu0 }
 0x399   : > { %v6084_v26 = vpop.f32.mrb[111].mxu1 }
 0x39a   : > { %v6085_v53 = vadd.f32 %v6084_v26, %v6083_v60  ;;  %v8914_v22 = vadd.f32 %v8760_v19, %v6082_v24  ;;  %v8933_v60 = vpop.f32.mrb[144].mxu0 }
 0x39c   : > { %9553 = vst [vmem:[#allocation13_spill] sm:$0xff] %v8914_v22  ;;  %v8917_v25 = vadd.f32 %v8765_v49, %v6085_v53 }
 0x39e   : > { %9554 = vst [vmem:[#allocation14_spill] sm:$0xff] %v8917_v25  ;;  %v6086_v36 = vpop.f32.mrb[112].mxu1  ;;  %v8935_v25 = vpop.f32.mrb[145].mxu0 }
 0x39f   : > { %v6087_v0 = vpop.f32.mrb[113].mxu1  ;;  %v8937_v22 = vpop.f32.mrb[146].mxu0 }
 0x3a0   : > { %v6088_v47 = vadd.f32 %v6087_v0, %v6086_v36  ;;  %v6089_v41 = vpop.f32.mrb[114].mxu1  ;;  %9557 = vst [vmem:[#allocation17_spill] sm:$0xff] %v8937_v22  ;;  %v8939_v51 = vpop.f32.mrb[147].mxu0 }
 0x3a1   : > { %v6090_v5 = vpop.f32.mrb[115].mxu1  ;;  %9558 = vst [vmem:[#allocation18_spill] sm:$0xff] %v8939_v51 }
 0x3a2   : > { %v6091_v26 = vadd.f32 %v6090_v5, %v6089_v41  ;;  %v8928_v19 = vadd.f32 %v8768_v27, %v6088_v47 }
 0x3a4   : > { %9555 = vst [vmem:[#allocation15_spill] sm:$0xff] %v8928_v19  ;;  %v8931_v49 = vadd.f32 %v8771_v1, %v6091_v26 }
 0x3a6   : > { %9556 = vst [vmem:[#allocation16_spill] sm:$0xff] %v8931_v49  ;;  %v6092_v24 = vpop.f32.mrb[116].mxu1 }
 0x3a7   : > { %v6093_v53 = vpop.f32.mrb[117].mxu1 }
 0x3a8   : > { %v6094_v36 = vadd.f32 %v6093_v53, %v6092_v24  ;;  %v6095_v0 = vpop.f32.mrb[118].mxu1 }
 0x3a9   : > { %v6096_v40 = vpop.f32.mrb[119].mxu1 }
 0x3aa   : > { %v6097_v5 = vadd.f32 %v6096_v40, %v6095_v0  ;;  %v8942_v27 = vadd.f32 %v8774_v15, %v6094_v36 }
 0x3ac   : > { %v8945_v1 = vadd.f32 %v8777_v43, %v6097_v5 }
 0x3ae   : > { %v6098_v47 = vpop.f32.mrb[120].mxu1 }
 0x3af   : > { %v6099_v41 = vpop.f32.mrb[121].mxu1 }
 0x3b0   : > { %v6100_v26 = vadd.f32 %v6099_v41, %v6098_v47  ;;  %v6101_v49 = vpop.f32.mrb[122].mxu1 }
 0x3b1   : > { %v6102_v19 = vpop.f32.mrb[123].mxu1 }
 0x3b2   : > { %v6103_v7 = vadd.f32 %v6102_v19, %v6101_v49  ;;  %v8948_v24 = vadd.f32 %v8780_v38, %v6100_v26 }
 0x3b4   : > { %v8951_v53 = vadd.f32 %v8783_v21, %v6103_v7 }
 0x3b6   : > { %v6104_v51 = vpop.f32.mrb[124].mxu1 }
 0x3b7   : > { %v6105_v40 = vpop.f32.mrb[125].mxu1 }
 0x3b8   : > { %v6106_v0 = vadd.f32 %v6105_v40, %v6104_v51  ;;  %v6107_v15 = vpop.f32.mrb[126].mxu1 }
 0x3b9   : > { %v6108_v36 = vpop.f32.mrb[127].mxu1 }
 0x3ba   : > { %v6109_v22 = vadd.f32 %v6108_v36, %v6107_v15  ;;  %v8954_v43 = vadd.f32 %v8786_v12, %v6106_v0 }
 0x3bc   : > { %v8957_v5 = vadd.f32 %v8789_v46, %v6109_v22 }
 0x3be   : > { %v6110_v47 = vpop.f32.mrb[128].mxu1 }
 0x3bf   : > { %v6111_v19 = vpop.f32.mrb[129].mxu1 }
 0x3c0   : > { %v6112_v49 = vadd.f32 %v6111_v19, %v6110_v47  ;;  %v6113_v38 = vpop.f32.mrb[130].mxu1 }
 0x3c1   : > { %v6114_v41 = vpop.f32.mrb[131].mxu1 }
 0x3c2   : > { %v6115_v26 = vadd.f32 %v6114_v41, %v6113_v38  ;;  %v8960_v21 = vadd.f32 %v8792_v63, %v6112_v49 }
 0x3c4   : > { %v8963_v51 = vadd.f32 %v8795_v11, %v6115_v26  ;;  %v8974_v11 = vld [vmem:[%s9311_s4 + $0x4] ss:$0 sm:$0xff] }
 0x3c5   : > { %9560 = vst [vmem:[#allocation20_spill] sm:$0xff] %v8974_v11 }
 0x3c6   : > { %v6116_v7 = vpop.f32.mrb[132].mxu1 }
 0x3c7   : > { %v6117_v40 = vpop.f32.mrb[133].mxu1 }
 0x3c8   : > { %v6118_v15 = vadd.f32 %v6117_v40, %v6116_v7  ;;  %v6119_v12 = vpop.f32.mrb[134].mxu1  ;;  %v4724_v40 = vmul.f32 %v8833_v58, %v8974_v11  ;;  %v9009_v58 = vmul.f32 %v8974_v11, %v8855_v13  ;;  %v9030_v13 = vmul.f32 %v8877_v48, %v8974_v11 }
 0x3c9   : > { %v6120_v0 = vpop.f32.mrb[135].mxu1  ;;  %v9048_v48 = vmul.f32 %v8974_v11, %v8883_v16  ;;  %v9064_v16 = vmul.f32 %v8895_v18, %v8974_v11 }
 0x3ca   : > { %v6121_v36 = vadd.f32 %v6120_v0, %v6119_v12  ;;  %v8966_v46 = vadd.f32 %v8799_v6, %v6118_v15  ;;  %v4723_v6 = vmul.f32 %v8820_v42, %v8974_v11  ;;  %v4722_v15 = vmul.f32 %v8974_v11, %v8841_v17  ;;  %v9001_v42 = vld [vmem:[%s9311_s4 + $0x2] ss:$0 sm:$0xff] }
 0x3cb   : > { %v8992_v12 = vmul.f32 %v8843_v39, %v8974_v11  ;;  %v9013_v17 = vmul.f32 %v8857_v23, %v8974_v11  ;;  %v9017_v39 = vmul.f32 %v8974_v11, %v8865_v32  ;;  %v9036_v32 = vld [vmem:[%s9311_s4 + $0x3] ss:$0 sm:$0xff] }
 0x3cc   : > { %v8969_v22 = vadd.f32 %v8802_v31, %v6121_v36  ;;  %v4721_v31 = vmul.f32 %v8974_v11, %v8831_v59  ;;  %v9005_v59 = vmul.f32 %v8850_v54, %v8974_v11  ;;  %v9022_v36 = vmul.f32 %v8867_v4, %v8974_v11 }
 0x3cd   : > { %v9026_v54 = vmul.f32 %v8974_v11, %v8869_v10  ;;  %v9040_v4 = vmul.f32 %v8974_v11, %v8879_v8  ;;  %v9044_v10 = vmul.f32 %v8881_v28, %v8974_v11  ;;  %v9058_v8 = vmul.f32 %v8974_v11, %v8893_v35 }
 0x3ce   : > { %9559 = vst [vmem:[#allocation19_spill] sm:$0xff] %v8969_v22  ;;  %v6122_v47 = vpop.f32.mrb[136].mxu1  ;;  %v9074_v35 = vmul.f32 %v8905_v34, %v8974_v11  ;;  %v9093_v34 = vmul.f32 %v8974_v11, %v8911_v30  ;;  %v9111_v30 = vmul.f32 %v8974_v11, %v8925_v37  ;;  %v9123_v37 = vmul.f32 %v8974_v11, %v8935_v25 }
 0x3cf   : > { %v6123_v19 = vpop.f32.mrb[137].mxu1 }
 0x3d0   : > { %v6124_v38 = vadd.f32 %v6123_v19, %v6122_v47  ;;  %v6125_v63 = vpop.f32.mrb[138].mxu1 }
 0x3d1   : > { %v6126_v49 = vpop.f32.mrb[139].mxu1 }
 0x3d2   : > { %v6127_v41 = vadd.f32 %v6126_v49, %v6125_v63  ;;  %v8977_v26 = vadd.f32 %v8807_v44, %v6124_v38  ;;  %v8996_v44 = vmul.f32 %v8974_v11, %v8845_v45  ;;  %v9054_v38 = vmul.f32 %v8891_v55, %v8974_v11 }
 0x3d4   : > { %v8984_v7 = vadd.f32 %v8810_v61, %v6127_v41  ;;  %v9078_v41 = vmul.f32 %v8974_v11, %v8907_v9 }
 0x3d6   : > { %v6385_v61 = vpop.f32.mrb[44].mxu1 }
 0x3d7   : > { %v6467_v45 = vadd.f32 %v8826_v62, %v6385_v61  ;;  %v4155_v0 = vpop.f32.mrb[45].mxu1  ;;  %v9089_v61 = vmul.f32 %v8909_v29, %v8974_v11 }
 0x3d8   : > { %v6470_v23 = vadd.f32 %v8818_v20, %v4155_v0  ;;  %v6386_v62 = vpop.f32.mrb[46].mxu1  ;;  %v9098_v0 = vmul.f32 %v8919_v3, %v8974_v11 }
 0x3d9   : > { %v4651_v20 = vmul.f32 %v6467_v45, %v9001_v42  ;;  %v6473_v47 = vadd.f32 %v8829_v33, %v6386_v62  ;;  %v4158_v19 = vpop.f32.mrb[47].mxu1  ;;  %v9068_v33 = vmul.f32 %v8974_v11, %v8897_v57 }
 0x3da   : > { %v4649_v28 = vmul.f32 %v6470_v23, %v9001_v42  ;;  %v6476_v63 = vadd.f32 %v8823_v56, %v4158_v19  ;;  %v9083_v56 = vld [vmem:[%s9311_s4 + $0x5] ss:$0 sm:$0xff]  ;;  %v9102_v23 = vmul.f32 %v8974_v11, %v8921_v50  ;;  %v9117_v50 = vmul.f32 %v8933_v60, %v8974_v11 }
 0x3db   : > { %v4687_v49 = vadd.f32 %v9036_v32, %v4651_v20  ;;  %v4652_v55 = vmul.f32 %v6473_v47, %v9001_v42  ;;  %v9107_v47 = vmul.f32 %v8923_v14, %v8974_v11 }
 0x3dc   : > { %v4685_v18 = vadd.f32 %v9036_v32, %v4649_v28  ;;  %v4650_v57 = vmul.f32 %v6476_v63, %v9001_v42 }
 0x3dd   : > { %v4755_v45 = vadd.f32 %v4723_v6, %v4687_v49  ;;  %v4688_v9 = vadd.f32 %v9036_v32, %v4652_v55 }
 0x3de   : > { %v4753_v62 = vadd.f32 %v4721_v31, %v4685_v18  ;;  %v4686_v20 = vadd.f32 %v9036_v32, %v4650_v57  ;;  %v6389_v29 = vpop.f32.mrb[48].mxu1  ;;  %v9561_v18 = vld [vmem:[#allocation5_spill] sm:$0xff] }
 0x3df   : > { %v4791_v6 = vadd.f32 %v9083_v56, %v4755_v45  ;;  %v4756_v3 = vadd.f32 %v4724_v40, %v4688_v9  ;;  %v6479_v19 = vadd.f32 %v8848_v2, %v6389_v29  ;;  %v4171_v28 = vpop.f32.mrb[49].mxu1 }
 0x3e0   : > { %v4789_v31 = vadd.f32 %v9083_v56, %v4753_v62  ;;  %v4754_v63 = vadd.f32 %v4722_v15, %v4686_v20  ;;  %v6482_v14 = vadd.f32 %v8836_v52, %v4171_v28  ;;  %v6390_v49 = vpop.f32.mrb[50].mxu1  ;;  %v9562_v62 = vld [vmem:[#allocation4_spill] sm:$0xff] }
 0x3e1   : > { %v4823_v55 = vmax.f32 %v4791_v6, 0.0  ;;  %v4792_v40 = vadd.f32 %v9083_v56, %v4756_v3  ;;  %v4655_v2 = vmul.f32 %v6479_v19, %v9001_v42  ;;  %v6485_v57 = vadd.f32 %v9561_v18, %v6390_v49  ;;  %v4174_v45 = vpop.f32.mrb[51].mxu1 }
 0x3e2   : > { %v4821_v60 = vmax.f32 %v4789_v31, 0.0  ;;  %v4790_v9 = vadd.f32 %v9083_v56, %v4754_v63  ;;  %v4653_v15 = vmul.f32 %v6482_v14, %v9001_v42  ;;  %v6488_v52 = vadd.f32 %v9562_v62, %v4174_v45 }
 0x3e3   : > { %v4855_v20 = vmin.f32 %v4823_v55, 123.0  ;;  %v4824_v29 = vmax.f32 %v4792_v40, 0.0  ;;  %v4691_v25 = vadd.f32 %v9036_v32, %v4655_v2  ;;  %v4656_v6 = vmul.f32 %v6485_v57, %v9001_v42 }
 0x3e4   : > { %v4853_v28 = vmin.f32 %v4821_v60, 123.0  ;;  %v4822_v3 = vmax.f32 %v4790_v9, 0.0  ;;  %v4689_v19 = vadd.f32 %v9036_v32, %v4653_v15  ;;  %v4654_v49 = vmul.f32 %v6488_v52, %v9001_v42 }
 0x3e5   : > { %v4887_v18 = vmul.f32 2.0731707, %v4855_v20  ;;  %v4856_v31 = vmin.f32 %v4824_v29, 123.0  ;;  %v4759_v63 = vadd.f32 %v8992_v12, %v4691_v25  ;;  %v4692_v14 = vadd.f32 %v9036_v32, %v4656_v6 }
 0x3e6   : > { %v4885_v11 = vmul.f32 2.0731707, %v4853_v28  ;;  %v4854_v55 = vmin.f32 %v4822_v3, 123.0  ;;  %v4757_v40 = vadd.f32 %v8996_v44, %v4689_v19  ;;  %v4690_v2 = vadd.f32 %v9036_v32, %v4654_v49  ;;  %v6393_v57 = vpop.f32.mrb[52].mxu1 }
 0x3e7   : > { %v6728_v45 = vround.rtne.f32 %v4887_v18  ;;  %v4888_v60 = vmul.f32 2.0731707, %v4856_v31  ;;  %v4795_v9 = vadd.f32 %v9083_v56, %v4759_v63  ;;  %v4760_v15 = vadd.f32 %v9005_v59, %v4692_v14  ;;  %v4187_v62 = vpop.f32.mrb[53].mxu1 }
 0x3e8   : > { %v6726_v52 = vround.rtne.f32 %v4885_v11  ;;  %v4886_v20 = vmul.f32 2.0731707, %v4854_v55  ;;  %v4793_v12 = vadd.f32 %v9083_v56, %v4757_v40  ;;  %v4758_v29 = vadd.f32 %v9009_v58, %v4690_v2  ;;  %v6394_v25 = vpop.f32.mrb[54].mxu1  ;;  %v9563_v55 = vld [vmem:[#allocation9_spill] sm:$0xff] }
 0x3e9   : > { %v4951_v6 = vmul.f32 0.48235294, %v6728_v45  ;;  %v6729_v44 = vround.rtne.f32 %v4888_v60  ;;  %v4827_v28 = vmax.f32 %v4795_v9, 0.0  ;;  %v4796_v3 = vadd.f32 %v9083_v56, %v4760_v15  ;;  %v4190_v19 = vpop.f32.mrb[55].mxu1  ;;  %v9564_v60 = vld [vmem:[#allocation8_spill] sm:$0xff] }
 0x3ea   : > { %v4949_v49 = vmul.f32 0.48235294, %v6726_v52  ;;  %v6727_v18 = vround.rtne.f32 %v4886_v20  ;;  %v4825_v31 = vmax.f32 %v4793_v12, 0.0  ;;  %v4794_v59 = vadd.f32 %v9083_v56, %v4758_v29 }
 0x3eb   : > { %v4952_v63 = vmul.f32 0.48235294, %v6729_v44  ;;  %v4859_v11 = vmin.f32 %v4827_v28, 123.0  ;;  %v4828_v14 = vmax.f32 %v4796_v3, 0.0  ;;  %v6491_v40 = vadd.f32 %v9563_v55, %v6393_v57 }
 0x3ec   : > { %v4950_v58 = vmul.f32 0.48235294, %v6727_v18  ;;  %v4857_v2 = vmin.f32 %v4825_v31, 123.0  ;;  %v4826_v45 = vmax.f32 %v4794_v59, 0.0  ;;  %v6494_v9 = vadd.f32 %v9564_v60, %v4187_v62  ;;  %v9565_v31 = vld [vmem:[#allocation3_spill] sm:$0xff] }
 0x3ed   : > { %v5606_v15 = vpack.c.bf16 %v4952_v63, %v4951_v6  ;;  %v4891_v52 = vmul.f32 2.0731707, %v4859_v11  ;;  %v4860_v20 = vmin.f32 %v4828_v14, 123.0  ;;  %v4659_v12 = vmul.f32 %v6491_v40, %v9001_v42  ;;  %v9566_v14 = vld [vmem:[#allocation6_spill] sm:$0xff] }
 0x3ee   : > { %v5601_v29 = vpack.c.bf16 %v4950_v58, %v4949_v49  ;;  %v4889_v44 = vmul.f32 2.0731707, %v4857_v2  ;;  %v4858_v57 = vmin.f32 %v4826_v45, 123.0  ;;  %v4657_v28 = vmul.f32 %v6494_v9, %v9001_v42  ;;  %v6397_v3 = vpop.f32.mrb[56].mxu1 }
 0x3ef   : > { %5678 = vst [vmem:[%s9150_s15 + $0x8] sm:$0xff] %v5606_v15   ;;  %v6732_v55 = vround.rtne.f32 %v4891_v52  ;;  %v4892_v22 = vmul.f32 2.0731707, %v4860_v20  ;;  %v4695_v18 = vadd.f32 %v9036_v32, %v4659_v12  ;;  %v6497_v59 = vadd.f32 %v9565_v31, %v6394_v25  ;;  %v4203_v62 = vpop.f32.mrb[57].mxu1 }
 0x3f0   : > { %5602 = vst [vmem:[%s9150_s15] sm:$0xff] %v5601_v29   ;;  %v6730_v6 = vround.rtne.f32 %v4889_v44  ;;  %v4890_v63 = vmul.f32 2.0731707, %v4858_v57  ;;  %v4693_v11 = vadd.f32 %v9036_v32, %v4657_v28  ;;  %v6500_v49 = vadd.f32 %v9566_v14, %v4190_v19  ;;  %v6398_v40 = vpop.f32.mrb[58].mxu1  ;;  %v9567_v44 = vld [vmem:[#allocation11_spill] sm:$0xff] }
 0x3f1   : > { %v4955_v58 = vmul.f32 0.48235294, %v6732_v55  ;;  %v6733_v2 = vround.rtne.f32 %v4892_v22  ;;  %v4763_v45 = vadd.f32 %v9013_v17, %v4695_v18  ;;  %v4660_v60 = vmul.f32 %v6497_v59, %v9001_v42  ;;  %v4206_v9 = vpop.f32.mrb[59].mxu1  ;;  %v9568_v55 = vld [vmem:[#allocation7_spill] sm:$0xff] }
 0x3f2   : > { %v4953_v15 = vmul.f32 0.48235294, %v6730_v6  ;;  %v6731_v52 = vround.rtne.f32 %v4890_v63  ;;  %v4761_v25 = vadd.f32 %v9017_v39, %v4693_v11  ;;  %v4658_v20 = vmul.f32 %v6500_v49, %v9001_v42 }
 0x3f3   : > { %v4956_v12 = vmul.f32 0.48235294, %v6733_v2  ;;  %v4799_v29 = vadd.f32 %v9083_v56, %v4763_v45  ;;  %v4696_v19 = vadd.f32 %v9036_v32, %v4660_v60  ;;  %v6503_v57 = vadd.f32 %v9567_v44, %v6397_v3  ;;  %v9569_v60 = vld [vmem:[#allocation12_spill] sm:$0xff] }
 0x3f4   : > { %v4954_v22 = vmul.f32 0.48235294, %v6731_v52  ;;  %v4797_v17 = vadd.f32 %v9083_v56, %v4761_v25  ;;  %v4694_v28 = vadd.f32 %v9036_v32, %v4658_v20  ;;  %v6506_v18 = vadd.f32 %v9568_v55, %v4203_v62  ;;  %v9570_v20 = vld [vmem:[#allocation10_spill] sm:$0xff] }
 0x3f5   : > { %v5616_v31 = vpack.c.bf16 %v4956_v12, %v4955_v58  ;;  %v4831_v39 = vmax.f32 %v4799_v29, 0.0  ;;  %v4764_v59 = vadd.f32 %v9022_v36, %v4696_v19  ;;  %v4663_v6 = vmul.f32 %v6503_v57, %v9001_v42 }
 0x3f6   : > { %v5611_v63 = vpack.c.bf16 %v4954_v22, %v4953_v15  ;;  %v4829_v11 = vmax.f32 %v4797_v17, 0.0  ;;  %v4762_v14 = vadd.f32 %v9026_v54, %v4694_v28  ;;  %v4661_v3 = vmul.f32 %v6506_v18, %v9001_v42  ;;  %v6401_v49 = vpop.f32.mrb[60].mxu1 }
 0x3f7   : > { %5680 = vst [vmem:[%s9150_s15 + $0x18] sm:$0xff] %v5616_v31   ;;  %v4863_v2 = vmin.f32 %v4831_v39, 123.0  ;;  %v4800_v45 = vadd.f32 %v9083_v56, %v4764_v59  ;;  %v4699_v62 = vadd.f32 %v9036_v32, %v4663_v6  ;;  %v6509_v58 = vadd.f32 %v9569_v60, %v6398_v40  ;;  %v4219_v52 = vpop.f32.mrb[61].mxu1 }
 0x3f8   : > { %5679 = vst [vmem:[%s9150_s15 + $0x10] sm:$0xff] %v5611_v63   ;;  %v4861_v36 = vmin.f32 %v4829_v11, 123.0  ;;  %v4798_v25 = vadd.f32 %v9083_v56, %v4762_v14  ;;  %v4697_v15 = vadd.f32 %v9036_v32, %v4661_v3  ;;  %v6512_v54 = vadd.f32 %v9570_v20, %v4206_v9  ;;  %v6402_v12 = vpop.f32.mrb[62].mxu1  ;;  %v9571_v20 = vld [vmem:[#allocation15_spill] sm:$0xff] }
 0x3f9   : > { %v4895_v29 = vmul.f32 2.0731707, %v4863_v2  ;;  %v4832_v19 = vmax.f32 %v4800_v45, 0.0  ;;  %v4767_v44 = vadd.f32 %v9030_v13, %v4699_v62  ;;  %v4664_v57 = vmul.f32 %v6509_v58, %v9001_v42  ;;  %v4222_v22 = vpop.f32.mrb[63].mxu1 }
 0x3fa   : > { %v4893_v17 = vmul.f32 2.0731707, %v4861_v36  ;;  %v4830_v28 = vmax.f32 %v4798_v25, 0.0  ;;  %v4765_v40 = vadd.f32 %v9040_v4, %v4697_v15  ;;  %v4662_v55 = vmul.f32 %v6512_v54, %v9001_v42 }
 0x3fb   : > { %v6736_v18 = vround.rtne.f32 %v4895_v29  ;;  %v4864_v31 = vmin.f32 %v4832_v19, 123.0  ;;  %v4803_v39 = vadd.f32 %v9083_v56, %v4767_v44  ;;  %v4700_v9 = vadd.f32 %v9036_v32, %v4664_v57 }
 0x3fc   : > { %v6734_v59 = vround.rtne.f32 %v4893_v17  ;;  %v4862_v6 = vmin.f32 %v4830_v28, 123.0  ;;  %v4801_v63 = vadd.f32 %v9083_v56, %v4765_v40  ;;  %v4698_v13 = vadd.f32 %v9036_v32, %v4662_v55  ;;  %v9572_v17 = vld [vmem:[#allocation13_spill] sm:$0xff] }
 0x3fd   : > { %v4959_v11 = vmul.f32 0.48235294, %v6736_v18  ;;  %v4896_v14 = vmul.f32 2.0731707, %v4864_v31  ;;  %v4835_v3 = vmax.f32 %v4803_v39, 0.0  ;;  %v4768_v2 = vadd.f32 %v9044_v10, %v4700_v9 }
 0x3fe   : > { %v4957_v4 = vmul.f32 0.48235294, %v6734_v59  ;;  %v4894_v45 = vmul.f32 2.0731707, %v4862_v6  ;;  %v4833_v62 = vmax.f32 %v4801_v63, 0.0  ;;  %v4766_v60 = vadd.f32 %v9048_v48, %v4698_v13  ;;  %v6405_v58 = vpop.f32.mrb[64].mxu1 }
 0x3ff   : > { %v6737_v36 = vround.rtne.f32 %v4896_v14  ;;  %v4867_v25 = vmin.f32 %v4835_v3, 123.0  ;;  %v4804_v15 = vadd.f32 %v9083_v56, %v4768_v2  ;;  %v6515_v54 = vadd.f32 %v9571_v20, %v6401_v49  ;;  %v4235_v29 = vpop.f32.mrb[65].mxu1 }
 0x400   : > { %v6735_v19 = vround.rtne.f32 %v4894_v45  ;;  %v4865_v44 = vmin.f32 %v4833_v62, 123.0  ;;  %v4802_v57 = vadd.f32 %v9083_v56, %v4766_v60  ;;  %v6518_v28 = vadd.f32 %v9572_v17, %v4219_v52  ;;  %v6406_v10 = vpop.f32.mrb[66].mxu1  ;;  %v9573_v45 = vld [vmem:[#allocation16_spill] sm:$0xff] }
 0x401   : > { %v4960_v40 = vmul.f32 0.48235294, %v6737_v36  ;;  %v4899_v55 = vmul.f32 2.0731707, %v4867_v25  ;;  %v4836_v18 = vmax.f32 %v4804_v15, 0.0  ;;  %v4667_v48 = vmul.f32 %v6515_v54, %v9001_v42  ;;  %v4238_v31 = vpop.f32.mrb[67].mxu1 }
 0x402   : > { %v4958_v39 = vmul.f32 0.48235294, %v6735_v19  ;;  %v4897_v9 = vmul.f32 2.0731707, %v4865_v44  ;;  %v4834_v59 = vmax.f32 %v4802_v57, 0.0  ;;  %v4665_v49 = vmul.f32 %v6518_v28, %v9001_v42  ;;  %v9574_v19 = vld [vmem:[#allocation14_spill] sm:$0xff] }
 0x403   : > { %v5626_v6 = vpack.c.bf16 %v4960_v40, %v4959_v11  ;;  %v6740_v63 = vround.rtne.f32 %v4899_v55  ;;  %v4868_v13 = vmin.f32 %v4836_v18, 123.0  ;;  %v4703_v14 = vadd.f32 %v9036_v32, %v4667_v48 }
 0x404   : > { %v5621_v52 = vpack.c.bf16 %v4958_v39, %v4957_v4  ;;  %v6738_v3 = vround.rtne.f32 %v4897_v9  ;;  %v4866_v2 = vmin.f32 %v4834_v59, 123.0  ;;  %v6521_v62 = vadd.f32 %v9573_v45, %v6402_v12 }
 0x405   : > { %5682 = vst [vmem:[%s9150_s15 + $0x28] sm:$0xff] %v5626_v6   ;;  %v4963_v60 = vmul.f32 0.48235294, %v6740_v63  ;;  %v4900_v36 = vmul.f32 2.0731707, %v4868_v13  ;;  %v4771_v25 = vadd.f32 %v9054_v38, %v4703_v14  ;;  %v4701_v15 = vadd.f32 %v9036_v32, %v4665_v49 }
 0x406   : > { %5681 = vst [vmem:[%s9150_s15 + $0x20] sm:$0xff] %v5621_v52   ;;  %v4961_v20 = vmul.f32 0.48235294, %v6738_v3  ;;  %v4898_v54 = vmul.f32 2.0731707, %v4866_v2  ;;  %v4668_v11 = vmul.f32 %v6521_v62, %v9001_v42  ;;  %v6524_v44 = vadd.f32 %v9574_v19, %v4222_v22  ;;  %v6409_v57 = vpop.f32.mrb[68].mxu1 }
 0x407   : > { %v6741_v4 = vround.rtne.f32 %v4900_v36  ;;  %v4807_v17 = vadd.f32 %v9083_v56, %v4771_v25  ;;  %v4769_v12 = vadd.f32 %v9058_v8, %v4701_v15  ;;  %v6527_v28 = vadd.f32 %v8948_v24, %v6405_v58  ;;  %v9210_v40 = vpop.f32.mrb[69].mxu1 }
 0x408   : > { %v6739_v38 = vround.rtne.f32 %v4898_v54  ;;  %v4666_v55 = vmul.f32 %v6524_v44, %v9001_v42  ;;  %v4704_v18 = vadd.f32 %v9036_v32, %v4668_v11  ;;  %v6530_v48 = vadd.f32 %v8942_v27, %v4235_v29  ;;  %v9215_v39 = vpop.f32.mrb[70].mxu1 }
 0x409   : > { %v4964_v22 = vmul.f32 0.48235294, %v6741_v4  ;;  %v4839_v9 = vmax.f32 %v4807_v17, 0.0  ;;  %v4805_v59 = vadd.f32 %v9083_v56, %v4769_v12  ;;  %v4671_v8 = vmul.f32 %v6527_v28, %v9001_v42  ;;  %v9219_v49 = vpop.f32.mrb[71].mxu1 }
 0x40a   : > { %v4962_v24 = vmul.f32 0.48235294, %v6739_v38  ;;  %v4772_v58 = vadd.f32 %v9064_v16, %v4704_v18  ;;  %v4702_v6 = vadd.f32 %v9036_v32, %v4666_v55  ;;  %v4669_v63 = vmul.f32 %v6530_v48, %v9001_v42 }
 0x40b   : > { %v5636_v27 = vpack.c.bf16 %v4964_v22, %v4963_v60  ;;  %v4871_v29 = vmin.f32 %v4839_v9, 123.0  ;;  %v4837_v13 = vmax.f32 %v4805_v59, 0.0  ;;  %v4707_v14 = vadd.f32 %v9036_v32, %v4671_v8 }
 0x40c   : > { %v5631_v52 = vpack.c.bf16 %v4962_v24, %v4961_v20  ;;  %v4808_v3 = vadd.f32 %v9083_v56, %v4772_v58  ;;  %v4770_v2 = vadd.f32 %v9068_v33, %v4702_v6  ;;  %v6533_v45 = vadd.f32 %v8951_v53, %v6406_v10 }
 0x40d   : > { %5684 = vst [vmem:[%s9150_s15 + $0x38] sm:$0xff] %v5636_v27   ;;  %v4903_v62 = vmul.f32 2.0731707, %v4871_v29  ;;  %v4869_v16 = vmin.f32 %v4837_v13, 123.0  ;;  %v4775_v36 = vadd.f32 %v9074_v35, %v4707_v14  ;;  %v4705_v25 = vadd.f32 %v9036_v32, %v4669_v63 }
 0x40e   : > { %5683 = vst [vmem:[%s9150_s15 + $0x30] sm:$0xff] %v5631_v52   ;;  %v4840_v60 = vmax.f32 %v4808_v3, 0.0  ;;  %v4806_v15 = vadd.f32 %v9083_v56, %v4770_v2  ;;  %v4672_v54 = vmul.f32 %v6533_v45, %v9001_v42  ;;  %v6536_v20 = vadd.f32 %v8945_v1, %v4238_v31  ;;  %v6413_v11 = vpop.f32.mrb[72].mxu1 }
 0x40f   : > { %v6744_v19 = vround.rtne.f32 %v4903_v62  ;;  %v4901_v33 = vmul.f32 2.0731707, %v4869_v16  ;;  %v4811_v53 = vadd.f32 %v9083_v56, %v4775_v36  ;;  %v4773_v10 = vadd.f32 %v9078_v41, %v4705_v25  ;;  %v4267_v44 = vpop.f32.mrb[73].mxu1 }
 0x410   : > { %v4872_v4 = vmin.f32 %v4840_v60, 123.0  ;;  %v4838_v35 = vmax.f32 %v4806_v15, 0.0  ;;  %v4670_v17 = vmul.f32 %v6536_v20, %v9001_v42  ;;  %v4708_v12 = vadd.f32 %v9036_v32, %v4672_v54  ;;  %v9239_v28 = vpop.f32.mrb[74].mxu1 }
 0x411   : > { %v4967_v38 = vmul.f32 0.48235294, %v6744_v19  ;;  %v6742_v55 = vround.rtne.f32 %v4901_v33  ;;  %v4843_v18 = vmax.f32 %v4811_v53, 0.0  ;;  %v4809_v1 = vadd.f32 %v9083_v56, %v4773_v10  ;;  %v9242_v31 = vpop.f32.mrb[75].mxu1 }
 0x412   : > { %v4904_v48 = vmul.f32 2.0731707, %v4872_v4  ;;  %v4870_v22 = vmin.f32 %v4838_v35, 123.0  ;;  %v4776_v41 = vadd.f32 %v9089_v61, %v4708_v12  ;;  %v4706_v9 = vadd.f32 %v9036_v32, %v4670_v17 }
 0x413   : > { %v4965_v59 = vmul.f32 0.48235294, %v6742_v55  ;;  %v4875_v8 = vmin.f32 %v4843_v18, 123.0  ;;  %v4841_v24 = vmax.f32 %v4809_v1, 0.0  ;;  %v6539_v58 = vadd.f32 %v8960_v21, %v6409_v57 }
 0x414   : > { %v6745_v6 = vround.rtne.f32 %v4904_v48  ;;  %v4902_v63 = vmul.f32 2.0731707, %v4870_v22  ;;  %v4812_v27 = vadd.f32 %v9083_v56, %v4776_v41  ;;  %v4774_v29 = vadd.f32 %v9093_v34, %v4706_v9 }
 0x415   : > { %v4907_v13 = vmul.f32 2.0731707, %v4875_v8  ;;  %v4873_v14 = vmin.f32 %v4841_v24, 123.0  ;;  %v4675_v52 = vmul.f32 %v6539_v58, %v9001_v42  ;;  %v6542_v61 = vadd.f32 %v8954_v43, %v9210_v40 }
 0x416   : > { %v4968_v3 = vmul.f32 0.48235294, %v6745_v6  ;;  %v6743_v2 = vround.rtne.f32 %v4902_v63  ;;  %v4844_v45 = vmax.f32 %v4812_v27, 0.0  ;;  %v4810_v62 = vadd.f32 %v9083_v56, %v4774_v29 }
 0x417   : > { %v6748_v21 = vround.rtne.f32 %v4907_v13  ;;  %v4905_v57 = vmul.f32 2.0731707, %v4873_v14  ;;  %v4673_v16 = vmul.f32 %v6542_v61, %v9001_v42  ;;  %v4711_v36 = vadd.f32 %v9036_v32, %v4675_v52 }
 0x418   : > { %v5646_v34 = vpack.c.bf16 %v4968_v3, %v4967_v38  ;;  %v4966_v25 = vmul.f32 0.48235294, %v6743_v2  ;;  %v4876_v60 = vmin.f32 %v4844_v45, 123.0  ;;  %v4842_v15 = vmax.f32 %v4810_v62, 0.0  ;;  %v9575_v2 = vld [vmem:[#allocation19_spill] sm:$0xff]  ;;  %v9577_v45 = vld [vmem:[#allocation17_spill] sm:$0xff] }
 0x419   : > { %v4971_v54 = vmul.f32 0.48235294, %v6748_v21  ;;  %v6746_v20 = vround.rtne.f32 %v4905_v57  ;;  %v4779_v43 = vadd.f32 %v9098_v0, %v4711_v36  ;;  %v6545_v40 = vadd.f32 %v8963_v51, %v9215_v39 }
 0x41a   : > { %5686 = vst [vmem:[%s9150_s15 + $0x48] sm:$0xff] %v5646_v34   ;;  %v5641_v19 = vpack.c.bf16 %v4966_v25, %v4965_v59  ;;  %v4908_v33 = vmul.f32 2.0731707, %v4876_v60  ;;  %v4874_v53 = vmin.f32 %v4842_v15, 123.0  ;;  %v4709_v10 = vadd.f32 %v9036_v32, %v4673_v16 }
 0x41b   : > { %v4969_v4 = vmul.f32 0.48235294, %v6746_v20  ;;  %v4815_v35 = vadd.f32 %v9083_v56, %v4779_v43  ;;  %v4676_v17 = vmul.f32 %v6545_v40, %v9001_v42  ;;  %v6548_v12 = vadd.f32 %v8957_v5, %v9219_v49  ;;  %v9578_v40 = vld [vmem:[#allocation18_spill] sm:$0xff] }
 0x41c   : > { %5685 = vst [vmem:[%s9150_s15 + $0x40] sm:$0xff] %v5641_v19   ;;  %v6749_v38 = vround.rtne.f32 %v4908_v33  ;;  %v4906_v0 = vmul.f32 2.0731707, %v4874_v53  ;;  %v4777_v55 = vadd.f32 %v9102_v23, %v4709_v10  ;;  %v6551_v51 = vadd.f32 %v8977_v26, %v6413_v11 }
 0x41d   : > { %v4847_v39 = vmax.f32 %v4815_v35, 0.0  ;;  %v4674_v18 = vmul.f32 %v6548_v12, %v9001_v42  ;;  %v4712_v1 = vadd.f32 %v9036_v32, %v4676_v17  ;;  %v6554_v48 = vadd.f32 %v8966_v46, %v4267_v44 }
 0x41e   : > { %v4972_v22 = vmul.f32 0.48235294, %v6749_v38  ;;  %v6747_v41 = vround.rtne.f32 %v4906_v0  ;;  %v4813_v9 = vadd.f32 %v9083_v56, %v4777_v55  ;;  %v4679_v5 = vmul.f32 %v6551_v51, %v9001_v42 }
 0x41f   : > { %v4879_v49 = vmin.f32 %v4847_v39, 123.0  ;;  %v4780_v59 = vadd.f32 %v9107_v47, %v4712_v1  ;;  %v4710_v23 = vadd.f32 %v9036_v32, %v4674_v18  ;;  %v4677_v26 = vmul.f32 %v6554_v48, %v9001_v42 }
 0x420   : > { %v5656_v11 = vpack.c.bf16 %v4972_v22, %v4971_v54  ;;  %v4970_v8 = vmul.f32 0.48235294, %v6747_v41  ;;  %v4845_v24 = vmax.f32 %v4813_v9, 0.0  ;;  %v4715_v46 = vadd.f32 %v9036_v32, %v4679_v5 }
 0x421   : > { %v4911_v44 = vmul.f32 2.0731707, %v4879_v49  ;;  %v4816_v58 = vadd.f32 %v9083_v56, %v4780_v59  ;;  %v4778_v6 = vadd.f32 %v9111_v30, %v4710_v23  ;;  %v6557_v63 = vadd.f32 %v8984_v7, %v9239_v28  ;;  %v9576_v28 = vld [vmem:[#allocation20_spill] sm:$0xff] }
 0x422   : > { %5688 = vst [vmem:[%s9150_s15 + $0x58] sm:$0xff] %v5656_v11   ;;  %v5651_v47 = vpack.c.bf16 %v4970_v8, %v4969_v4  ;;  %v4877_v27 = vmin.f32 %v4845_v24, 123.0  ;;  %v4783_v29 = vadd.f32 %v9117_v50, %v4715_v46  ;;  %v4713_v13 = vadd.f32 %v9036_v32, %v4677_v26 }
 0x423   : > { %v4848_v14 = vmax.f32 %v4816_v58, 0.0  ;;  %v4814_v52 = vadd.f32 %v9083_v56, %v4778_v6  ;;  %v4680_v61 = vmul.f32 %v6557_v63, %v9001_v42  ;;  %v6560_v7 = vadd.f32 %v9575_v2, %v9242_v31 }
 0x424   : > { %5687 = vst [vmem:[%s9150_s15 + $0x50] sm:$0xff] %v5651_v47   ;;  %v4819_v3 = vadd.f32 %v9083_v56, %v4783_v29  ;;  %v4781_v30 = vadd.f32 %v9123_v37, %v4713_v13  ;;  %v4752_v62 = vmul.f32 %v9577_v45, %v9576_v28  ;;  %v4909_v21 = vmul.f32 2.0731707, %v4877_v27 }
 0x425   : > { %v4880_v50 = vmin.f32 %v4848_v14, 123.0  ;;  %v4846_v57 = vmax.f32 %v4814_v52, 0.0  ;;  %v4716_v16 = vadd.f32 %v9036_v32, %v4680_v61  ;;  %v6752_v36 = vround.rtne.f32 %v4911_v44 }
 0x426   : > { %v4851_v34 = vmax.f32 %v4819_v3, 0.0  ;;  %v4817_v25 = vadd.f32 %v9083_v56, %v4781_v30  ;;  %v4678_v60 = vmul.f32 %v6560_v7, %v9001_v42  ;;  %v4750_v19 = vmul.f32 %v9576_v28, %v9578_v40 }
 0x427   : > { %v4912_v15 = vmul.f32 2.0731707, %v4880_v50  ;;  %v4878_v54 = vmin.f32 %v4846_v57, 123.0  ;;  %v4784_v37 = vadd.f32 %v4752_v62, %v4716_v16  ;;  %v6750_v33 = vround.rtne.f32 %v4909_v21 }
 0x428   : > { %v4883_v20 = vmin.f32 %v4851_v34, 123.0  ;;  %v4849_v43 = vmax.f32 %v4817_v25, 0.0  ;;  %v4714_v31 = vadd.f32 %v9036_v32, %v4678_v60  ;;  %v4975_v35 = vmul.f32 0.48235294, %v6752_v36 }
 0x429   : > { %v6753_v53 = vround.rtne.f32 %v4912_v15  ;;  %v4910_v10 = vmul.f32 2.0731707, %v4878_v54  ;;  %v4820_v4 = vadd.f32 %v9083_v56, %v4784_v37  ;;  %v4973_v32 = vmul.f32 0.48235294, %v6750_v33 }
 0x42a   : > { %v4881_v17 = vmin.f32 %v4849_v43, 123.0  ;;  %v4782_v12 = vadd.f32 %v4750_v19, %v4714_v31  ;;  %v4915_v0 = vmul.f32 2.0731707, %v4883_v20 }
 0x42b   : > { %v4976_v42 = vmul.f32 0.48235294, %v6753_v53  ;;  %v6751_v38 = vround.rtne.f32 %v4910_v10  ;;  %v4852_v55 = vmax.f32 %v4820_v4, 0.0 }
 0x42c   : > { %v4818_v51 = vadd.f32 %v9083_v56, %v4782_v12  ;;  %v4913_v48 = vmul.f32 2.0731707, %v4881_v17  ;;  %v6756_v9 = vround.rtne.f32 %v4915_v0 }
 0x42d   : > { %v5666_v39 = vpack.c.bf16 %v4976_v42, %v4975_v35  ;;  %v4974_v18 = vmul.f32 0.48235294, %v6751_v38  ;;  %v4884_v1 = vmin.f32 %v4852_v55, 123.0 }
 0x42e   : > { %v4850_v22 = vmax.f32 %v4818_v51, 0.0  ;;  %v6754_v23 = vround.rtne.f32 %v4913_v48  ;;  %v4979_v11 = vmul.f32 0.48235294, %v6756_v9 }
 0x42f   : > { %5690 = vst [vmem:[%s9150_s15 + $0x68] sm:$0xff] %v5666_v39   ;;  %v5661_v41 = vpack.c.bf16 %v4974_v18, %v4973_v32  ;;  %v4916_v5 = vmul.f32 2.0731707, %v4884_v1 }
 0x430   : > { %v4882_v49 = vmin.f32 %v4850_v22, 123.0  ;;  %v4977_v46 = vmul.f32 0.48235294, %v6754_v23 }
 0x431   : > { %5689 = vst [vmem:[%s9150_s15 + $0x60] sm:$0xff] %v5661_v41   ;;  %v6757_v59 = vround.rtne.f32 %v4916_v5 }
 0x432   : > { %v4914_v26 = vmul.f32 2.0731707, %v4882_v49 }
 0x433   : > { %v4980_v8 = vmul.f32 0.48235294, %v6757_v59 }
 0x434   : > { %v6755_v56 = vround.rtne.f32 %v4914_v26 }
 0x435   : > { %v5676_v24 = vpack.c.bf16 %v4980_v8, %v4979_v11 }
 0x436   : > { %v4978_v44 = vmul.f32 0.48235294, %v6755_v56 }
 0x437   : > { %5692 = vst [vmem:[%s9150_s15 + $0x78] sm:$0xff] %v5676_v24  }
 0x438   : > { %v5671_v58 = vpack.c.bf16 %v4978_v44, %v4977_v46 }
 0x43a   : > { %5691 = vst [vmem:[%s9150_s15 + $0x70] sm:$0xff] %v5671_v58  }
 0x43b PF: > { %s15_s18 = sadd.s32 1, %s6909_s18  }
 0x43c   : > { %p12_p4 = scmp.ge.s32.totalorder %s15_s18, 4  }
 0x43e   :  { %14 = sbr.rel (!%p12_p4) target bundleno = 1 (0x1), region = 74 }

</bundles_post_ra>
